<compile_context>
chip_gen: v5e
topology: v5e:2x2
jax: 0.10.0
libtpu: 0.0.40
codegen_flags: <defaults>
</compile_context>

<pallas_src>
import functools

import jax
import jax.numpy as jnp
from jax.experimental import pallas as pl
from jax.experimental.pallas import tpu as pltpu

# ----------------------------- "hp" hyperparameters (small, synthetic) ------
ENCODER_HIDDEN = 32          # hp.encoder_hidden
FILTER_SIZE = 32             # hp.variance_predictor_filter_size
KERNEL = 3                   # hp.variance_predictor_kernel_size
N_BINS = 32                  # hp.n_bins
F0_MIN, F0_MAX = 71.0, 795.8
ENERGY_MIN, ENERGY_MAX = 0.0, 315.0
LOG_OFFSET = 1.0             # hp.log_offset
LN_EPS = 1e-5                # torch nn.LayerNorm default


# ----------------------------- shared predictor body (transposed layout) -----
def _lane_masks(width):
    """[1, width] masks: zero the conv taps that fall off the sequence ends."""
    pos = jax.lax.broadcasted_iota(jnp.int32, (1, width), 1)
    prev_m = (pos != 0).astype(jnp.float32)          # t==0 has no x[t-1]
    next_m = (pos != width - 1).astype(jnp.float32)  # t==last has no x[t+1]
    return prev_m, next_m


def _conv_relu_ln(inp, w_taps, b_col, g_col, be_col, prev_m, next_m):
    """k=3 'same' conv -> ReLU -> LayerNorm over channels.

    inp:    [C, T] f32 (channels on sublanes, time on lanes)
    w_taps: [3, F, C] bf16  (tap order: x[t-1], x[t], x[t+1])
    b/g/be: [F, 1] f32
    masks:  [1, T] f32 (applied AFTER the matmul; valid since they are per-col)
    """
    t = inp.shape[-1]
    prev = pltpu.roll(inp, 1, 1)          # column t holds x[:, t-1]   (XLU)
    nxt = pltpu.roll(inp, t - 1, 1)       # column t holds x[:, t+1]   (XLU)
    f32 = jnp.float32
    h = (jnp.dot(w_taps[0], prev.astype(jnp.bfloat16),
                 preferred_element_type=f32) * prev_m
         + jnp.dot(w_taps[1], inp.astype(jnp.bfloat16),
                   preferred_element_type=f32)
         + jnp.dot(w_taps[2], nxt.astype(jnp.bfloat16),
                   preferred_element_type=f32) * next_m
         + b_col)
    h = jnp.maximum(h, 0.0)                                    # ReLU
    mu = jnp.mean(h, axis=0, keepdims=True)                    # LN over channels
    var = jnp.mean(jnp.square(h - mu), axis=0, keepdims=True)
    return (h - mu) * jax.lax.rsqrt(var + LN_EPS) * g_col + be_col
    # dropout: identity (inference)


def _predictor_core(x, w1_taps, w2_taps, vec, wl_row, prev_m, next_m):
    """conv3->ReLU->LN (x2) -> linear.  Returns un-masked prediction [1, T].

    x:       [Cin, T] f32
    w1_taps: [3, F, Cin] bf16,  w2_taps: [3, F, F] bf16
    vec:     [F, 8] f32   cols: b1 g1 be1 b2 g2 be2 bl pad
    wl_row:  [1, F] bf16
    """
    h = _conv_relu_ln(x, w1_taps, vec[:, 0:1], vec[:, 1:2], vec[:, 2:3],
                      prev_m, next_m)
    h = _conv_relu_ln(h, w2_taps, vec[:, 3:4], vec[:, 4:5], vec[:, 5:6],
                      prev_m, next_m)
    bl = vec[0:1, 6:7]                                          # [1, 1]
    pred = jnp.dot(wl_row, h.astype(jnp.bfloat16),
                   preferred_element_type=jnp.float32) + bl     # [1, T]
    return pred


# ----------------------------- Kernel A: duration predictor ------------------
def _duration_kernel(x_ref, keep_ref, w1_ref, w2_ref, vec_ref, wl_ref,
                     ld_ref, dur_ref, *, d_control):
    x = x_ref[0]                                   # [H, T] f32
    keep = keep_ref[0]                             # [1, T] f32 (1 = not masked)
    t = x.shape[-1]
    prev_m, next_m = _lane_masks(t)

    pred = _predictor_core(x, w1_ref[...], w2_ref[...], vec_ref[...],
                           wl_ref[...], prev_m, next_m)
    log_dur = pred * keep                          # masked_fill(mask, 0)

    # fused duration post-processing (exp -> EUP, rest VPU):
    # clamp(round(exp(ld) - log_offset) * d_control, min=0) -> int
    dur_f = jnp.maximum(jnp.round(jnp.exp(log_dur) - LOG_OFFSET) * d_control,
                        0.0)
    ld_ref[0] = log_dur
    dur_ref[0] = dur_f.astype(jnp.int32)


def duration_predictor(x_t, keep_src, p, *, d_control):
    """x_t: [B, H, T], keep_src: [B, 1, T] -> (log_dur [B,T], dur_rounded [B,T] int32)."""
    B, H, T = x_t.shape
    F = FILTER_SIZE
    kern = functools.partial(_duration_kernel, d_control=d_control)
    log_dur, dur = pl.pallas_call(
        kern,
        out_shape=(jax.ShapeDtypeStruct((B, 1, T), jnp.float32),
                   jax.ShapeDtypeStruct((B, 1, T), jnp.int32)),
        grid_spec=pltpu.PrefetchScalarGridSpec(
            num_scalar_prefetch=0,
            grid=(B,),
            in_specs=[
                pl.BlockSpec((1, H, T), lambda b: (b, 0, 0)),
                pl.BlockSpec((1, 1, T), lambda b: (b, 0, 0)),
                pl.BlockSpec((3, F, H), lambda b: (0, 0, 0)),   # resident weight
                pl.BlockSpec((3, F, F), lambda b: (0, 0, 0)),
                pl.BlockSpec((F, 8), lambda b: (0, 0)),
                pl.BlockSpec((1, F), lambda b: (0, 0)),
            ],
            out_specs=(pl.BlockSpec((1, 1, T), lambda b: (b, 0, 0)),
                       pl.BlockSpec((1, 1, T), lambda b: (b, 0, 0))),
        ),
        compiler_params=pltpu.CompilerParams(
            dimension_semantics=("parallel",),       # v7x: shard batch on 2 TCs
            vmem_limit_bytes=32 * 1024 * 1024),      # raises v5e 16 MiB default
    )(x_t, keep_src, p["w1"], p["w2"], p["vec"], p["wl"])
    return log_dur[:, 0, :], dur[:, 0, :]


# -------- Kernel B: fused length-regulator gather + pitch/energy + embeddings -
def _pitch_energy_kernel(x_ref, idx_ref, w1_ref, w2_ref, vec_ref, wl_ref,
                         bins_ref, embT_ref, xo_ref, pp_ref, ep_ref,
                         *, n_bins, p_control, e_control):
    x_src = x_ref[0]                               # [H, T] f32 (encoder output)
    idx = idx_ref[0]                               # [1, M] int32; == T for pad
    T = x_src.shape[-1]
    M = idx.shape[-1]

    # ---- length regulation as a one-hot gather on the MXU (x_mel stays in VMEM)
    tt = jax.lax.broadcasted_iota(jnp.int32, (T, M), 0)
    gath = (tt == idx).astype(jnp.float32)                     # [T, M]
    x_mel = jnp.dot(x_src, gath, preferred_element_type=jnp.float32)  # [H, M]

    keep = (idx < T).astype(jnp.float32)                       # [1, M]
    prev_m, next_m = _lane_masks(M)

    def branch(i, control):
        pred = _predictor_core(x_mel, w1_ref[i], w2_ref[i], vec_ref[i],
                               wl_ref[i], prev_m, next_m)       # [1, M]
        pred = pred * keep * control                            # masked_fill, *ctl
        bins = bins_ref[i]                                      # [n_bins-1, 1]
        # torch.bucketize(right=False) == count of boundaries strictly < value
        bidx = jnp.sum((pred > bins).astype(jnp.int32),
                       axis=0, keepdims=True)                   # [1, M]
        return pred, bidx

    pred_p, bidx_p = branch(0, p_control)
    pred_e, bidx_e = branch(1, e_control)

    # ---- merged pitch+energy embedding lookup: one one-hot, one MXU matmul
    kk = jax.lax.broadcasted_iota(jnp.int32, (2 * n_bins, M), 0)
    oh = ((kk == bidx_p) | (kk == (bidx_e + n_bins))).astype(jnp.bfloat16)
    emb = jnp.dot(embT_ref[...], oh, preferred_element_type=jnp.float32)  # [H, M]

    xo_ref[0] = x_mel + emb                                     # residual add
    pp_ref[0] = pred_p
    ep_ref[0] = pred_e


def fused_pitch_energy(x_t, gidx, pe, *, p_control, e_control):
    """x_t: [B, H, T], gidx: [B, 1, max_len] int32 (== T where padded)."""
    B, H, T = x_t.shape
    M = gidx.shape[-1]
    F = FILTER_SIZE
    kern = functools.partial(_pitch_energy_kernel, n_bins=N_BINS,
                             p_control=p_control, e_control=e_control)
    xo_t, pp, ep = pl.pallas_call(
        kern,
        out_shape=(jax.ShapeDtypeStruct((B, H, M), jnp.float32),
                   jax.ShapeDtypeStruct((B, 1, M), jnp.float32),
                   jax.ShapeDtypeStruct((B, 1, M), jnp.float32)),
        grid_spec=pltpu.PrefetchScalarGridSpec(
            num_scalar_prefetch=0,
            grid=(B,),
            in_specs=[
                pl.BlockSpec((1, H, T), lambda b: (b, 0, 0)),
                pl.BlockSpec((1, 1, M), lambda b: (b, 0, 0)),
                pl.BlockSpec((2, 3, F, H), lambda b: (0, 0, 0, 0)),
                pl.BlockSpec((2, 3, F, F), lambda b: (0, 0, 0, 0)),
                pl.BlockSpec((2, F, 8), lambda b: (0, 0, 0)),
                pl.BlockSpec((2, 1, F), lambda b: (0, 0, 0)),
                pl.BlockSpec((2, N_BINS - 1, 1), lambda b: (0, 0, 0)),
                pl.BlockSpec((H, 2 * N_BINS), lambda b: (0, 0)),
            ],
            out_specs=(pl.BlockSpec((1, H, M), lambda b: (b, 0, 0)),
                       pl.BlockSpec((1, 1, M), lambda b: (b, 0, 0)),
                       pl.BlockSpec((1, 1, M), lambda b: (b, 0, 0))),
        ),
        compiler_params=pltpu.CompilerParams(
            dimension_semantics=("parallel",),
            vmem_limit_bytes=32 * 1024 * 1024),
    )(x_t, gidx, pe["w1"], pe["w2"], pe["vec"], pe["wl"], pe["bins"], pe["embT"])
    # back to [B, max_len, H] for the module's output contract (layout plumbing)
    return jnp.transpose(xo_t, (0, 2, 1)), pp[:, 0, :], ep[:, 0, :]


# ----------------------------- Full VarianceAdaptor forward ------------------
def variance_adaptor_forward(x, src_mask, params, *, max_len,
                             d_control=1.0, p_control=1.0, e_control=1.0):
    B, T, H = x.shape
    x_t = jnp.transpose(x, (0, 2, 1))                         # [B, H, T]
    keep_src = jnp.logical_not(src_mask).astype(jnp.float32)[:, None, :]

    # Kernel A: duration predictor + fused exp/round/clamp/int post-processing.
    log_duration_prediction, duration_rounded = duration_predictor(
        x_t, keep_src, params["duration"], d_control=d_control)

    # Length-regulator index computation (small JAX glue).  The gather itself is
    # fused into kernel B as a one-hot MXU matmul, so x_mel never hits HBM.
    # TODO(synk): truly dynamic (data-dependent) output lengths are not
    # expressible; output is padded to a static max_len instead of the python
    # list+pad path of the reference LengthRegulator.
    cum = jnp.cumsum(duration_rounded, axis=1)                 # [B, T] int32
    mel_len = jnp.minimum(cum[:, -1], max_len).astype(jnp.int32)
    frames = jnp.arange(max_len, dtype=cum.dtype)
    gidx = jax.vmap(lambda c: jnp.searchsorted(c, frames, side="right"))(cum)
    gidx = jnp.minimum(gidx, T - 1).astype(jnp.int32)
    valid = frames[None, :] < mel_len[:, None]
    mel_mask = jnp.logical_not(valid)                          # True = padded
    gidx = jnp.where(valid, gidx, T)[:, None, :]               # T == pad sentinel

    # Kernel B: gather + pitch/energy predictors + bucketize + embeddings + add.
    x_out, pitch_prediction, energy_prediction = fused_pitch_energy(
        x_t, gidx, params["pe"], p_control=p_control, e_control=e_control)

    return (x_out, log_duration_prediction, pitch_prediction,
            energy_prediction, mel_len, mel_mask)


# ----------------------------- deterministic parameter init ------------------
def _xavier(key, shape, fan_in, fan_out):
    std = (2.0 / (fan_in + fan_out)) ** 0.5
    return std * jax.random.normal(key, shape, dtype=jnp.float32)


def init_predictor_params(key, in_dim, filt):
    k1, k2, k3 = jax.random.split(key, 3)
    # packed per-channel vectors: cols = b1, g1, be1, b2, g2, be2, bl, pad
    vec = jnp.zeros((filt, 8), jnp.float32)
    vec = vec.at[:, 1].set(1.0)   # LayerNorm1 gamma
    vec = vec.at[:, 4].set(1.0)   # LayerNorm2 gamma
    return dict(
        # conv weights per tap: [3, F, Cin], tap order x[t-1], x[t], x[t+1]
        w1=_xavier(k1, (KERNEL, filt, in_dim),
                   in_dim * KERNEL, filt).astype(jnp.bfloat16),
        w2=_xavier(k2, (KERNEL, filt, filt),
                   filt * KERNEL, filt).astype(jnp.bfloat16),
        vec=vec,
        wl=_xavier(k3, (1, filt), filt, 1).astype(jnp.bfloat16),
    )


def init_params(key):
    kd, kp, ke, kpe, kee = jax.random.split(key, 5)
    dur = init_predictor_params(kd, ENCODER_HIDDEN, FILTER_SIZE)
    pit = init_predictor_params(kp, ENCODER_HIDDEN, FILTER_SIZE)
    ene = init_predictor_params(ke, ENCODER_HIDDEN, FILTER_SIZE)
    pitch_bins = jnp.exp(jnp.linspace(jnp.log(F0_MIN), jnp.log(F0_MAX),
                                      N_BINS - 1)).astype(jnp.float32)
    energy_bins = jnp.linspace(ENERGY_MIN, ENERGY_MAX,
                               N_BINS - 1).astype(jnp.float32)
    emb_p = jax.random.normal(kpe, (N_BINS, ENCODER_HIDDEN), jnp.float32)
    emb_e = jax.random.normal(kee, (N_BINS, ENCODER_HIDDEN), jnp.float32)
    # pitch (index 0) and energy (index 1) packed for the fused kernel B
    pe = dict(
        w1=jnp.stack([pit["w1"], ene["w1"]]),                    # [2, 3, F, H]
        w2=jnp.stack([pit["w2"], ene["w2"]]),                    # [2, 3, F, F]
        vec=jnp.stack([pit["vec"], ene["vec"]]),                 # [2, F, 8]
        wl=jnp.stack([pit["wl"], ene["wl"]]),                    # [2, 1, F]
        bins=jnp.stack([pitch_bins, energy_bins])[:, :, None],   # [2, NB-1, 1]
        embT=jnp.concatenate([emb_p.T, emb_e.T],
                             axis=1).astype(jnp.bfloat16),       # [H, 2*NB]
    )
    return dict(duration=dur, pe=pe)


# ----------------------------- demo ------------------------------------------
if __name__ == "__main__":
    key = jax.random.PRNGKey(0)
    k_param, k_x = jax.random.split(key, 2)

    B, T_SRC, MAX_LEN = 2, 8, 16
    params = init_params(k_param)
    x = jax.random.normal(k_x, (B, T_SRC, ENCODER_HIDDEN), dtype=jnp.float32)
    src_lengths = jnp.array([8, 5], dtype=jnp.int32)
    src_mask = jnp.arange(T_SRC)[None, :] >= src_lengths[:, None]   # True = padded

    fwd = jax.jit(functools.partial(variance_adaptor_forward, max_len=MAX_LEN))
    outs = fwd(x, src_mask, params)
    jax.block_until_ready(outs)
    (x_out, log_dur, pitch_pred, energy_pred, mel_len, mel_mask) = outs

    assert x_out.shape == (B, MAX_LEN, ENCODER_HIDDEN)
    assert log_dur.shape == (B, T_SRC)
    assert pitch_pred.shape == (B, MAX_LEN)
    assert energy_pred.shape == (B, MAX_LEN)
    assert mel_len.shape == (B,)
    assert mel_mask.shape == (B, MAX_LEN)
    print("KERNEL_OK")
</pallas_src>

<mosaic_0001>
module attributes {stable_mosaic.version = 11 : i64} {
  func.func @_duration_kernel(%arg0: i32, %arg1: memref<1x32x8xf32, #tpu.memory_space<vmem>>, %arg2: memref<1x1x8xf32, #tpu.memory_space<vmem>>, %arg3: memref<3x32x32xbf16, #tpu.memory_space<vmem>>, %arg4: memref<3x32x32xbf16, #tpu.memory_space<vmem>>, %arg5: memref<32x8xf32, #tpu.memory_space<vmem>>, %arg6: memref<1x32xbf16, #tpu.memory_space<vmem>>, %arg7: memref<1x1x8xf32, #tpu.memory_space<vmem>>, %arg8: memref<1x1x8xi32, #tpu.memory_space<vmem>>) attributes {dimension_semantics = [#tpu.dimension_semantics<parallel>], iteration_bounds = array<i64: 2>, scalar_prefetch = 0 : i64, scratch_operands = 0 : i64, tpu.core_type = #tpu.core_type<tc>, window_params = [{transform_indices = @transform_0, window_bounds = array<i64: 1, 32, 8>}, {transform_indices = @transform_1, window_bounds = array<i64: 1, 1, 8>}, {pipeline_mode = #tpu.pipeline_mode<synchronous>, transform_indices = @transform_2, window_bounds = array<i64: 3, 32, 32>}, {pipeline_mode = #tpu.pipeline_mode<synchronous>, transform_indices = @transform_3, window_bounds = array<i64: 3, 32, 32>}, {pipeline_mode = #tpu.pipeline_mode<synchronous>, transform_indices = @transform_4, window_bounds = array<i64: 32, 8>}, {pipeline_mode = #tpu.pipeline_mode<synchronous>, transform_indices = @transform_5, window_bounds = array<i64: 1, 32>}, {transform_indices = @transform_6, window_bounds = array<i64: 1, 1, 8>}, {transform_indices = @transform_7, window_bounds = array<i64: 1, 1, 8>}]} {
    %c0 = arith.constant 0 : index
    %c0_0 = arith.constant 0 : index
    %c0_1 = arith.constant 0 : index
    %0 = vector.load %arg1[%c0, %c0_0, %c0_1] : memref<1x32x8xf32, #tpu.memory_space<vmem>>, vector<1x32x8xf32>
    %1 = vector.shape_cast %0 : vector<1x32x8xf32> to vector<32x8xf32>
    %c0_2 = arith.constant 0 : index
    %c0_3 = arith.constant 0 : index
    %c0_4 = arith.constant 0 : index
    %2 = vector.load %arg2[%c0_2, %c0_3, %c0_4] : memref<1x1x8xf32, #tpu.memory_space<vmem>>, vector<1x1x8xf32>
    %3 = vector.shape_cast %2 : vector<1x1x8xf32> to vector<1x8xf32>
    %4 = tpu.iota {dimensions = array<i32: 1>} : vector<1x8xi32>
    %c0_i32 = arith.constant 0 : i32
    %5 = vector.broadcast %c0_i32 : i32 to vector<1x8xi32>
    %6 = arith.cmpi ne, %4, %5 : vector<1x8xi32>
    %7 = arith.extui %6 : vector<1x8xi1> to vector<1x8xi32>
    %8 = arith.sitofp %7 : vector<1x8xi32> to vector<1x8xf32>
    %c7_i32 = arith.constant 7 : i32
    %9 = vector.broadcast %c7_i32 : i32 to vector<1x8xi32>
    %10 = arith.cmpi ne, %4, %9 : vector<1x8xi32>
    %11 = arith.extui %10 : vector<1x8xi1> to vector<1x8xi32>
    %12 = arith.sitofp %11 : vector<1x8xi32> to vector<1x8xf32>
    %c0_5 = arith.constant 0 : index
    %c0_6 = arith.constant 0 : index
    %c0_7 = arith.constant 0 : index
    %13 = vector.load %arg3[%c0_5, %c0_6, %c0_7] : memref<3x32x32xbf16, #tpu.memory_space<vmem>>, vector<3x32x32xbf16>
    %c0_8 = arith.constant 0 : index
    %c0_9 = arith.constant 0 : index
    %c0_10 = arith.constant 0 : index
    %14 = vector.load %arg4[%c0_8, %c0_9, %c0_10] : memref<3x32x32xbf16, #tpu.memory_space<vmem>>, vector<3x32x32xbf16>
    %c0_11 = arith.constant 0 : index
    %c0_12 = arith.constant 0 : index
    %15 = vector.load %arg5[%c0_11, %c0_12] : memref<32x8xf32, #tpu.memory_space<vmem>>, vector<32x8xf32>
    %c0_13 = arith.constant 0 : index
    %c0_14 = arith.constant 0 : index
    %16 = vector.load %arg6[%c0_13, %c0_14] : memref<1x32xbf16, #tpu.memory_space<vmem>>, vector<1x32xbf16>
    %17 = vector.extract_strided_slice %15 {offsets = [0, 0], sizes = [32, 1], strides = [1, 1]} : vector<32x8xf32> to vector<32x1xf32>
    %18 = vector.extract_strided_slice %15 {offsets = [0, 1], sizes = [32, 1], strides = [1, 1]} : vector<32x8xf32> to vector<32x1xf32>
    %19 = vector.extract_strided_slice %15 {offsets = [0, 2], sizes = [32, 1], strides = [1, 1]} : vector<32x8xf32> to vector<32x1xf32>
    %c1_i32 = arith.constant 1 : i32
    %20 = tpu.dynamic_rotate %1 by %c1_i32 dim 1 : vector<32x8xf32>, i32 -> vector<32x8xf32>
    %c7_i32_15 = arith.constant 7 : i32
    %21 = tpu.dynamic_rotate %1 by %c7_i32_15 dim 1 : vector<32x8xf32>, i32 -> vector<32x8xf32>
    %22 = vector.extract_strided_slice %13 {offsets = [0, 0, 0], sizes = [1, 32, 32], strides = [1, 1, 1]} : vector<3x32x32xbf16> to vector<1x32x32xbf16>
    %23 = vector.shape_cast %22 : vector<1x32x32xbf16> to vector<32x32xbf16>
    %24 = arith.truncf %20 : vector<32x8xf32> to vector<32x8xbf16>
    %cst = arith.constant dense<0.000000e+00> : vector<32x8xf32>
    %25 = tpu.matmul %23, %24, %cst {dimension_numbers = #tpu.dot_dimension_numbers<[1], [0], [0], [1], [0, 0, 1, 1], [], []>} : vector<32x32xbf16>, vector<32x8xbf16>, vector<32x8xf32> -> vector<32x8xf32>
    %26 = vector.broadcast %8 : vector<1x8xf32> to vector<32x8xf32>
    %27 = arith.mulf %25, %26 : vector<32x8xf32>
    %28 = vector.extract_strided_slice %13 {offsets = [1, 0, 0], sizes = [1, 32, 32], strides = [1, 1, 1]} : vector<3x32x32xbf16> to vector<1x32x32xbf16>
    %29 = vector.shape_cast %28 : vector<1x32x32xbf16> to vector<32x32xbf16>
    %30 = arith.truncf %1 : vector<32x8xf32> to vector<32x8xbf16>
    %cst_16 = arith.constant dense<0.000000e+00> : vector<32x8xf32>
    %31 = tpu.matmul %29, %30, %cst_16 {dimension_numbers = #tpu.dot_dimension_numbers<[1], [0], [0], [1], [0, 0, 1, 1], [], []>} : vector<32x32xbf16>, vector<32x8xbf16>, vector<32x8xf32> -> vector<32x8xf32>
    %32 = arith.addf %27, %31 : vector<32x8xf32>
    %33 = vector.extract_strided_slice %13 {offsets = [2, 0, 0], sizes = [1, 32, 32], strides = [1, 1, 1]} : vector<3x32x32xbf16> to vector<1x32x32xbf16>
    %34 = vector.shape_cast %33 : vector<1x32x32xbf16> to vector<32x32xbf16>
    %35 = arith.truncf %21 : vector<32x8xf32> to vector<32x8xbf16>
    %cst_17 = arith.constant dense<0.000000e+00> : vector<32x8xf32>
    %36 = tpu.matmul %34, %35, %cst_17 {dimension_numbers = #tpu.dot_dimension_numbers<[1], [0], [0], [1], [0, 0, 1, 1], [], []>} : vector<32x32xbf16>, vector<32x8xbf16>, vector<32x8xf32> -> vector<32x8xf32>
    %37 = vector.broadcast %12 : vector<1x8xf32> to vector<32x8xf32>
    %38 = arith.mulf %36, %37 : vector<32x8xf32>
    %39 = arith.addf %32, %38 : vector<32x8xf32>
    %40 = vector.broadcast %17 : vector<32x1xf32> to vector<32x8xf32>
    %41 = arith.addf %39, %40 : vector<32x8xf32>
    %cst_18 = arith.constant 0.000000e+00 : f32
    %42 = vector.broadcast %cst_18 : f32 to vector<32x8xf32>
    %43 = arith.maximumf %41, %42 : vector<32x8xf32>
    %cst_19 = arith.constant dense<0.000000e+00> : vector<8xf32>
    %44 = vector.multi_reduction <add>, %43, %cst_19 [0] : vector<32x8xf32> to vector<8xf32>
    %45 = vector.shape_cast %44 : vector<8xf32> to vector<1x8xf32>
    %cst_20 = arith.constant 3.200000e+01 : f32
    %46 = vector.broadcast %cst_20 : f32 to vector<1x8xf32>
    %47 = arith.divf %45, %46 : vector<1x8xf32>
    %48 = vector.broadcast %47 : vector<1x8xf32> to vector<32x8xf32>
    %49 = arith.subf %43, %48 : vector<32x8xf32>
    %50 = arith.mulf %49, %49 : vector<32x8xf32>
    %cst_21 = arith.constant dense<0.000000e+00> : vector<8xf32>
    %51 = vector.multi_reduction <add>, %50, %cst_21 [0] : vector<32x8xf32> to vector<8xf32>
    %52 = vector.shape_cast %51 : vector<8xf32> to vector<1x8xf32>
    %cst_22 = arith.constant 3.200000e+01 : f32
    %53 = vector.broadcast %cst_22 : f32 to vector<1x8xf32>
    %54 = arith.divf %52, %53 : vector<1x8xf32>
    %55 = vector.broadcast %47 : vector<1x8xf32> to vector<32x8xf32>
    %56 = arith.subf %43, %55 : vector<32x8xf32>
    %cst_23 = arith.constant 9.99999974E-6 : f32
    %57 = vector.broadcast %cst_23 : f32 to vector<1x8xf32>
    %58 = arith.addf %54, %57 : vector<1x8xf32>
    %59 = math.rsqrt %58 : vector<1x8xf32>
    %60 = vector.broadcast %59 : vector<1x8xf32> to vector<32x8xf32>
    %61 = arith.mulf %56, %60 : vector<32x8xf32>
    %62 = vector.broadcast %18 : vector<32x1xf32> to vector<32x8xf32>
    %63 = arith.mulf %61, %62 : vector<32x8xf32>
    %64 = vector.broadcast %19 : vector<32x1xf32> to vector<32x8xf32>
    %65 = arith.addf %63, %64 : vector<32x8xf32>
    %66 = vector.extract_strided_slice %15 {offsets = [0, 3], sizes = [32, 1], strides = [1, 1]} : vector<32x8xf32> to vector<32x1xf32>
    %67 = vector.extract_strided_slice %15 {offsets = [0, 4], sizes = [32, 1], strides = [1, 1]} : vector<32x8xf32> to vector<32x1xf32>
    %68 = vector.extract_strided_slice %15 {offsets = [0, 5], sizes = [32, 1], strides = [1, 1]} : vector<32x8xf32> to vector<32x1xf32>
    %c1_i32_24 = arith.constant 1 : i32
    %69 = tpu.dynamic_rotate %65 by %c1_i32_24 dim 1 : vector<32x8xf32>, i32 -> vector<32x8xf32>
    %c7_i32_25 = arith.constant 7 : i32
    %70 = tpu.dynamic_rotate %65 by %c7_i32_25 dim 1 : vector<32x8xf32>, i32 -> vector<32x8xf32>
    %71 = vector.extract_strided_slice %14 {offsets = [0, 0, 0], sizes = [1, 32, 32], strides = [1, 1, 1]} : vector<3x32x32xbf16> to vector<1x32x32xbf16>
    %72 = vector.shape_cast %71 : vector<1x32x32xbf16> to vector<32x32xbf16>
    %73 = arith.truncf %69 : vector<32x8xf32> to vector<32x8xbf16>
    %cst_26 = arith.constant dense<0.000000e+00> : vector<32x8xf32>
    %74 = tpu.matmul %72, %73, %cst_26 {dimension_numbers = #tpu.dot_dimension_numbers<[1], [0], [0], [1], [0, 0, 1, 1], [], []>} : vector<32x32xbf16>, vector<32x8xbf16>, vector<32x8xf32> -> vector<32x8xf32>
    %75 = vector.broadcast %8 : vector<1x8xf32> to vector<32x8xf32>
    %76 = arith.mulf %74, %75 : vector<32x8xf32>
    %77 = vector.extract_strided_slice %14 {offsets = [1, 0, 0], sizes = [1, 32, 32], strides = [1, 1, 1]} : vector<3x32x32xbf16> to vector<1x32x32xbf16>
    %78 = vector.shape_cast %77 : vector<1x32x32xbf16> to vector<32x32xbf16>
    %79 = arith.truncf %65 : vector<32x8xf32> to vector<32x8xbf16>
    %cst_27 = arith.constant dense<0.000000e+00> : vector<32x8xf32>
    %80 = tpu.matmul %78, %79, %cst_27 {dimension_numbers = #tpu.dot_dimension_numbers<[1], [0], [0], [1], [0, 0, 1, 1], [], []>} : vector<32x32xbf16>, vector<32x8xbf16>, vector<32x8xf32> -> vector<32x8xf32>
    %81 = arith.addf %76, %80 : vector<32x8xf32>
    %82 = vector.extract_strided_slice %14 {offsets = [2, 0, 0], sizes = [1, 32, 32], strides = [1, 1, 1]} : vector<3x32x32xbf16> to vector<1x32x32xbf16>
    %83 = vector.shape_cast %82 : vector<1x32x32xbf16> to vector<32x32xbf16>
    %84 = arith.truncf %70 : vector<32x8xf32> to vector<32x8xbf16>
    %cst_28 = arith.constant dense<0.000000e+00> : vector<32x8xf32>
    %85 = tpu.matmul %83, %84, %cst_28 {dimension_numbers = #tpu.dot_dimension_numbers<[1], [0], [0], [1], [0, 0, 1, 1], [], []>} : vector<32x32xbf16>, vector<32x8xbf16>, vector<32x8xf32> -> vector<32x8xf32>
    %86 = vector.broadcast %12 : vector<1x8xf32> to vector<32x8xf32>
    %87 = arith.mulf %85, %86 : vector<32x8xf32>
    %88 = arith.addf %81, %87 : vector<32x8xf32>
    %89 = vector.broadcast %66 : vector<32x1xf32> to vector<32x8xf32>
    %90 = arith.addf %88, %89 : vector<32x8xf32>
    %cst_29 = arith.constant 0.000000e+00 : f32
    %91 = vector.broadcast %cst_29 : f32 to vector<32x8xf32>
    %92 = arith.maximumf %90, %91 : vector<32x8xf32>
    %cst_30 = arith.constant dense<0.000000e+00> : vector<8xf32>
    %93 = vector.multi_reduction <add>, %92, %cst_30 [0] : vector<32x8xf32> to vector<8xf32>
    %94 = vector.shape_cast %93 : vector<8xf32> to vector<1x8xf32>
    %cst_31 = arith.constant 3.200000e+01 : f32
    %95 = vector.broadcast %cst_31 : f32 to vector<1x8xf32>
    %96 = arith.divf %94, %95 : vector<1x8xf32>
    %97 = vector.broadcast %96 : vector<1x8xf32> to vector<32x8xf32>
    %98 = arith.subf %92, %97 : vector<32x8xf32>
    %99 = arith.mulf %98, %98 : vector<32x8xf32>
    %cst_32 = arith.constant dense<0.000000e+00> : vector<8xf32>
    %100 = vector.multi_reduction <add>, %99, %cst_32 [0] : vector<32x8xf32> to vector<8xf32>
    %101 = vector.shape_cast %100 : vector<8xf32> to vector<1x8xf32>
    %cst_33 = arith.constant 3.200000e+01 : f32
    %102 = vector.broadcast %cst_33 : f32 to vector<1x8xf32>
    %103 = arith.divf %101, %102 : vector<1x8xf32>
    %104 = vector.broadcast %96 : vector<1x8xf32> to vector<32x8xf32>
    %105 = arith.subf %92, %104 : vector<32x8xf32>
    %cst_34 = arith.constant 9.99999974E-6 : f32
    %106 = vector.broadcast %cst_34 : f32 to vector<1x8xf32>
    %107 = arith.addf %103, %106 : vector<1x8xf32>
    %108 = math.rsqrt %107 : vector<1x8xf32>
    %109 = vector.broadcast %108 : vector<1x8xf32> to vector<32x8xf32>
    %110 = arith.mulf %105, %109 : vector<32x8xf32>
    %111 = vector.broadcast %67 : vector<32x1xf32> to vector<32x8xf32>
    %112 = arith.mulf %110, %111 : vector<32x8xf32>
    %113 = vector.broadcast %68 : vector<32x1xf32> to vector<32x8xf32>
    %114 = arith.addf %112, %113 : vector<32x8xf32>
    %115 = vector.extract_strided_slice %15 {offsets = [0, 6], sizes = [1, 1], strides = [1, 1]} : vector<32x8xf32> to vector<1x1xf32>
    %116 = arith.truncf %114 : vector<32x8xf32> to vector<32x8xbf16>
    %cst_35 = arith.constant dense<0.000000e+00> : vector<1x8xf32>
    %117 = tpu.matmul %16, %116, %cst_35 {dimension_numbers = #tpu.dot_dimension_numbers<[1], [0], [0], [1], [0, 0, 1, 1], [], []>} : vector<1x32xbf16>, vector<32x8xbf16>, vector<1x8xf32> -> vector<1x8xf32>
    %118 = vector.broadcast %115 : vector<1x1xf32> to vector<1x8xf32>
    %119 = arith.addf %117, %118 : vector<1x8xf32>
    %120 = arith.mulf %119, %3 : vector<1x8xf32>
    %121 = math.exp %120 : vector<1x8xf32>
    %cst_36 = arith.constant 1.000000e+00 : f32
    %122 = vector.broadcast %cst_36 : f32 to vector<1x8xf32>
    %123 = arith.subf %121, %122 : vector<1x8xf32>
    %124 = math.roundeven %123 : vector<1x8xf32>
    %cst_37 = arith.constant 1.000000e+00 : f32
    %125 = vector.broadcast %cst_37 : f32 to vector<1x8xf32>
    %126 = arith.mulf %124, %125 : vector<1x8xf32>
    %cst_38 = arith.constant 0.000000e+00 : f32
    %127 = vector.broadcast %cst_38 : f32 to vector<1x8xf32>
    %128 = arith.maximumf %126, %127 : vector<1x8xf32>
    %c0_39 = arith.constant 0 : index
    %c0_40 = arith.constant 0 : index
    %c0_41 = arith.constant 0 : index
    %129 = vector.load %arg7[%c0_39, %c0_40, %c0_41] : memref<1x1x8xf32, #tpu.memory_space<vmem>>, vector<1x1x8xf32>
    %130 = vector.shape_cast %129 : vector<1x1x8xf32> to vector<1x8xf32>
    %131 = vector.shape_cast %120 : vector<1x8xf32> to vector<1x1x8xf32>
    tpu.vector_store %arg7[%c0_39, %c0_40, %c0_41], %131 {strides = array<i32>} : memref<1x1x8xf32, #tpu.memory_space<vmem>>, vector<1x1x8xf32>,
    %132 = arith.fptosi %128 : vector<1x8xf32> to vector<1x8xi32>
    %c0_42 = arith.constant 0 : index
    %c0_43 = arith.constant 0 : index
    %c0_44 = arith.constant 0 : index
    %133 = vector.load %arg8[%c0_42, %c0_43, %c0_44] : memref<1x1x8xi32, #tpu.memory_space<vmem>>, vector<1x1x8xi32>
    %134 = vector.shape_cast %133 : vector<1x1x8xi32> to vector<1x8xi32>
    %135 = vector.shape_cast %132 : vector<1x8xi32> to vector<1x1x8xi32>
    tpu.vector_store %arg8[%c0_42, %c0_43, %c0_44], %135 {strides = array<i32>} : memref<1x1x8xi32, #tpu.memory_space<vmem>>, vector<1x1x8xi32>,
    return
  }
  func.func @transform_0(%arg0: i32) -> (i32, i32, i32) {
    %c0_i32 = arith.constant 0 : i32
    %c0_i32_0 = arith.constant 0 : i32
    %c0_i32_1 = arith.constant 0 : i32
    return %arg0, %c0_i32, %c0_i32_0 : i32, i32, i32
  }
  func.func @transform_1(%arg0: i32) -> (i32, i32, i32) {
    %c0_i32 = arith.constant 0 : i32
    %c0_i32_0 = arith.constant 0 : i32
    %c0_i32_1 = arith.constant 0 : i32
    return %arg0, %c0_i32, %c0_i32_0 : i32, i32, i32
  }
  func.func @transform_2(%arg0: i32) -> (i32, i32, i32) {
    %c0_i32 = arith.constant 0 : i32
    %c0_i32_0 = arith.constant 0 : i32
    %c0_i32_1 = arith.constant 0 : i32
    %c0_i32_2 = arith.constant 0 : i32
    return %c0_i32, %c0_i32_0, %c0_i32_1 : i32, i32, i32
  }
  func.func @transform_3(%arg0: i32) -> (i32, i32, i32) {
    %c0_i32 = arith.constant 0 : i32
    %c0_i32_0 = arith.constant 0 : i32
    %c0_i32_1 = arith.constant 0 : i32
    %c0_i32_2 = arith.constant 0 : i32
    return %c0_i32, %c0_i32_0, %c0_i32_1 : i32, i32, i32
  }
  func.func @transform_4(%arg0: i32) -> (i32, i32) {
    %c0_i32 = arith.constant 0 : i32
    %c0_i32_0 = arith.constant 0 : i32
    %c0_i32_1 = arith.constant 0 : i32
    return %c0_i32, %c0_i32_0 : i32, i32
  }
  func.func @transform_5(%arg0: i32) -> (i32, i32) {
    %c0_i32 = arith.constant 0 : i32
    %c0_i32_0 = arith.constant 0 : i32
    %c0_i32_1 = arith.constant 0 : i32
    return %c0_i32, %c0_i32_0 : i32, i32
  }
  func.func @transform_6(%arg0: i32) -> (i32, i32, i32) {
    %c0_i32 = arith.constant 0 : i32
    %c0_i32_0 = arith.constant 0 : i32
    %c0_i32_1 = arith.constant 0 : i32
    return %arg0, %c0_i32, %c0_i32_0 : i32, i32, i32
  }
  func.func @transform_7(%arg0: i32) -> (i32, i32, i32) {
    %c0_i32 = arith.constant 0 : i32
    %c0_i32_0 = arith.constant 0 : i32
    %c0_i32_1 = arith.constant 0 : i32
    return %arg0, %c0_i32, %c0_i32_0 : i32, i32, i32
  }
}

module attributes {stable_mosaic.version = 11 : i64} {
  func.func @_pitch_energy_kernel(%arg0: i32, %arg1: memref<1x32x8xf32, #tpu.memory_space<vmem>>, %arg2: memref<1x1x16xi32, #tpu.memory_space<vmem>>, %arg3: memref<2x3x32x32xbf16, #tpu.memory_space<vmem>>, %arg4: memref<2x3x32x32xbf16, #tpu.memory_space<vmem>>, %arg5: memref<2x32x8xf32, #tpu.memory_space<vmem>>, %arg6: memref<2x1x32xbf16, #tpu.memory_space<vmem>>, %arg7: memref<2x31x1xf32, #tpu.memory_space<vmem>>, %arg8: memref<32x64xbf16, #tpu.memory_space<vmem>>, %arg9: memref<1x32x16xf32, #tpu.memory_space<vmem>>, %arg10: memref<1x1x16xf32, #tpu.memory_space<vmem>>, %arg11: memref<1x1x16xf32, #tpu.memory_space<vmem>>) attributes {dimension_semantics = [#tpu.dimension_semantics<parallel>], iteration_bounds = array<i64: 2>, scalar_prefetch = 0 : i64, scratch_operands = 0 : i64, tpu.core_type = #tpu.core_type<tc>, window_params = [{transform_indices = @transform_0, window_bounds = array<i64: 1, 32, 8>}, {transform_indices = @transform_1, window_bounds = array<i64: 1, 1, 16>}, {pipeline_mode = #tpu.pipeline_mode<synchronous>, transform_indices = @transform_2, window_bounds = array<i64: 2, 3, 32, 32>}, {pipeline_mode = #tpu.pipeline_mode<synchronous>, transform_indices = @transform_3, window_bounds = array<i64: 2, 3, 32, 32>}, {pipeline_mode = #tpu.pipeline_mode<synchronous>, transform_indices = @transform_4, window_bounds = array<i64: 2, 32, 8>}, {pipeline_mode = #tpu.pipeline_mode<synchronous>, transform_indices = @transform_5, window_bounds = array<i64: 2, 1, 32>}, {pipeline_mode = #tpu.pipeline_mode<synchronous>, transform_indices = @transform_6, window_bounds = array<i64: 2, 31, 1>}, {pipeline_mode = #tpu.pipeline_mode<synchronous>, transform_indices = @transform_7, window_bounds = array<i64: 32, 64>}, {transform_indices = @transform_8, window_bounds = array<i64: 1, 32, 16>}, {transform_indices = @transform_9, window_bounds = array<i64: 1, 1, 16>}, {transform_indices = @transform_10, window_bounds = array<i64: 1, 1, 16>}]} {
    %c0 = arith.constant 0 : index
    %c0_0 = arith.constant 0 : index
    %c0_1 = arith.constant 0 : index
    %0 = vector.load %arg1[%c0, %c0_0, %c0_1] : memref<1x32x8xf32, #tpu.memory_space<vmem>>, vector<1x32x8xf32>
    %1 = vector.shape_cast %0 : vector<1x32x8xf32> to vector<32x8xf32>
    %c0_2 = arith.constant 0 : index
    %c0_3 = arith.constant 0 : index
    %c0_4 = arith.constant 0 : index
    %2 = vector.load %arg2[%c0_2, %c0_3, %c0_4] : memref<1x1x16xi32, #tpu.memory_space<vmem>>, vector<1x1x16xi32>
    %3 = vector.shape_cast %2 : vector<1x1x16xi32> to vector<1x16xi32>
    %4 = tpu.iota {dimensions = array<i32: 0>} : vector<8x16xi32>
    %5 = vector.broadcast %3 : vector<1x16xi32> to vector<8x16xi32>
    %6 = arith.cmpi eq, %4, %5 : vector<8x16xi32>
    %7 = arith.extui %6 : vector<8x16xi1> to vector<8x16xi32>
    %8 = arith.sitofp %7 : vector<8x16xi32> to vector<8x16xf32>
    %cst = arith.constant dense<0.000000e+00> : vector<32x16xf32>
    %9 = tpu.matmul %1, %8, %cst {dimension_numbers = #tpu.dot_dimension_numbers<[1], [0], [0], [1], [0, 0, 1, 1], [], []>} : vector<32x8xf32>, vector<8x16xf32>, vector<32x16xf32> -> vector<32x16xf32>
    %c8_i32 = arith.constant 8 : i32
    %10 = vector.broadcast %c8_i32 : i32 to vector<1x16xi32>
    %11 = arith.cmpi slt, %3, %10 : vector<1x16xi32>
    %12 = arith.extui %11 : vector<1x16xi1> to vector<1x16xi32>
    %13 = arith.sitofp %12 : vector<1x16xi32> to vector<1x16xf32>
    %14 = tpu.iota {dimensions = array<i32: 1>} : vector<1x16xi32>
    %c0_i32 = arith.constant 0 : i32
    %15 = vector.broadcast %c0_i32 : i32 to vector<1x16xi32>
    %16 = arith.cmpi ne, %14, %15 : vector<1x16xi32>
    %17 = arith.extui %16 : vector<1x16xi1> to vector<1x16xi32>
    %18 = arith.sitofp %17 : vector<1x16xi32> to vector<1x16xf32>
    %c15_i32 = arith.constant 15 : i32
    %19 = vector.broadcast %c15_i32 : i32 to vector<1x16xi32>
    %20 = arith.cmpi ne, %14, %19 : vector<1x16xi32>
    %21 = arith.extui %20 : vector<1x16xi1> to vector<1x16xi32>
    %22 = arith.sitofp %21 : vector<1x16xi32> to vector<1x16xf32>
    %c0_5 = arith.constant 0 : index
    %c0_6 = arith.constant 0 : index
    %c0_7 = arith.constant 0 : index
    %c0_8 = arith.constant 0 : index
    %23 = vector.load %arg3[%c0_5, %c0_6, %c0_7, %c0_8] : memref<2x3x32x32xbf16, #tpu.memory_space<vmem>>, vector<1x3x32x32xbf16>
    %24 = vector.shape_cast %23 : vector<1x3x32x32xbf16> to vector<3x32x32xbf16>
    %c0_9 = arith.constant 0 : index
    %c0_10 = arith.constant 0 : index
    %c0_11 = arith.constant 0 : index
    %c0_12 = arith.constant 0 : index
    %25 = vector.load %arg4[%c0_9, %c0_10, %c0_11, %c0_12] : memref<2x3x32x32xbf16, #tpu.memory_space<vmem>>, vector<1x3x32x32xbf16>
    %26 = vector.shape_cast %25 : vector<1x3x32x32xbf16> to vector<3x32x32xbf16>
    %c0_13 = arith.constant 0 : index
    %c0_14 = arith.constant 0 : index
    %c0_15 = arith.constant 0 : index
    %27 = vector.load %arg5[%c0_13, %c0_14, %c0_15] : memref<2x32x8xf32, #tpu.memory_space<vmem>>, vector<1x32x8xf32>
    %28 = vector.shape_cast %27 : vector<1x32x8xf32> to vector<32x8xf32>
    %c0_16 = arith.constant 0 : index
    %c0_17 = arith.constant 0 : index
    %c0_18 = arith.constant 0 : index
    %29 = vector.load %arg6[%c0_16, %c0_17, %c0_18] : memref<2x1x32xbf16, #tpu.memory_space<vmem>>, vector<1x1x32xbf16>
    %30 = vector.shape_cast %29 : vector<1x1x32xbf16> to vector<1x32xbf16>
    %31 = vector.extract_strided_slice %28 {offsets = [0, 0], sizes = [32, 1], strides = [1, 1]} : vector<32x8xf32> to vector<32x1xf32>
    %32 = vector.extract_strided_slice %28 {offsets = [0, 1], sizes = [32, 1], strides = [1, 1]} : vector<32x8xf32> to vector<32x1xf32>
    %33 = vector.extract_strided_slice %28 {offsets = [0, 2], sizes = [32, 1], strides = [1, 1]} : vector<32x8xf32> to vector<32x1xf32>
    %c1_i32 = arith.constant 1 : i32
    %34 = tpu.dynamic_rotate %9 by %c1_i32 dim 1 : vector<32x16xf32>, i32 -> vector<32x16xf32>
    %c15_i32_19 = arith.constant 15 : i32
    %35 = tpu.dynamic_rotate %9 by %c15_i32_19 dim 1 : vector<32x16xf32>, i32 -> vector<32x16xf32>
    %36 = vector.extract_strided_slice %24 {offsets = [0, 0, 0], sizes = [1, 32, 32], strides = [1, 1, 1]} : vector<3x32x32xbf16> to vector<1x32x32xbf16>
    %37 = vector.shape_cast %36 : vector<1x32x32xbf16> to vector<32x32xbf16>
    %38 = arith.truncf %34 : vector<32x16xf32> to vector<32x16xbf16>
    %cst_20 = arith.constant dense<0.000000e+00> : vector<32x16xf32>
    %39 = tpu.matmul %37, %38, %cst_20 {dimension_numbers = #tpu.dot_dimension_numbers<[1], [0], [0], [1], [0, 0, 1, 1], [], []>} : vector<32x32xbf16>, vector<32x16xbf16>, vector<32x16xf32> -> vector<32x16xf32>
    %40 = vector.broadcast %18 : vector<1x16xf32> to vector<32x16xf32>
    %41 = arith.mulf %39, %40 : vector<32x16xf32>
    %42 = vector.extract_strided_slice %24 {offsets = [1, 0, 0], sizes = [1, 32, 32], strides = [1, 1, 1]} : vector<3x32x32xbf16> to vector<1x32x32xbf16>
    %43 = vector.shape_cast %42 : vector<1x32x32xbf16> to vector<32x32xbf16>
    %44 = arith.truncf %9 : vector<32x16xf32> to vector<32x16xbf16>
    %cst_21 = arith.constant dense<0.000000e+00> : vector<32x16xf32>
    %45 = tpu.matmul %43, %44, %cst_21 {dimension_numbers = #tpu.dot_dimension_numbers<[1], [0], [0], [1], [0, 0, 1, 1], [], []>} : vector<32x32xbf16>, vector<32x16xbf16>, vector<32x16xf32> -> vector<32x16xf32>
    %46 = arith.addf %41, %45 : vector<32x16xf32>
    %47 = vector.extract_strided_slice %24 {offsets = [2, 0, 0], sizes = [1, 32, 32], strides = [1, 1, 1]} : vector<3x32x32xbf16> to vector<1x32x32xbf16>
    %48 = vector.shape_cast %47 : vector<1x32x32xbf16> to vector<32x32xbf16>
    %49 = arith.truncf %35 : vector<32x16xf32> to vector<32x16xbf16>
    %cst_22 = arith.constant dense<0.000000e+00> : vector<32x16xf32>
    %50 = tpu.matmul %48, %49, %cst_22 {dimension_numbers = #tpu.dot_dimension_numbers<[1], [0], [0], [1], [0, 0, 1, 1], [], []>} : vector<32x32xbf16>, vector<32x16xbf16>, vector<32x16xf32> -> vector<32x16xf32>
    %51 = vector.broadcast %22 : vector<1x16xf32> to vector<32x16xf32>
    %52 = arith.mulf %50, %51 : vector<32x16xf32>
    %53 = arith.addf %46, %52 : vector<32x16xf32>
    %54 = vector.broadcast %31 : vector<32x1xf32> to vector<32x16xf32>
    %55 = arith.addf %53, %54 : vector<32x16xf32>
    %cst_23 = arith.constant 0.000000e+00 : f32
    %56 = vector.broadcast %cst_23 : f32 to vector<32x16xf32>
    %57 = arith.maximumf %55, %56 : vector<32x16xf32>
    %cst_24 = arith.constant dense<0.000000e+00> : vector<16xf32>
    %58 = vector.multi_reduction <add>, %57, %cst_24 [0] : vector<32x16xf32> to vector<16xf32>
    %59 = vector.shape_cast %58 : vector<16xf32> to vector<1x16xf32>
    %cst_25 = arith.constant 3.200000e+01 : f32
    %60 = vector.broadcast %cst_25 : f32 to vector<1x16xf32>
    %61 = arith.divf %59, %60 : vector<1x16xf32>
    %62 = vector.broadcast %61 : vector<1x16xf32> to vector<32x16xf32>
    %63 = arith.subf %57, %62 : vector<32x16xf32>
    %64 = arith.mulf %63, %63 : vector<32x16xf32>
    %cst_26 = arith.constant dense<0.000000e+00> : vector<16xf32>
    %65 = vector.multi_reduction <add>, %64, %cst_26 [0] : vector<32x16xf32> to vector<16xf32>
    %66 = vector.shape_cast %65 : vector<16xf32> to vector<1x16xf32>
    %cst_27 = arith.constant 3.200000e+01 : f32
    %67 = vector.broadcast %cst_27 : f32 to vector<1x16xf32>
    %68 = arith.divf %66, %67 : vector<1x16xf32>
    %69 = vector.broadcast %61 : vector<1x16xf32> to vector<32x16xf32>
    %70 = arith.subf %57, %69 : vector<32x16xf32>
    %cst_28 = arith.constant 9.99999974E-6 : f32
    %71 = vector.broadcast %cst_28 : f32 to vector<1x16xf32>
    %72 = arith.addf %68, %71 : vector<1x16xf32>
    %73 = math.rsqrt %72 : vector<1x16xf32>
    %74 = vector.broadcast %73 : vector<1x16xf32> to vector<32x16xf32>
    %75 = arith.mulf %70, %74 : vector<32x16xf32>
    %76 = vector.broadcast %32 : vector<32x1xf32> to vector<32x16xf32>
    %77 = arith.mulf %75, %76 : vector<32x16xf32>
    %78 = vector.broadcast %33 : vector<32x1xf32> to vector<32x16xf32>
    %79 = arith.addf %77, %78 : vector<32x16xf32>
    %80 = vector.extract_strided_slice %28 {offsets = [0, 3], sizes = [32, 1], strides = [1, 1]} : vector<32x8xf32> to vector<32x1xf32>
    %81 = vector.extract_strided_slice %28 {offsets = [0, 4], sizes = [32, 1], strides = [1, 1]} : vector<32x8xf32> to vector<32x1xf32>
    %82 = vector.extract_strided_slice %28 {offsets = [0, 5], sizes = [32, 1], strides = [1, 1]} : vector<32x8xf32> to vector<32x1xf32>
    %c1_i32_29 = arith.constant 1 : i32
    %83 = tpu.dynamic_rotate %79 by %c1_i32_29 dim 1 : vector<32x16xf32>, i32 -> vector<32x16xf32>
    %c15_i32_30 = arith.constant 15 : i32
    %84 = tpu.dynamic_rotate %79 by %c15_i32_30 dim 1 : vector<32x16xf32>, i32 -> vector<32x16xf32>
    %85 = vector.extract_strided_slice %26 {offsets = [0, 0, 0], sizes = [1, 32, 32], strides = [1, 1, 1]} : vector<3x32x32xbf16> to vector<1x32x32xbf16>
    %86 = vector.shape_cast %85 : vector<1x32x32xbf16> to vector<32x32xbf16>
    %87 = arith.truncf %83 : vector<32x16xf32> to vector<32x16xbf16>
    %cst_31 = arith.constant dense<0.000000e+00> : vector<32x16xf32>
    %88 = tpu.matmul %86, %87, %cst_31 {dimension_numbers = #tpu.dot_dimension_numbers<[1], [0], [0], [1], [0, 0, 1, 1], [], []>} : vector<32x32xbf16>, vector<32x16xbf16>, vector<32x16xf32> -> vector<32x16xf32>
    %89 = vector.broadcast %18 : vector<1x16xf32> to vector<32x16xf32>
    %90 = arith.mulf %88, %89 : vector<32x16xf32>
    %91 = vector.extract_strided_slice %26 {offsets = [1, 0, 0], sizes = [1, 32, 32], strides = [1, 1, 1]} : vector<3x32x32xbf16> to vector<1x32x32xbf16>
    %92 = vector.shape_cast %91 : vector<1x32x32xbf16> to vector<32x32xbf16>
    %93 = arith.truncf %79 : vector<32x16xf32> to vector<32x16xbf16>
    %cst_32 = arith.constant dense<0.000000e+00> : vector<32x16xf32>
    %94 = tpu.matmul %92, %93, %cst_32 {dimension_numbers = #tpu.dot_dimension_numbers<[1], [0], [0], [1], [0, 0, 1, 1], [], []>} : vector<32x32xbf16>, vector<32x16xbf16>, vector<32x16xf32> -> vector<32x16xf32>
    %95 = arith.addf %90, %94 : vector<32x16xf32>
    %96 = vector.extract_strided_slice %26 {offsets = [2, 0, 0], sizes = [1, 32, 32], strides = [1, 1, 1]} : vector<3x32x32xbf16> to vector<1x32x32xbf16>
    %97 = vector.shape_cast %96 : vector<1x32x32xbf16> to vector<32x32xbf16>
    %98 = arith.truncf %84 : vector<32x16xf32> to vector<32x16xbf16>
    %cst_33 = arith.constant dense<0.000000e+00> : vector<32x16xf32>
    %99 = tpu.matmul %97, %98, %cst_33 {dimension_numbers = #tpu.dot_dimension_numbers<[1], [0], [0], [1], [0, 0, 1, 1], [], []>} : vector<32x32xbf16>, vector<32x16xbf16>, vector<32x16xf32> -> vector<32x16xf32>
    %100 = vector.broadcast %22 : vector<1x16xf32> to vector<32x16xf32>
    %101 = arith.mulf %99, %100 : vector<32x16xf32>
    %102 = arith.addf %95, %101 : vector<32x16xf32>
    %103 = vector.broadcast %80 : vector<32x1xf32> to vector<32x16xf32>
    %104 = arith.addf %102, %103 : vector<32x16xf32>
    %cst_34 = arith.constant 0.000000e+00 : f32
    %105 = vector.broadcast %cst_34 : f32 to vector<32x16xf32>
    %106 = arith.maximumf %104, %105 : vector<32x16xf32>
    %cst_35 = arith.constant dense<0.000000e+00> : vector<16xf32>
    %107 = vector.multi_reduction <add>, %106, %cst_35 [0] : vector<32x16xf32> to vector<16xf32>
    %108 = vector.shape_cast %107 : vector<16xf32> to vector<1x16xf32>
    %cst_36 = arith.constant 3.200000e+01 : f32
    %109 = vector.broadcast %cst_36 : f32 to vector<1x16xf32>
    %110 = arith.divf %108, %109 : vector<1x16xf32>
    %111 = vector.broadcast %110 : vector<1x16xf32> to vector<32x16xf32>
    %112 = arith.subf %106, %111 : vector<32x16xf32>
    %113 = arith.mulf %112, %112 : vector<32x16xf32>
    %cst_37 = arith.constant dense<0.000000e+00> : vector<16xf32>
    %114 = vector.multi_reduction <add>, %113, %cst_37 [0] : vector<32x16xf32> to vector<16xf32>
    %115 = vector.shape_cast %114 : vector<16xf32> to vector<1x16xf32>
    %cst_38 = arith.constant 3.200000e+01 : f32
    %116 = vector.broadcast %cst_38 : f32 to vector<1x16xf32>
    %117 = arith.divf %115, %116 : vector<1x16xf32>
    %118 = vector.broadcast %110 : vector<1x16xf32> to vector<32x16xf32>
    %119 = arith.subf %106, %118 : vector<32x16xf32>
    %cst_39 = arith.constant 9.99999974E-6 : f32
    %120 = vector.broadcast %cst_39 : f32 to vector<1x16xf32>
    %121 = arith.addf %117, %120 : vector<1x16xf32>
    %122 = math.rsqrt %121 : vector<1x16xf32>
    %123 = vector.broadcast %122 : vector<1x16xf32> to vector<32x16xf32>
    %124 = arith.mulf %119, %123 : vector<32x16xf32>
    %125 = vector.broadcast %81 : vector<32x1xf32> to vector<32x16xf32>
    %126 = arith.mulf %124, %125 : vector<32x16xf32>
    %127 = vector.broadcast %82 : vector<32x1xf32> to vector<32x16xf32>
    %128 = arith.addf %126, %127 : vector<32x16xf32>
    %129 = vector.extract_strided_slice %28 {offsets = [0, 6], sizes = [1, 1], strides = [1, 1]} : vector<32x8xf32> to vector<1x1xf32>
    %130 = arith.truncf %128 : vector<32x16xf32> to vector<32x16xbf16>
    %cst_40 = arith.constant dense<0.000000e+00> : vector<1x16xf32>
    %131 = tpu.matmul %30, %130, %cst_40 {dimension_numbers = #tpu.dot_dimension_numbers<[1], [0], [0], [1], [0, 0, 1, 1], [], []>} : vector<1x32xbf16>, vector<32x16xbf16>, vector<1x16xf32> -> vector<1x16xf32>
    %132 = vector.broadcast %129 : vector<1x1xf32> to vector<1x16xf32>
    %133 = arith.addf %131, %132 : vector<1x16xf32>
    %134 = arith.mulf %133, %13 : vector<1x16xf32>
    %cst_41 = arith.constant 1.000000e+00 : f32
    %135 = vector.broadcast %cst_41 : f32 to vector<1x16xf32>
    %136 = arith.mulf %134, %135 : vector<1x16xf32>
    %c0_42 = arith.constant 0 : index
    %c0_43 = arith.constant 0 : index
    %c0_44 = arith.constant 0 : index
    %137 = vector.load %arg7[%c0_42, %c0_43, %c0_44] : memref<2x31x1xf32, #tpu.memory_space<vmem>>, vector<1x31x1xf32>
    %138 = vector.shape_cast %137 : vector<1x31x1xf32> to vector<31x1xf32>
    %139 = vector.broadcast %136 : vector<1x16xf32> to vector<31x16xf32>
    %140 = vector.broadcast %138 : vector<31x1xf32> to vector<31x16xf32>
    %141 = arith.cmpf ogt, %139, %140 : vector<31x16xf32>
    %142 = arith.extui %141 : vector<31x16xi1> to vector<31x16xi32>
    %cst_45 = arith.constant dense<0> : vector<16xi32>
    %143 = vector.multi_reduction <add>, %142, %cst_45 [0] : vector<31x16xi32> to vector<16xi32>
    %144 = vector.shape_cast %143 : vector<16xi32> to vector<1x16xi32>
    %c1 = arith.constant 1 : index
    %c0_46 = arith.constant 0 : index
    %c0_47 = arith.constant 0 : index
    %c0_48 = arith.constant 0 : index
    %145 = vector.load %arg3[%c1, %c0_46, %c0_47, %c0_48] : memref<2x3x32x32xbf16, #tpu.memory_space<vmem>>, vector<1x3x32x32xbf16>
    %146 = vector.shape_cast %145 : vector<1x3x32x32xbf16> to vector<3x32x32xbf16>
    %c1_49 = arith.constant 1 : index
    %c0_50 = arith.constant 0 : index
    %c0_51 = arith.constant 0 : index
    %c0_52 = arith.constant 0 : index
    %147 = vector.load %arg4[%c1_49, %c0_50, %c0_51, %c0_52] : memref<2x3x32x32xbf16, #tpu.memory_space<vmem>>, vector<1x3x32x32xbf16>
    %148 = vector.shape_cast %147 : vector<1x3x32x32xbf16> to vector<3x32x32xbf16>
    %c1_53 = arith.constant 1 : index
    %c0_54 = arith.constant 0 : index
    %c0_55 = arith.constant 0 : index
    %149 = vector.load %arg5[%c1_53, %c0_54, %c0_55] : memref<2x32x8xf32, #tpu.memory_space<vmem>>, vector<1x32x8xf32>
    %150 = vector.shape_cast %149 : vector<1x32x8xf32> to vector<32x8xf32>
    %c1_56 = arith.constant 1 : index
    %c0_57 = arith.constant 0 : index
    %c0_58 = arith.constant 0 : index
    %151 = vector.load %arg6[%c1_56, %c0_57, %c0_58] : memref<2x1x32xbf16, #tpu.memory_space<vmem>>, vector<1x1x32xbf16>
    %152 = vector.shape_cast %151 : vector<1x1x32xbf16> to vector<1x32xbf16>
    %153 = vector.extract_strided_slice %150 {offsets = [0, 0], sizes = [32, 1], strides = [1, 1]} : vector<32x8xf32> to vector<32x1xf32>
    %154 = vector.extract_strided_slice %150 {offsets = [0, 1], sizes = [32, 1], strides = [1, 1]} : vector<32x8xf32> to vector<32x1xf32>
    %155 = vector.extract_strided_slice %150 {offsets = [0, 2], sizes = [32, 1], strides = [1, 1]} : vector<32x8xf32> to vector<32x1xf32>
    %c1_i32_59 = arith.constant 1 : i32
    %156 = tpu.dynamic_rotate %9 by %c1_i32_59 dim 1 : vector<32x16xf32>, i32 -> vector<32x16xf32>
    %c15_i32_60 = arith.constant 15 : i32
    %157 = tpu.dynamic_rotate %9 by %c15_i32_60 dim 1 : vector<32x16xf32>, i32 -> vector<32x16xf32>
    %158 = vector.extract_strided_slice %146 {offsets = [0, 0, 0], sizes = [1, 32, 32], strides = [1, 1, 1]} : vector<3x32x32xbf16> to vector<1x32x32xbf16>
    %159 = vector.shape_cast %158 : vector<1x32x32xbf16> to vector<32x32xbf16>
    %160 = arith.truncf %156 : vector<32x16xf32> to vector<32x16xbf16>
    %cst_61 = arith.constant dense<0.000000e+00> : vector<32x16xf32>
    %161 = tpu.matmul %159, %160, %cst_61 {dimension_numbers = #tpu.dot_dimension_numbers<[1], [0], [0], [1], [0, 0, 1, 1], [], []>} : vector<32x32xbf16>, vector<32x16xbf16>, vector<32x16xf32> -> vector<32x16xf32>
    %162 = vector.broadcast %18 : vector<1x16xf32> to vector<32x16xf32>
    %163 = arith.mulf %161, %162 : vector<32x16xf32>
    %164 = vector.extract_strided_slice %146 {offsets = [1, 0, 0], sizes = [1, 32, 32], strides = [1, 1, 1]} : vector<3x32x32xbf16> to vector<1x32x32xbf16>
    %165 = vector.shape_cast %164 : vector<1x32x32xbf16> to vector<32x32xbf16>
    %166 = arith.truncf %9 : vector<32x16xf32> to vector<32x16xbf16>
    %cst_62 = arith.constant dense<0.000000e+00> : vector<32x16xf32>
    %167 = tpu.matmul %165, %166, %cst_62 {dimension_numbers = #tpu.dot_dimension_numbers<[1], [0], [0], [1], [0, 0, 1, 1], [], []>} : vector<32x32xbf16>, vector<32x16xbf16>, vector<32x16xf32> -> vector<32x16xf32>
    %168 = arith.addf %163, %167 : vector<32x16xf32>
    %169 = vector.extract_strided_slice %146 {offsets = [2, 0, 0], sizes = [1, 32, 32], strides = [1, 1, 1]} : vector<3x32x32xbf16> to vector<1x32x32xbf16>
    %170 = vector.shape_cast %169 : vector<1x32x32xbf16> to vector<32x32xbf16>
    %171 = arith.truncf %157 : vector<32x16xf32> to vector<32x16xbf16>
    %cst_63 = arith.constant dense<0.000000e+00> : vector<32x16xf32>
    %172 = tpu.matmul %170, %171, %cst_63 {dimension_numbers = #tpu.dot_dimension_numbers<[1], [0], [0], [1], [0, 0, 1, 1], [], []>} : vector<32x32xbf16>, vector<32x16xbf16>, vector<32x16xf32> -> vector<32x16xf32>
    %173 = vector.broadcast %22 : vector<1x16xf32> to vector<32x16xf32>
    %174 = arith.mulf %172, %173 : vector<32x16xf32>
    %175 = arith.addf %168, %174 : vector<32x16xf32>
    %176 = vector.broadcast %153 : vector<32x1xf32> to vector<32x16xf32>
    %177 = arith.addf %175, %176 : vector<32x16xf32>
    %cst_64 = arith.constant 0.000000e+00 : f32
    %178 = vector.broadcast %cst_64 : f32 to vector<32x16xf32>
    %179 = arith.maximumf %177, %178 : vector<32x16xf32>
    %cst_65 = arith.constant dense<0.000000e+00> : vector<16xf32>
    %180 = vector.multi_reduction <add>, %179, %cst_65 [0] : vector<32x16xf32> to vector<16xf32>
    %181 = vector.shape_cast %180 : vector<16xf32> to vector<1x16xf32>
    %cst_66 = arith.constant 3.200000e+01 : f32
    %182 = vector.broadcast %cst_66 : f32 to vector<1x16xf32>
    %183 = arith.divf %181, %182 : vector<1x16xf32>
    %184 = vector.broadcast %183 : vector<1x16xf32> to vector<32x16xf32>
    %185 = arith.subf %179, %184 : vector<32x16xf32>
    %186 = arith.mulf %185, %185 : vector<32x16xf32>
    %cst_67 = arith.constant dense<0.000000e+00> : vector<16xf32>
    %187 = vector.multi_reduction <add>, %186, %cst_67 [0] : vector<32x16xf32> to vector<16xf32>
    %188 = vector.shape_cast %187 : vector<16xf32> to vector<1x16xf32>
    %cst_68 = arith.constant 3.200000e+01 : f32
    %189 = vector.broadcast %cst_68 : f32 to vector<1x16xf32>
    %190 = arith.divf %188, %189 : vector<1x16xf32>
    %191 = vector.broadcast %183 : vector<1x16xf32> to vector<32x16xf32>
    %192 = arith.subf %179, %191 : vector<32x16xf32>
    %cst_69 = arith.constant 9.99999974E-6 : f32
    %193 = vector.broadcast %cst_69 : f32 to vector<1x16xf32>
    %194 = arith.addf %190, %193 : vector<1x16xf32>
    %195 = math.rsqrt %194 : vector<1x16xf32>
    %196 = vector.broadcast %195 : vector<1x16xf32> to vector<32x16xf32>
    %197 = arith.mulf %192, %196 : vector<32x16xf32>
    %198 = vector.broadcast %154 : vector<32x1xf32> to vector<32x16xf32>
    %199 = arith.mulf %197, %198 : vector<32x16xf32>
    %200 = vector.broadcast %155 : vector<32x1xf32> to vector<32x16xf32>
    %201 = arith.addf %199, %200 : vector<32x16xf32>
    %202 = vector.extract_strided_slice %150 {offsets = [0, 3], sizes = [32, 1], strides = [1, 1]} : vector<32x8xf32> to vector<32x1xf32>
    %203 = vector.extract_strided_slice %150 {offsets = [0, 4], sizes = [32, 1], strides = [1, 1]} : vector<32x8xf32> to vector<32x1xf32>
    %204 = vector.extract_strided_slice %150 {offsets = [0, 5], sizes = [32, 1], strides = [1, 1]} : vector<32x8xf32> to vector<32x1xf32>
    %c1_i32_70 = arith.constant 1 : i32
    %205 = tpu.dynamic_rotate %201 by %c1_i32_70 dim 1 : vector<32x16xf32>, i32 -> vector<32x16xf32>
    %c15_i32_71 = arith.constant 15 : i32
    %206 = tpu.dynamic_rotate %201 by %c15_i32_71 dim 1 : vector<32x16xf32>, i32 -> vector<32x16xf32>
    %207 = vector.extract_strided_slice %148 {offsets = [0, 0, 0], sizes = [1, 32, 32], strides = [1, 1, 1]} : vector<3x32x32xbf16> to vector<1x32x32xbf16>
    %208 = vector.shape_cast %207 : vector<1x32x32xbf16> to vector<32x32xbf16>
    %209 = arith.truncf %205 : vector<32x16xf32> to vector<32x16xbf16>
    %cst_72 = arith.constant dense<0.000000e+00> : vector<32x16xf32>
    %210 = tpu.matmul %208, %209, %cst_72 {dimension_numbers = #tpu.dot_dimension_numbers<[1], [0], [0], [1], [0, 0, 1, 1], [], []>} : vector<32x32xbf16>, vector<32x16xbf16>, vector<32x16xf32> -> vector<32x16xf32>
    %211 = vector.broadcast %18 : vector<1x16xf32> to vector<32x16xf32>
    %212 = arith.mulf %210, %211 : vector<32x16xf32>
    %213 = vector.extract_strided_slice %148 {offsets = [1, 0, 0], sizes = [1, 32, 32], strides = [1, 1, 1]} : vector<3x32x32xbf16> to vector<1x32x32xbf16>
    %214 = vector.shape_cast %213 : vector<1x32x32xbf16> to vector<32x32xbf16>
    %215 = arith.truncf %201 : vector<32x16xf32> to vector<32x16xbf16>
    %cst_73 = arith.constant dense<0.000000e+00> : vector<32x16xf32>
    %216 = tpu.matmul %214, %215, %cst_73 {dimension_numbers = #tpu.dot_dimension_numbers<[1], [0], [0], [1], [0, 0, 1, 1], [], []>} : vector<32x32xbf16>, vector<32x16xbf16>, vector<32x16xf32> -> vector<32x16xf32>
    %217 = arith.addf %212, %216 : vector<32x16xf32>
    %218 = vector.extract_strided_slice %148 {offsets = [2, 0, 0], sizes = [1, 32, 32], strides = [1, 1, 1]} : vector<3x32x32xbf16> to vector<1x32x32xbf16>
    %219 = vector.shape_cast %218 : vector<1x32x32xbf16> to vector<32x32xbf16>
    %220 = arith.truncf %206 : vector<32x16xf32> to vector<32x16xbf16>
    %cst_74 = arith.constant dense<0.000000e+00> : vector<32x16xf32>
    %221 = tpu.matmul %219, %220, %cst_74 {dimension_numbers = #tpu.dot_dimension_numbers<[1], [0], [0], [1], [0, 0, 1, 1], [], []>} : vector<32x32xbf16>, vector<32x16xbf16>, vector<32x16xf32> -> vector<32x16xf32>
    %222 = vector.broadcast %22 : vector<1x16xf32> to vector<32x16xf32>
    %223 = arith.mulf %221, %222 : vector<32x16xf32>
    %224 = arith.addf %217, %223 : vector<32x16xf32>
    %225 = vector.broadcast %202 : vector<32x1xf32> to vector<32x16xf32>
    %226 = arith.addf %224, %225 : vector<32x16xf32>
    %cst_75 = arith.constant 0.000000e+00 : f32
    %227 = vector.broadcast %cst_75 : f32 to vector<32x16xf32>
    %228 = arith.maximumf %226, %227 : vector<32x16xf32>
    %cst_76 = arith.constant dense<0.000000e+00> : vector<16xf32>
    %229 = vector.multi_reduction <add>, %228, %cst_76 [0] : vector<32x16xf32> to vector<16xf32>
    %230 = vector.shape_cast %229 : vector<16xf32> to vector<1x16xf32>
    %cst_77 = arith.constant 3.200000e+01 : f32
    %231 = vector.broadcast %cst_77 : f32 to vector<1x16xf32>
    %232 = arith.divf %230, %231 : vector<1x16xf32>
    %233 = vector.broadcast %232 : vector<1x16xf32> to vector<32x16xf32>
    %234 = arith.subf %228, %233 : vector<32x16xf32>
    %235 = arith.mulf %234, %234 : vector<32x16xf32>
    %cst_78 = arith.constant dense<0.000000e+00> : vector<16xf32>
    %236 = vector.multi_reduction <add>, %235, %cst_78 [0] : vector<32x16xf32> to vector<16xf32>
    %237 = vector.shape_cast %236 : vector<16xf32> to vector<1x16xf32>
    %cst_79 = arith.constant 3.200000e+01 : f32
    %238 = vector.broadcast %cst_79 : f32 to vector<1x16xf32>
    %239 = arith.divf %237, %238 : vector<1x16xf32>
    %240 = vector.broadcast %232 : vector<1x16xf32> to vector<32x16xf32>
    %241 = arith.subf %228, %240 : vector<32x16xf32>
    %cst_80 = arith.constant 9.99999974E-6 : f32
    %242 = vector.broadcast %cst_80 : f32 to vector<1x16xf32>
    %243 = arith.addf %239, %242 : vector<1x16xf32>
    %244 = math.rsqrt %243 : vector<1x16xf32>
    %245 = vector.broadcast %244 : vector<1x16xf32> to vector<32x16xf32>
    %246 = arith.mulf %241, %245 : vector<32x16xf32>
    %247 = vector.broadcast %203 : vector<32x1xf32> to vector<32x16xf32>
    %248 = arith.mulf %246, %247 : vector<32x16xf32>
    %249 = vector.broadcast %204 : vector<32x1xf32> to vector<32x16xf32>
    %250 = arith.addf %248, %249 : vector<32x16xf32>
    %251 = vector.extract_strided_slice %150 {offsets = [0, 6], sizes = [1, 1], strides = [1, 1]} : vector<32x8xf32> to vector<1x1xf32>
    %252 = arith.truncf %250 : vector<32x16xf32> to vector<32x16xbf16>
    %cst_81 = arith.constant dense<0.000000e+00> : vector<1x16xf32>
    %253 = tpu.matmul %152, %252, %cst_81 {dimension_numbers = #tpu.dot_dimension_numbers<[1], [0], [0], [1], [0, 0, 1, 1], [], []>} : vector<1x32xbf16>, vector<32x16xbf16>, vector<1x16xf32> -> vector<1x16xf32>
    %254 = vector.broadcast %251 : vector<1x1xf32> to vector<1x16xf32>
    %255 = arith.addf %253, %254 : vector<1x16xf32>
    %256 = arith.mulf %255, %13 : vector<1x16xf32>
    %cst_82 = arith.constant 1.000000e+00 : f32
    %257 = vector.broadcast %cst_82 : f32 to vector<1x16xf32>
    %258 = arith.mulf %256, %257 : vector<1x16xf32>
    %c1_83 = arith.constant 1 : index
    %c0_84 = arith.constant 0 : index
    %c0_85 = arith.constant 0 : index
    %259 = vector.load %arg7[%c1_83, %c0_84, %c0_85] : memref<2x31x1xf32, #tpu.memory_space<vmem>>, vector<1x31x1xf32>
    %260 = vector.shape_cast %259 : vector<1x31x1xf32> to vector<31x1xf32>
    %261 = vector.broadcast %258 : vector<1x16xf32> to vector<31x16xf32>
    %262 = vector.broadcast %260 : vector<31x1xf32> to vector<31x16xf32>
    %263 = arith.cmpf ogt, %261, %262 : vector<31x16xf32>
    %264 = arith.extui %263 : vector<31x16xi1> to vector<31x16xi32>
    %cst_86 = arith.constant dense<0> : vector<16xi32>
    %265 = vector.multi_reduction <add>, %264, %cst_86 [0] : vector<31x16xi32> to vector<16xi32>
    %266 = vector.shape_cast %265 : vector<16xi32> to vector<1x16xi32>
    %267 = tpu.iota {dimensions = array<i32: 0>} : vector<64x16xi32>
    %268 = vector.broadcast %144 : vector<1x16xi32> to vector<64x16xi32>
    %269 = arith.cmpi eq, %267, %268 : vector<64x16xi32>
    %c32_i32 = arith.constant 32 : i32
    %270 = vector.broadcast %c32_i32 : i32 to vector<1x16xi32>
    %271 = arith.addi %266, %270 : vector<1x16xi32>
    %272 = vector.broadcast %271 : vector<1x16xi32> to vector<64x16xi32>
    %273 = arith.cmpi eq, %267, %272 : vector<64x16xi32>
    %274 = arith.ori %269, %273 : vector<64x16xi1>
    %275 = arith.extui %274 : vector<64x16xi1> to vector<64x16xi32>
    %276 = arith.sitofp %275 : vector<64x16xi32> to vector<64x16xf32>
    %277 = arith.truncf %276 : vector<64x16xf32> to vector<64x16xbf16>
    %c0_87 = arith.constant 0 : index
    %c0_88 = arith.constant 0 : index
    %278 = vector.load %arg8[%c0_87, %c0_88] : memref<32x64xbf16, #tpu.memory_space<vmem>>, vector<32x64xbf16>
    %cst_89 = arith.constant dense<0.000000e+00> : vector<32x16xf32>
    %279 = tpu.matmul %278, %277, %cst_89 {dimension_numbers = #tpu.dot_dimension_numbers<[1], [0], [0], [1], [0, 0, 1, 1], [], []>} : vector<32x64xbf16>, vector<64x16xbf16>, vector<32x16xf32> -> vector<32x16xf32>
    %280 = arith.addf %9, %279 : vector<32x16xf32>
    %c0_90 = arith.constant 0 : index
    %c0_91 = arith.constant 0 : index
    %c0_92 = arith.constant 0 : index
    %281 = vector.load %arg9[%c0_90, %c0_91, %c0_92] : memref<1x32x16xf32, #tpu.memory_space<vmem>>, vector<1x32x16xf32>
    %282 = vector.shape_cast %281 : vector<1x32x16xf32> to vector<32x16xf32>
    %283 = vector.shape_cast %280 : vector<32x16xf32> to vector<1x32x16xf32>
    tpu.vector_store %arg9[%c0_90, %c0_91, %c0_92], %283 {strides = array<i32>} : memref<1x32x16xf32, #tpu.memory_space<vmem>>, vector<1x32x16xf32>,
    %c0_93 = arith.constant 0 : index
    %c0_94 = arith.constant 0 : index
    %c0_95 = arith.constant 0 : index
    %284 = vector.load %arg10[%c0_93, %c0_94, %c0_95] : memref<1x1x16xf32, #tpu.memory_space<vmem>>, vector<1x1x16xf32>
    %285 = vector.shape_cast %284 : vector<1x1x16xf32> to vector<1x16xf32>
    %286 = vector.shape_cast %136 : vector<1x16xf32> to vector<1x1x16xf32>
    tpu.vector_store %arg10[%c0_93, %c0_94, %c0_95], %286 {strides = array<i32>} : memref<1x1x16xf32, #tpu.memory_space<vmem>>, vector<1x1x16xf32>,
    %c0_96 = arith.constant 0 : index
    %c0_97 = arith.constant 0 : index
    %c0_98 = arith.constant 0 : index
    %287 = vector.load %arg11[%c0_96, %c0_97, %c0_98] : memref<1x1x16xf32, #tpu.memory_space<vmem>>, vector<1x1x16xf32>
    %288 = vector.shape_cast %287 : vector<1x1x16xf32> to vector<1x16xf32>
    %289 = vector.shape_cast %258 : vector<1x16xf32> to vector<1x1x16xf32>
    tpu.vector_store %arg11[%c0_96, %c0_97, %c0_98], %289 {strides = array<i32>} : memref<1x1x16xf32, #tpu.memory_space<vmem>>, vector<1x1x16xf32>,
    return
  }
  func.func @transform_0(%arg0: i32) -> (i32, i32, i32) {
    %c0_i32 = arith.constant 0 : i32
    %c0_i32_0 = arith.constant 0 : i32
    %c0_i32_1 = arith.constant 0 : i32
    return %arg0, %c0_i32, %c0_i32_0 : i32, i32, i32
  }
  func.func @transform_1(%arg0: i32) -> (i32, i32, i32) {
    %c0_i32 = arith.constant 0 : i32
    %c0_i32_0 = arith.constant 0 : i32
    %c0_i32_1 = arith.constant 0 : i32
    return %arg0, %c0_i32, %c0_i32_0 : i32, i32, i32
  }
  func.func @transform_2(%arg0: i32) -> (i32, i32, i32, i32) {
    %c0_i32 = arith.constant 0 : i32
    %c0_i32_0 = arith.constant 0 : i32
    %c0_i32_1 = arith.constant 0 : i32
    %c0_i32_2 = arith.constant 0 : i32
    %c0_i32_3 = arith.constant 0 : i32
    return %c0_i32, %c0_i32_0, %c0_i32_1, %c0_i32_2 : i32, i32, i32, i32
  }
  func.func @transform_3(%arg0: i32) -> (i32, i32, i32, i32) {
    %c0_i32 = arith.constant 0 : i32
    %c0_i32_0 = arith.constant 0 : i32
    %c0_i32_1 = arith.constant 0 : i32
    %c0_i32_2 = arith.constant 0 : i32
    %c0_i32_3 = arith.constant 0 : i32
    return %c0_i32, %c0_i32_0, %c0_i32_1, %c0_i32_2 : i32, i32, i32, i32
  }
  func.func @transform_4(%arg0: i32) -> (i32, i32, i32) {
    %c0_i32 = arith.constant 0 : i32
    %c0_i32_0 = arith.constant 0 : i32
    %c0_i32_1 = arith.constant 0 : i32
    %c0_i32_2 = arith.constant 0 : i32
    return %c0_i32, %c0_i32_0, %c0_i32_1 : i32, i32, i32
  }
  func.func @transform_5(%arg0: i32) -> (i32, i32, i32) {
    %c0_i32 = arith.constant 0 : i32
    %c0_i32_0 = arith.constant 0 : i32
    %c0_i32_1 = arith.constant 0 : i32
    %c0_i32_2 = arith.constant 0 : i32
    return %c0_i32, %c0_i32_0, %c0_i32_1 : i32, i32, i32
  }
  func.func @transform_6(%arg0: i32) -> (i32, i32, i32) {
    %c0_i32 = arith.constant 0 : i32
    %c0_i32_0 = arith.constant 0 : i32
    %c0_i32_1 = arith.constant 0 : i32
    %c0_i32_2 = arith.constant 0 : i32
    return %c0_i32, %c0_i32_0, %c0_i32_1 : i32, i32, i32
  }
  func.func @transform_7(%arg0: i32) -> (i32, i32) {
    %c0_i32 = arith.constant 0 : i32
    %c0_i32_0 = arith.constant 0 : i32
    %c0_i32_1 = arith.constant 0 : i32
    return %c0_i32, %c0_i32_0 : i32, i32
  }
  func.func @transform_8(%arg0: i32) -> (i32, i32, i32) {
    %c0_i32 = arith.constant 0 : i32
    %c0_i32_0 = arith.constant 0 : i32
    %c0_i32_1 = arith.constant 0 : i32
    return %arg0, %c0_i32, %c0_i32_0 : i32, i32, i32
  }
  func.func @transform_9(%arg0: i32) -> (i32, i32, i32) {
    %c0_i32 = arith.constant 0 : i32
    %c0_i32_0 = arith.constant 0 : i32
    %c0_i32_1 = arith.constant 0 : i32
    return %arg0, %c0_i32, %c0_i32_0 : i32, i32, i32
  }
  func.func @transform_10(%arg0: i32) -> (i32, i32, i32) {
    %c0_i32 = arith.constant 0 : i32
    %c0_i32_0 = arith.constant 0 : i32
    %c0_i32_1 = arith.constant 0 : i32
    return %arg0, %c0_i32, %c0_i32_0 : i32, i32, i32
  }
}

</mosaic_0001>

<bundles_post_ra>
// kernel: custom-call.3
= control target key start
LH: loop header
LB: loop body
LE: loop exit
PB: predicated region body
PF: predicated region fallthrough
CT: control target
= control target key end

     0   :  { %s6_s0 = inlined_call_operand.vmem [shape: u32[2,16], index: 0, kind: output, shape index: {}]  }

// kernel: squeeze.12
= control target key start
LH: loop header
LB: loop body
LE: loop exit
PB: predicated region body
PF: predicated region fallthrough
CT: control target
= control target key end

     0   :  { %vm7_vm0 = vcmask 130048   ;;  %s39_s0 = inlined_call_operand.vmem [shape: s32[32], index: 0, kind: input, shape index: {}]   ;;  %s40_s1 = inlined_call_operand.vmem [shape: s32[2,16], index: 1, kind: output, shape index: {}]  }
   0x1   :  { %v4_v0 = vld [vmem:[%s39_s0] sm:$0x1]  ;;  %s22_s0 = smov 112  }
   0x2   :  { %5 = vst [vmem:[#allocation1] sm:$0x1] %v4_v0 }
   0x9   :  { %v9_v1 = vld [vmem:[#allocation1] sm:$0x1]  }
   0xa   :  { %v6_v2 = vld [vmem:[#allocation1] sm:$0x1]   ;;  %10 = vrot.lane.b32.xlu0 %v9_v1, %s22_s0 }
   0xb   :  { %8 = vst.msk [vmem:[#allocation0] sm:$0x1] %vm7_vm0, %v6_v2  }
  0x7c   :  { %v11_v3 = vpop.permute.xlu0 %10  }
  0x7d   :  { %14 = vst.msk [vmem:[#allocation0 + $0x1] sm:$0x1] %vm7_vm0, %v11_v3  }
  0x84   :  { %v17_v4 = vld [vmem:[#allocation0] sm:$0x3] }
  0x85   :  { %20 = vst [vmem:[%s40_s1] sm:$0x3] %v17_v4 }

// kernel: variance_adaptor_forward.2
= control target key start
LH: loop header
LB: loop body
LE: loop exit
PB: predicated region body
PF: predicated region fallthrough
CT: control target
= control target key end

     0   :  { %13 = vsyncpa [#allocation3], 0  ;;  %s1652_s0 = inlined_call_operand.vmem [shape: f32[2,32,8], index: 0, kind: input, shape index: {}]   ;;  %s1653_s1 = inlined_call_operand.vmem [shape: f32[2,1,8], index: 1, kind: input, shape index: {}]   ;;  %s1654_s2 = inlined_call_operand.vmem [shape: bf16[3,32,32], index: 2, kind: input, shape index: {}]   ;;  %s1655_s3 = inlined_call_operand.vmem [shape: bf16[3,32,32], index: 3, kind: input, shape index: {}]   ;;  %s1656_s4 = inlined_call_operand.vmem [shape: f32[32,8], index: 4, kind: input, shape index: {}]   ;;  %s1657_s5 = inlined_call_operand.vmem [shape: bf16[1,32], index: 5, kind: input, shape index: {}]   ;;  %s1658_s6 = inlined_call_operand.hbm [shape: f32[2,1,8], index: 6, kind: output, shape index: {0}]   ;;  %s1659_s7 = inlined_call_operand.vmem [shape: s32[2,1,8], index: 7, kind: output, shape index: {1}]  }
   0x1   :  { %15 = vsyncpa [#allocation3 + $0x1], 0  ;;  %s1383_s24 = smov 0   ;;  %s1385_s25 = smov 0  }
   0x2   :  { %s1387_s26 = smov 0   ;;  %s1389_s27 = smov 0  }
   0x3 LB: > { %s1404_s28 = sadd.s32 4294967295, %s1329_s27   ;;  %s1046_s29 = sadd.s32 4294967294, %s1329_s27   ;;  %s1329_s27 = sphi %s1389_s27, %s1665_s27   ;;  %s1325_s26 = sphi %s1387_s26, %s1664_s26   ;;  %s1321_s25 = sphi %s1385_s25, %s1663_s25   ;;  %s1317_s24 = sphi %s1383_s24, %s1662_s24  }
   0x4   : > { %s1408_s30 = sadd.s32 1, %s1329_s27   ;;  %s164_s8 = sadd.s32 1, %s1325_s26 }
   0x5   : > { %s161_s9 = ssub.s32 %s1329_s27, %s1408_s30  ;;  %p174_p0 = scmp.ne.s32.totalorder %s1325_s26, %s1321_s25 }
   0x6   : > { %p162_p1 = scmp.eq.s32.totalorder %s161_s9, 0  ;;  %p175_p2 = scmp.eq.s32.totalorder %s1404_s28, 1 }
   0x7   : > { %p180_p3 = scmp.ne.s32.totalorder %s1321_s25, %s1317_s24  ;;  %p181_p4 = scmp.eq.s32.totalorder %s1046_s29, 1 }
   0x8   : > { %s1419_s10 = scalar_select %p162_p1, %s1325_s26, %s164_s8  }
   0x9   : > { %p1421_p5 = por %p175_p2, %p174_p0  ;;  %p1425_p6 = por %p181_p4, %p180_p3 }
   0xa   : > { %p1049_p7 = scmp.ge.s32.totalorder %s1329_s27, 1  ;;  %p251_p8 = scmp.lt.s32.totalorder %s1329_s27, 3 }
   0xc   : > { %p252_p9 = pnand %p1049_p7, %p251_p8 }
   0xd   : > { %p288_p10 = scmp.lt.s32.totalorder (!%p252_p9), %s1404_s28, 1  ;;  %s1331_s18 = smov (!%p252_p9), 8  }
   0xe   : > { %255 = sbr.rel (%p252_p9) target bundleno = 1373 (0x55d), region = 44  ;;  %s1332_s19 = smov (!%p252_p9), 127  }
   0xf   : > { %s1333_s20 = smov (!%p252_p9), 121   ;;  %s281_s21 = sand.u32 (!%p252_p9), 1, %s1321_s25  }
  0x10   : > { %s956_s8 = scalar_lea.hbm (!%p252_p9), %s1658_s6, %s1404_s28  ;;  %s282_s9 = scalar_lea.vmem (!%p252_p9), [#allocation2], %s281_s21 }
  0x11   : > { %s960_s15 = sshll.u32 (!%p252_p9), %s956_s8, 4  ;;  %s945_s16 = scalar_lea.sflag (!%p252_p9), [#allocation3], %s281_s21  ;;  %s961_s15 = int_to_ptr.hbm [resolvable:$true] %s960_s15 }
  0x12   : > { %s1287_s22 = scalar_lea.hbm (!%p252_p9), %s1658_s6, 2 }
  0x13   : > { %s1433_s13 = scalar_select %p288_p10, %s1404_s28, 1  ;;  %vm342_vm0 = vcmask 1047616   ;;  %v1121_v32 = vld [vmem:[%s1654_s2 + $0x10] sm:$0xff]  ;;  %vm387_vm1 = vcmask 261120   ;;  %v1122_v34 = vld [vmem:[%s1654_s2 + $0x18] sm:$0xff]  ;;  %v1471_v36 = vld [vmem:[%s1656_s4 + $0x8] sm:$0xff]  ;;  %v305_v51 = vlaneseq }
  0x14   : > { %v1466_v35 = vld [vmem:[%s1656_s4 + $0x10] sm:$0xff]  ;;  %v1334_v37 = vmov 0   ;;  %v1476_v38 = vld [vmem:[%s1656_s4] sm:$0xff]  ;;  %v1488_v41 = vld [vmem:[%s1656_s4 + $0x18] sm:$0xff]  ;;  %v1335_v42 = vmov 1   ;;  %v1336_v43 = vmov 2  }
  0x15   : > { %s1118_s14 = sshll.u32 %s1433_s13, 5  ;;  %1219 = vset.pattern.permute.xlu1 %v1334_v37  ;;  %1218 = vset.pattern.permute.xlu0 %v1334_v37  ;;  %v1123_v40 = vld [vmem:[%s1654_s2 + $0x20] sm:$0xff]  ;;  %v1124_v45 = vld [vmem:[%s1654_s2 + $0x28] sm:$0xff]  ;;  %v306_v52 = vand.u32 127, %v305_v51  ;;  %v1337_v55 = vmov 0.0   ;;  %vm535_vm4 = vcmask 64512  }
  0x16   : > { %s292_s17 = scalar_lea.vmem %s1652_s0, %s1118_s14  ;;  %1217 = vset.pattern.permute.xlu2 %v1334_v37  ;;  %v1119_v47 = vld [vmem:[%s1654_s2] sm:$0xff]  ;;  %v1120_v48 = vld [vmem:[%s1654_s2 + $0x8] sm:$0xff]  ;;  %s958_s14 = sshll.u32 %s282_s9, 4  ;;  %vm940_vm12 = vcmask 57344   ;;  %s959_s14 = int_to_ptr.vmem [resolvable:$true] %s958_s14 }
  0x17   : > { %v302_v0 = vld [vmem:[%s292_s17 + $0x10] sm:$0xff]  ;;  %v303_v1 = vld [vmem:[%s292_s17 + $0x18] sm:$0xff]  ;;  %v300_v3 = vld [vmem:[%s292_s17] sm:$0xff]  ;;  %vm307_vm2 = vcmp.ne.s32.totalorder %v306_v52, 0  ;;  %vm310_vm3 = vcmp.ne.s32.totalorder %v306_v52, 7 }
  0x18   : > { %v1197_v2 = vpack.i.bf16 %v303_v1, %v302_v0  ;;  %v301_v4 = vld [vmem:[%s292_s17 + $0x8] sm:$0xff]  ;;  %v418_v30 = vpack.c.bf16 %v303_v1, %v302_v0  ;;  %v1511_v56 = vsel %vm307_vm2, 1.0, %v1337_v55  ;;  %v1514_v59 = vsel %vm310_vm3, 1.0, %v1337_v55  ;;  %s1281_s17 = sshra.s32 %s961_s15, 4  ;;  %s1282_s17 = int_to_ptr.hbm [resolvable:$true] %s1281_s17 }
  0x19   : > { %v1202_v5 = vpack.i.bf16 %v301_v4, %v300_v3  ;;  %v417_v31 = vpack.c.bf16 %v301_v4, %v300_v3  ;;  %p1288_p0 = scmp.lt.s32.totalorder %s1282_s17, %s1658_s6 }
  0x1a   : > { %1198 = vrot.lane.b32.xlu0 %v1197_v2, %s1331_s18  ;;  %441 = vmatpush.bf16.msra.mxu1 %v418_v30 }
  0x1e   : > { %442 = vmatpush.bf16.msra.mxu1 %v417_v31 }
  0x21   : > { %1072 = vmatmul.msk.bf16.vlgmr.msra.gmra.mxu1 %vm387_vm1, %v1121_v32 }
  0x22   : > { %1203 = vrot.lane.b32.xlu0 %v1202_v5, %s1331_s18 }
  0x31   : > { %1073 = vmatmul.msk.bf16.gmra.mxu1 %vm387_vm1, %v1122_v34 }
  0x8c   : > { %v1199_v6 = vpop.permute.xlu0 %1198 }
  0x8d   : > { %v1201_v7 = vunpack.i.h.bf16 %v1199_v6  ;;  %v1200_v8 = vunpack.i.l.bf16 %v1199_v6 }
  0x8f   : > { %v351_v9 = vsel %vm342_vm0, %v1200_v8, %v302_v0  ;;  %v354_v10 = vsel %vm342_vm0, %v1201_v7, %v303_v1 }
  0x90   : > { %v1207_v11 = vpack.i.bf16 %v354_v10, %v351_v9 }
  0x92   : > { %1208 = vrot.lane.b32.xlu1 %v1207_v11, %s1331_s18 }
  0x94   : > { %v1204_v12 = vpop.permute.xlu0 %1203 }
  0x95   : > { %v1206_v13 = vunpack.i.h.bf16 %v1204_v12  ;;  %v1205_v14 = vunpack.i.l.bf16 %v1204_v12 }
  0x97   : > { %v345_v15 = vsel %vm342_vm0, %v1205_v14, %v300_v3  ;;  %v348_v16 = vsel %vm342_vm0, %v1206_v13, %v301_v4  ;;  %v1338_v14 = vmov 32.0  }
  0x98   : > { %v1212_v17 = vpack.i.bf16 %v348_v16, %v345_v15  ;;  %1259 = vrcp.f32 %v1338_v14 }
  0x9a   : > { %1213 = vrot.lane.b32.xlu1 %v1212_v17, %s1331_s18 }
  0x9e   : > { %v444_v50 = vpop.f32.mrf.mxu1 }
  0xa6   : > { %v446_v54 = vpop.f32.mrf.mxu1 }
  0xae   : > { %v449_v63 = vpop.f32.mrf.mxu1 }
 0x104   : > { %v1209_v18 = vpop.permute.xlu1 %1208 }
 0x105   : > { %v1211_v19 = vunpack.i.h.bf16 %v1209_v18  ;;  %v1210_v20 = vunpack.i.l.bf16 %v1209_v18 }
 0x107   : > { %v365_v21 = vsel %vm342_vm0, %v1210_v20, %v302_v0  ;;  %v366_v22 = vsel %vm342_vm0, %v1211_v19, %v303_v1 }
 0x108   : > { %v368_v23 = vpack.c.bf16 %v366_v22, %v365_v21  ;;  %v451_v22 = vpop.f32.mrf.mxu1 }
 0x10a   : > { %470 = vrot.lane.b32.xlu2 %v368_v23, %s1332_s19  ;;  %383 = vrot.lane.b32.xlu0 %v368_v23, %s1333_s20 }
 0x10c   : > { %v1214_v24 = vpop.permute.xlu1 %1213 }
 0x10d   : > { %v1216_v25 = vunpack.i.h.bf16 %v1214_v24  ;;  %v1215_v26 = vunpack.i.l.bf16 %v1214_v24 }
 0x10f   : > { %v363_v27 = vsel %vm342_vm0, %v1215_v26, %v300_v3  ;;  %v364_v28 = vsel %vm342_vm0, %v1216_v25, %v301_v4  ;;  %v1260_v26 = vpop.eup %1259 }
 0x110   : > { %v367_v29 = vpack.c.bf16 %v364_v28, %v363_v27  ;;  %v550_v34 = vmul.f32 32.0, %v1260_v26  ;;  %vm554_vm5 = vweird.f32 %v1260_v26 }
 0x112   : > { %381 = vrot.lane.b32.xlu1 %v367_v29, %s1333_s20  ;;  %468 = vrot.lane.b32.xlu2 %v367_v29, %s1332_s19 }
 0x113   : > { %514 = vperm.xlu0 %1218, %v1471_v36  }
 0x11a   : > { %519 = vperm.xlu1 %1219, %v1466_v35   ;;  %509 = vperm.xlu2 %1217, %v1476_v38  }
 0x11b   : > { %1222 = vset.pattern.permute.xlu0 %v1336_v43 }
 0x11c   : > { %623 = vperm.xlu0 %1222, %v1466_v35  }
 0x122   : > { %1220 = vset.pattern.permute.xlu1 %v1335_v42  ;;  %524 = vperm.xlu2 %1217, %v1488_v41  }
 0x123   : > { %603 = vperm.xlu1 %1220, %v1466_v35  }
 0x124   : > { %619 = vperm.xlu0 %1222, %v1471_v36  }
 0x12a   : > { %1221 = vset.pattern.permute.xlu2 %v1335_v42 }
 0x12b   : > { %1223 = vset.pattern.permute.xlu1 %v1336_v43  ;;  %607 = vperm.xlu2 %1221, %v1488_v41  }
 0x12c   : > { %627 = vperm.xlu1 %1223, %v1488_v41  }
 0x133   : > { %595 = vperm.xlu2 %1221, %v1476_v38  }
 0x134   : > { %1224 = vset.pattern.permute.xlu1 %v1335_v42 }
 0x135   : > { %599 = vperm.xlu1 %1224, %v1471_v36  }
 0x13b   : > { %1225 = vset.pattern.permute.xlu2 %v1336_v43  ;;  %v551_v43 = vsub.f32 1.0, %v550_v34 }
 0x13c   : > { %615 = vperm.xlu2 %1225, %v1476_v38  }
 0x164   : > { %v471_v33 = vpop.permute.xlu2 %470 }
 0x165   : > { %486 = vmatpush.bf16.msra.mxu2 %v471_v33 }
 0x16c   : > { %v469_v39 = vpop.permute.xlu2 %468 }
 0x16d   : > { %487 = vmatpush.bf16.msra.mxu2 %v469_v39 }
 0x170   : > { %1082 = vmatmul.msk.bf16.vlgmr.msra.gmra.mxu2 %vm387_vm1, %v1123_v40 }
 0x174   : > { %v510_v7 = vpop.permute.xlu2 %509 }
 0x17c   : > { %v384_v44 = vpop.permute.xlu0 %383  ;;  %v525_v31 = vpop.permute.xlu2 %524 }
 0x17d   : > { %400 = vmatpush.bf16.msra.mxu0 %v384_v44  ;;  %1131 = vmatpush.bf16.msra.mxu3 %v384_v44 }
 0x180   : > { %1083 = vmatmul.msk.bf16.gmra.mxu2 %vm387_vm1, %v1124_v45 }
 0x184   : > { %v382_v46 = vpop.permute.xlu1 %381 }
 0x185   : > { %401 = vmatpush.bf16.msra.mxu0 %v382_v46  ;;  %1132 = vmatpush.bf16.msra.mxu3 %v382_v46  ;;  %v515_v13 = vpop.permute.xlu0 %514  ;;  %v552_v46 = vmul.f32 %v1260_v26, %v551_v43 }
 0x188   : > { %1062 = vmatmul.msk.bf16.vlgmr.msra.gmra.mxu0 %vm387_vm1, %v1119_v47  ;;  %1063 = vmatmul.msk.bf16.vlgmr.msra.gmra.mxu3 %vm387_vm1, %v1120_v48 }
 0x18c   : > { %v520_v12 = vpop.permute.xlu1 %519 }
 0x1f3   : > { %v489_v49 = vpop.f32.mrf.mxu2 }
 0x1f4   : > { %v499_v62 = vmul.f32 %v1514_v59, %v489_v49  ;;  %v553_v49 = vadd.f32 %v1260_v26, %v552_v46 }
 0x1f6   : > { %v1527_v52 = vsel %vm554_vm5, %v1260_v26, %v553_v49 }
 0x1fb   : > { %v491_v53 = vpop.f32.mrf.mxu2 }
 0x1fc   : > { %v500_v8 = vmul.f32 %v1514_v59, %v491_v53 }
 0x203   : > { %v494_v61 = vpop.f32.mrf.mxu2 }
 0x204   : > { %v501_v1 = vmul.f32 %v1514_v59, %v494_v61 }
 0x205   : > { %v403_v57 = vpop.f32.mrf.mxu0 }
 0x206   : > { %v413_v58 = vmul.f32 %v1511_v56, %v403_v57 }
 0x208   : > { %v454_v60 = vadd.f32 %v444_v50, %v413_v58 }
 0x20a   : > { %v503_v2 = vadd.f32 %v499_v62, %v454_v60 }
 0x20b   : > { %v408_v0 = vpop.f32.mrf.mxu3  ;;  %v496_v16 = vpop.f32.mrf.mxu2 }
 0x20c   : > { %v415_v3 = vmul.f32 %v1511_v56, %v408_v0  ;;  %v527_v9 = vadd.f32 %v510_v7, %v503_v2  ;;  %v502_v23 = vmul.f32 %v1514_v59, %v496_v16 }
 0x20d   : > { %v405_v4 = vpop.f32.mrf.mxu0 }
 0x20e   : > { %v456_v5 = vadd.f32 %v449_v63, %v415_v3  ;;  %v414_v6 = vmul.f32 %v1511_v56, %v405_v4  ;;  %v531_v18 = vmax.f32 %v527_v9, 0.0 }
 0x210   : > { %v455_v10 = vadd.f32 %v446_v54, %v414_v6  ;;  %v505_v11 = vadd.f32 %v501_v1, %v456_v5  ;;  %v536_v27 = vsel %vm535_vm4, %v531_v18, 0.0 }
 0x212   : > { %v504_v15 = vadd.f32 %v500_v8, %v455_v10  ;;  %v529_v19 = vadd.f32 %v520_v12, %v505_v11 }
 0x213   : > { %v410_v17 = vpop.f32.mrf.mxu3 }
 0x214   : > { %v528_v20 = vadd.f32 %v515_v13, %v504_v15  ;;  %v416_v21 = vmul.f32 %v1511_v56, %v410_v17  ;;  %v533_v28 = vmax.f32 %v529_v19, 0.0  ;;  %v604_v15 = vpop.permute.xlu1 %603  ;;  %v608_v17 = vpop.permute.xlu2 %607 }
 0x216   : > { %v532_v24 = vmax.f32 %v528_v20, 0.0  ;;  %v457_v25 = vadd.f32 %v451_v22, %v416_v21  ;;  %v539_v37 = vsel %vm535_vm4, %v533_v28, 0.0  ;;  %v624_v22 = vpop.permute.xlu0 %623 }
 0x218   : > { %v537_v29 = vsel %vm535_vm4, %v532_v24, 0.0  ;;  %v506_v30 = vadd.f32 %v502_v23, %v457_v25 }
 0x219   : > { %v538_v32 = vadd.f32 %v537_v29, %v536_v27 }
 0x21a   : > { %v530_v33 = vadd.f32 %v525_v31, %v506_v30 }
 0x21b   : > { %v540_v40 = vadd.f32 %v539_v37, %v538_v32 }
 0x21c   : > { %v534_v39 = vmax.f32 %v530_v33, 0.0  ;;  %v628_v20 = vpop.permute.xlu1 %627  ;;  %v596_v23 = vpop.permute.xlu2 %595 }
 0x21e   : > { %v541_v42 = vsel %vm535_vm4, %v534_v39, 0.0  ;;  %v620_v33 = vpop.permute.xlu0 %619 }
 0x21f   : > { %v542_v44 = vadd.f32 %v541_v42, %v540_v40 }
 0x221   : > { %v543_v45 = vrot.slane %v542_v44, 4 }
 0x223   : > { %v544_v47 = vadd.f32 %v543_v45, %v542_v44 }
 0x224   : > { %v616_v34 = vpop.permute.xlu2 %615 }
 0x225   : > { %v545_v48 = vrot.slane %v544_v47, 2 }
 0x227   : > { %v546_v50 = vadd.f32 %v545_v48, %v544_v47 }
 0x229   : > { %v547_v51 = vrot.slane %v546_v50, 1 }
 0x22b   : > { %v548_v53 = vadd.f32 %v547_v51, %v546_v50 }
 0x22d   : > { %v556_v54 = vmul.f32 %v1527_v52, %v548_v53 }
 0x22f   : > { %v560_v55 = vsub.f32 %v534_v39, %v556_v54  ;;  %v557_v57 = vsub.f32 %v531_v18, %v556_v54  ;;  %v558_v58 = vsub.f32 %v532_v24, %v556_v54  ;;  %v559_v60 = vsub.f32 %v533_v28, %v556_v54  ;;  %v600_v28 = vpop.permute.xlu1 %599 }
 0x231   : > { %v561_v61 = vmul.f32 %v557_v57, %v557_v57  ;;  %v562_v62 = vmul.f32 %v558_v58, %v558_v58  ;;  %v563_v63 = vmul.f32 %v559_v60, %v559_v60  ;;  %v564_v0 = vmul.f32 %v560_v55, %v560_v55 }
 0x233   : > { %v565_v1 = vsel %vm535_vm4, %v561_v61, 0.0  ;;  %v566_v2 = vsel %vm535_vm4, %v562_v62, 0.0  ;;  %v568_v4 = vsel %vm535_vm4, %v563_v63, 0.0  ;;  %v570_v6 = vsel %vm535_vm4, %v564_v0, 0.0 }
 0x234   : > { %v567_v3 = vadd.f32 %v566_v2, %v565_v1 }
 0x236   : > { %v569_v5 = vadd.f32 %v568_v4, %v567_v3 }
 0x238   : > { %v571_v7 = vadd.f32 %v570_v6, %v569_v5 }
 0x23a   : > { %v572_v8 = vrot.slane %v571_v7, 4 }
 0x23c   : > { %v573_v9 = vadd.f32 %v572_v8, %v571_v7 }
 0x23e   : > { %v574_v10 = vrot.slane %v573_v9, 2 }
 0x240   : > { %v575_v11 = vadd.f32 %v574_v10, %v573_v9 }
 0x242   : > { %v576_v12 = vrot.slane %v575_v11, 1 }
 0x244   : > { %v577_v13 = vadd.f32 %v576_v12, %v575_v11 }
 0x246   : > { %v578_v14 = vmul.f32 %v577_v13, %v1527_v52 }
 0x248   : > { %v579_v16 = vadd.f32 1e-05, %v578_v14  ;;  %v1127_v14 = vld [vmem:[%s1655_s3 + $0x10] sm:$0xff] }
 0x24a   : > { %1261 = vrsqrt.f32 %v579_v16  ;;  %vm586_vm7 = vweird.f32 %v579_v16 }
 0x250   : > { %v1262_v18 = vpop.eup %1261 }
 0x251   : > { %v581_v19 = vmul.f32 %v1262_v18, %v579_v16  ;;  %vm587_vm6 = vweird.f32 %v1262_v18  ;;  %v1339_v16 = vmov 3  }
 0x252   : > { %vm588_vm8 = vmor %vm586_vm7, %vm587_vm6  ;;  %1246 = vset.pattern.permute.xlu0 %v1339_v16  ;;  %1247 = vset.pattern.permute.xlu1 %v1339_v16 }
 0x253   : > { %v582_v21 = vmul.f32 %v1262_v18, %v581_v19  ;;  %1248 = vset.pattern.permute.xlu2 %v1339_v16  ;;  %v1128_v19 = vld [vmem:[%s1655_s3 + $0x18] sm:$0xff] }
 0x255   : > { %v583_v24 = vmul.f32 0.5, %v582_v21  ;;  %v1341_v21 = vmov 5  }
 0x257   : > { %v584_v25 = vsub.f32 1.5, %v583_v24 }
 0x259   : > { %v585_v26 = vmul.f32 %v1262_v18, %v584_v25  ;;  %v1129_v25 = vld [vmem:[%s1655_s3 + $0x20] sm:$0xff] }
 0x25b   : > { %v589_v27 = vsel %vm588_vm8, %v1262_v18, %v585_v26  ;;  %v1125_v18 = vld [vmem:[%s1655_s3] sm:$0xff] }
 0x25c   : > { %v592_v29 = vmul.f32 %v589_v27, %v559_v60  ;;  %v593_v30 = vmul.f32 %v589_v27, %v560_v55  ;;  %v590_v31 = vmul.f32 %v589_v27, %v557_v57  ;;  %v591_v32 = vmul.f32 %v589_v27, %v558_v58 }
 0x25e   : > { %v612_v37 = vmul.f32 %v604_v15, %v592_v29  ;;  %v613_v39 = vmul.f32 %v608_v17, %v593_v30  ;;  %v610_v40 = vmul.f32 %v596_v23, %v590_v31  ;;  %v611_v42 = vmul.f32 %v600_v28, %v591_v32 }
 0x260   : > { %v633_v43 = vadd.f32 %v628_v20, %v613_v39  ;;  %v632_v44 = vadd.f32 %v624_v22, %v612_v37  ;;  %v631_v45 = vadd.f32 %v620_v33, %v611_v42  ;;  %v630_v46 = vadd.f32 %v616_v34, %v610_v40  ;;  %v1126_v22 = vld [vmem:[%s1655_s3 + $0x8] sm:$0xff] }
 0x261   : > { %v1340_v20 = vmov 4  }
 0x262   : > { %v1226_v47 = vpack.i.bf16 %v633_v43, %v632_v44  ;;  %v708_v48 = vpack.c.bf16 %v633_v43, %v632_v44  ;;  %v1231_v49 = vpack.i.bf16 %v631_v45, %v630_v46  ;;  %v707_v50 = vpack.c.bf16 %v631_v45, %v630_v46 }
 0x264   : > { %1227 = vrot.lane.b32.xlu1 %v1226_v47, %s1331_s18  ;;  %731 = vmatpush.bf16.msrb.mxu0 %v708_v48 }
 0x265   : > { %1232 = vrot.lane.b32.xlu2 %v1231_v49, %s1331_s18 }
 0x268   : > { %732 = vmatpush.bf16.msrb.mxu0 %v707_v50 }
 0x26b   : > { %1102 = vmatmul.msk.bf16.vlgmr.msrb.gmra.mxu0 %vm387_vm1, %v1127_v14 }
 0x27b   : > { %1103 = vmatmul.msk.bf16.gmra.mxu0 %vm387_vm1, %v1128_v19 }
 0x2bf   : > { %v1233_v51 = vpop.permute.xlu2 %1232 }
 0x2c0   : > { %v1235_v53 = vunpack.i.h.bf16 %v1233_v51  ;;  %v1234_v54 = vunpack.i.l.bf16 %v1233_v51 }
 0x2c2   : > { %v636_v55 = vsel %vm342_vm0, %v1234_v54, %v630_v46  ;;  %v639_v57 = vsel %vm342_vm0, %v1235_v53, %v631_v45 }
 0x2c3   : > { %v1241_v58 = vpack.i.bf16 %v639_v57, %v636_v55 }
 0x2c5   : > { %1242 = vrot.lane.b32.xlu1 %v1241_v58, %s1331_s18 }
 0x2d6   : > { %v1228_v60 = vpop.permute.xlu1 %1227 }
 0x2d7   : > { %v1230_v61 = vunpack.i.h.bf16 %v1228_v60  ;;  %v1229_v62 = vunpack.i.l.bf16 %v1228_v60 }
 0x2d9   : > { %v642_v63 = vsel %vm342_vm0, %v1229_v62, %v632_v44  ;;  %v645_v0 = vsel %vm342_vm0, %v1230_v61, %v633_v43 }
 0x2da   : > { %v1236_v1 = vpack.i.bf16 %v645_v0, %v642_v63 }
 0x2dc   : > { %1237 = vrot.lane.b32.xlu0 %v1236_v1, %s1331_s18  ;;  %s1283_s18 = scalar_lea.hbm %s1282_s17, 1 }
 0x2dd   : > { %p1284_p11 = scmp.ne.s32.totalorder %s1282_s17, %s1283_s18  ;;  %p1289_p1 = scmp.lt.s32.totalorder %s1287_s22, %s1283_s18 }
 0x2df   : > { %p1285_p12 = pnand %p1284_p11, %p1421_p5  ;;  %p1290_p2 = por %p1289_p1, %p1288_p0 }
 0x2e1   : > { %p1286_p13 = pneg %p1285_p12 }
 0x2e3   : > { %p1291_p3 = pnand %p1290_p2, %p1286_p13 }
 0x2e8   : > { %v734_v26 = vpop.f32.mrf.mxu0 }
 0x2f0   : > { %v736_v29 = vpop.f32.mrf.mxu0 }
 0x2f8   : > { %v739_v37 = vpop.f32.mrf.mxu0 }
 0x300   : > { %v741_v60 = vpop.f32.mrf.mxu0 }
 0x337   : > { %v1243_v2 = vpop.permute.xlu1 %1242 }
 0x338   : > { %v1245_v3 = vunpack.i.h.bf16 %v1243_v2  ;;  %v1244_v4 = vunpack.i.l.bf16 %v1243_v2 }
 0x33a   : > { %v654_v5 = vsel %vm342_vm0, %v1244_v4, %v630_v46  ;;  %v655_v6 = vsel %vm342_vm0, %v1245_v3, %v631_v45 }
 0x33b   : > { %v658_v7 = vpack.c.bf16 %v655_v6, %v654_v5 }
 0x33d   : > { %672 = vrot.lane.b32.xlu0 %v658_v7, %s1333_s20 }
 0x345   : > { %798 = vperm.xlu0 %1246, %v1476_v38  }
 0x34d   : > { %1250 = vset.pattern.permute.xlu0 %v1340_v20 }
 0x34e   : > { %v1238_v8 = vpop.permute.xlu0 %1237  ;;  %885 = vperm.xlu0 %1250, %v1488_v41  }
 0x34f   : > { %v1240_v9 = vunpack.i.h.bf16 %v1238_v8  ;;  %v1239_v10 = vunpack.i.l.bf16 %v1238_v8 }
 0x351   : > { %v656_v11 = vsel %vm342_vm0, %v1239_v10, %v632_v44  ;;  %v657_v12 = vsel %vm342_vm0, %v1240_v9, %v633_v43 }
 0x352   : > { %v659_v13 = vpack.c.bf16 %v657_v12, %v656_v11 }
 0x354   : > { %674 = vrot.lane.b32.xlu2 %v659_v13, %s1333_s20  ;;  %760 = vrot.lane.b32.xlu1 %v659_v13, %s1332_s19 }
 0x356   : > { %1255 = vset.pattern.permute.xlu0 %v1341_v21 }
 0x357   : > { %893 = vperm.xlu0 %1255, %v1476_v38  }
 0x35c   : > { %758 = vrot.lane.b32.xlu2 %v658_v7, %s1332_s19  ;;  %802 = vperm.xlu1 %1247, %v1471_v36   ;;  %s295_s19 = scalar_lea.vmem %s1653_s1, %s1433_s13 }
 0x364   : > { %806 = vperm.xlu2 %1248, %v1466_v35   ;;  %810 = vperm.xlu1 %1247, %v1488_v41  }
 0x36c   : > { %1249 = vset.pattern.permute.xlu2 %v1340_v20  ;;  %1251 = vset.pattern.permute.xlu1 %v1341_v21 }
 0x36d   : > { %881 = vperm.xlu2 %1249, %v1466_v35   ;;  %901 = vperm.xlu1 %1251, %v1466_v35   ;;  %v1130_v35 = vld [vmem:[%s1655_s3 + $0x28] sm:$0xff] }
 0x375   : > { %1252 = vset.pattern.permute.xlu2 %v1341_v21  ;;  %1253 = vset.pattern.permute.xlu1 %v1340_v20 }
 0x376   : > { %905 = vperm.xlu2 %1252, %v1488_v41   ;;  %873 = vperm.xlu1 %1253, %v1476_v38  }
 0x37e   : > { %1254 = vset.pattern.permute.xlu2 %v1340_v20  ;;  %1256 = vset.pattern.permute.xlu1 %v1341_v21 }
 0x37f   : > { %877 = vperm.xlu2 %1254, %v1471_v36   ;;  %897 = vperm.xlu1 %1256, %v1471_v36  }
 0x3ae   : > { %v675_v15 = vpop.permute.xlu2 %674 }
 0x3af   : > { %690 = vmatpush.bf16.msrb.mxu3 %v675_v15  ;;  %v673_v17 = vpop.permute.xlu0 %672 }
 0x3b3   : > { %691 = vmatpush.bf16.msrb.mxu3 %v673_v17 }
 0x3b6   : > { %1092 = vmatmul.msk.bf16.vlgmr.msrb.gmra.mxu3 %vm387_vm1, %v1125_v18  ;;  %v759_v24 = vpop.permute.xlu2 %758 }
 0x3b7   : > { %v799_v47 = vpop.permute.xlu0 %798 }
 0x3be   : > { %v807_v51 = vpop.permute.xlu2 %806 }
 0x3c6   : > { %v761_v23 = vpop.permute.xlu1 %760  ;;  %1093 = vmatmul.msk.bf16.gmra.mxu3 %vm387_vm1, %v1126_v22 }
 0x3c7   : > { %776 = vmatpush.bf16.msrb.mxu1 %v761_v23 }
 0x3cb   : > { %777 = vmatpush.bf16.msrb.mxu1 %v759_v24 }
 0x3ce   : > { %1112 = vmatmul.msk.bf16.vlgmr.msrb.gmra.mxu1 %vm387_vm1, %v1129_v25  ;;  %v803_v45 = vpop.permute.xlu1 %802 }
 0x3d6   : > { %v811_v5 = vpop.permute.xlu1 %810 }
 0x3de   : > { %1113 = vmatmul.msk.bf16.gmra.mxu1 %vm387_vm1, %v1130_v35 }
 0x439   : > { %v693_v41 = vpop.f32.mrf.mxu3 }
 0x43a   : > { %v703_v32 = vmul.f32 %v1511_v56, %v693_v41 }
 0x43c   : > { %v744_v39 = vadd.f32 %v734_v26, %v703_v32 }
 0x441   : > { %v695_v27 = vpop.f32.mrf.mxu3 }
 0x442   : > { %v704_v33 = vmul.f32 %v1511_v56, %v695_v27 }
 0x444   : > { %v745_v40 = vadd.f32 %v736_v29, %v704_v33 }
 0x449   : > { %v698_v30 = vpop.f32.mrf.mxu3 }
 0x44a   : > { %v705_v34 = vmul.f32 %v1511_v56, %v698_v30 }
 0x44b   : > { %v779_v28 = vpop.f32.mrf.mxu1 }
 0x44c   : > { %v789_v42 = vmul.f32 %v1514_v59, %v779_v28  ;;  %v746_v43 = vadd.f32 %v739_v37, %v705_v34 }
 0x44e   : > { %v793_v48 = vadd.f32 %v789_v42, %v744_v39  ;;  %v882_v42 = vpop.permute.xlu2 %881 }
 0x450   : > { %v813_v55 = vadd.f32 %v799_v47, %v793_v48 }
 0x451   : > { %v700_v50 = vpop.f32.mrf.mxu3 }
 0x452   : > { %v706_v57 = vmul.f32 %v1511_v56, %v700_v50  ;;  %v817_v63 = vmax.f32 %v813_v55, 0.0 }
 0x453   : > { %v781_v31 = vpop.f32.mrf.mxu1 }
 0x454   : > { %v790_v36 = vmul.f32 %v1514_v59, %v781_v31  ;;  %v747_v0 = vadd.f32 %v741_v60, %v706_v57  ;;  %v821_v6 = vsel %vm535_vm4, %v817_v63, 0.0 }
 0x456   : > { %v794_v44 = vadd.f32 %v790_v36, %v745_v40  ;;  %v906_v48 = vpop.permute.xlu2 %905 }
 0x458   : > { %v814_v53 = vadd.f32 %v803_v45, %v794_v44  ;;  %v902_v44 = vpop.permute.xlu1 %901  ;;  %v1342_v45 = vmov 6  }
 0x459   : > { %1257 = vset.pattern.permute.xlu2 %v1342_v45  ;;  %1258 = vset.pattern.permute.xlu0 %v1342_v45 }
 0x45a   : > { %v818_v61 = vmax.f32 %v814_v53, 0.0  ;;  %915 = vperm.xlu2 %1257, %v1476_v38   ;;  %v886_v53 = vpop.permute.xlu0 %885 }
 0x45b   : > { %v784_v46 = vpop.f32.mrf.mxu1 }
 0x45c   : > { %v791_v49 = vmul.f32 %v1514_v59, %v784_v46  ;;  %v822_v3 = vsel %vm535_vm4, %v818_v61, 0.0 }
 0x45d   : > { %v823_v9 = vadd.f32 %v822_v3, %v821_v6 }
 0x45e   : > { %v795_v54 = vadd.f32 %v791_v49, %v746_v43  ;;  %v878_v57 = vpop.permute.xlu2 %877 }
 0x460   : > { %v815_v58 = vadd.f32 %v807_v51, %v795_v54  ;;  %v874_v51 = vpop.permute.xlu1 %873 }
 0x462   : > { %v819_v1 = vmax.f32 %v815_v58, 0.0  ;;  %v894_v3 = vpop.permute.xlu0 %893 }
 0x463   : > { %v786_v62 = vpop.f32.mrf.mxu1 }
 0x464   : > { %v792_v2 = vmul.f32 %v1514_v59, %v786_v62  ;;  %v824_v7 = vsel %vm535_vm4, %v819_v1, 0.0 }
 0x465   : > { %v825_v10 = vadd.f32 %v824_v7, %v823_v9 }
 0x466   : > { %v796_v4 = vadd.f32 %v792_v2, %v747_v0 }
 0x468   : > { %v816_v8 = vadd.f32 %v811_v5, %v796_v4  ;;  %v898_v2 = vpop.permute.xlu1 %897 }
 0x46a   : > { %v820_v56 = vmax.f32 %v816_v8, 0.0 }
 0x46c   : > { %v826_v11 = vsel %vm535_vm4, %v820_v56, 0.0 }
 0x46d   : > { %v827_v12 = vadd.f32 %v826_v11, %v825_v10  ;;  %v304_v11 = vld [vmem:[%s295_s19] sm:$0x1] }
 0x46f   : > { %v828_v13 = vrot.slane %v827_v12, 4 }
 0x471   : > { %v829_v14 = vadd.f32 %v828_v13, %v827_v12 }
 0x473   : > { %v830_v15 = vrot.slane %v829_v14, 2 }
 0x475   : > { %v831_v16 = vadd.f32 %v830_v15, %v829_v14 }
 0x477   : > { %v832_v59 = vrot.slane %v831_v16, 1 }
 0x479   : > { %v833_v17 = vadd.f32 %v832_v59, %v831_v16 }
 0x47b   : > { %v834_v18 = vmul.f32 %v833_v17, %v1527_v52 }
 0x47d   : > { %v838_v19 = vsub.f32 %v820_v56, %v834_v18  ;;  %v835_v20 = vsub.f32 %v817_v63, %v834_v18  ;;  %v836_v21 = vsub.f32 %v818_v61, %v834_v18  ;;  %v837_v22 = vsub.f32 %v819_v1, %v834_v18  ;;  %v341_v56 = vld [vmem:[%s1657_s5] sm:$0x1] }
 0x47f   : > { %v839_v23 = vmul.f32 %v835_v20, %v835_v20  ;;  %v840_v24 = vmul.f32 %v836_v21, %v836_v21  ;;  %v841_v25 = vmul.f32 %v837_v22, %v837_v22  ;;  %v842_v35 = vmul.f32 %v838_v19, %v838_v19 }
 0x481   : > { %v843_v41 = vsel %vm535_vm4, %v839_v23, 0.0  ;;  %v844_v26 = vsel %vm535_vm4, %v840_v24, 0.0  ;;  %v846_v28 = vsel %vm535_vm4, %v841_v25, 0.0  ;;  %v848_v30 = vsel %vm535_vm4, %v842_v35, 0.0 }
 0x482   : > { %v845_v27 = vadd.f32 %v844_v26, %v843_v41 }
 0x484   : > { %v847_v29 = vadd.f32 %v846_v28, %v845_v27 }
 0x486   : > { %v849_v31 = vadd.f32 %v848_v30, %v847_v29 }
 0x488   : > { %v850_v32 = vrot.slane %v849_v31, 4 }
 0x48a   : > { %v851_v33 = vadd.f32 %v850_v32, %v849_v31 }
 0x48c   : > { %v852_v34 = vrot.slane %v851_v33, 2 }
 0x48e   : > { %v853_v36 = vadd.f32 %v852_v34, %v851_v33 }
 0x490   : > { %v854_v37 = vrot.slane %v853_v36, 1 }
 0x492   : > { %v855_v39 = vadd.f32 %v854_v37, %v853_v36 }
 0x494   : > { %v856_v40 = vmul.f32 %v855_v39, %v1527_v52 }
 0x496   : > { %v857_v43 = vadd.f32 1e-05, %v856_v40 }
 0x498   : > { %1263 = vrsqrt.f32 %v857_v43  ;;  %vm864_vm10 = vweird.f32 %v857_v43 }
 0x49e   : > { %v1264_v46 = vpop.eup %1263 }
 0x49f   : > { %v859_v47 = vmul.f32 %v1264_v46, %v857_v43  ;;  %vm865_vm9 = vweird.f32 %v1264_v46 }
 0x4a0   : > { %vm866_vm11 = vmor %vm864_vm10, %vm865_vm9 }
 0x4a1   : > { %v860_v49 = vmul.f32 %v1264_v46, %v859_v47 }
 0x4a3   : > { %v861_v50 = vmul.f32 0.5, %v860_v49 }
 0x4a5   : > { %v862_v54 = vsub.f32 1.5, %v861_v50 }
 0x4a7   : > { %v863_v55 = vmul.f32 %v1264_v46, %v862_v54 }
 0x4a9   : > { %v867_v52 = vsel %vm866_vm11, %v1264_v46, %v863_v55 }
 0x4aa   : > { %v870_v58 = vmul.f32 %v867_v52, %v837_v22  ;;  %v868_v60 = vmul.f32 %v867_v52, %v835_v20  ;;  %v871_v61 = vmul.f32 %v867_v52, %v838_v19  ;;  %v869_v62 = vmul.f32 %v867_v52, %v836_v21 }
 0x4ac   : > { %v890_v63 = vmul.f32 %v882_v42, %v870_v58  ;;  %v888_v38 = vmul.f32 %v874_v51, %v868_v60  ;;  %v891_v0 = vmul.f32 %v886_v53, %v871_v61  ;;  %v889_v1 = vmul.f32 %v878_v57, %v869_v62 }
 0x4ae   : > { %v910_v4 = vadd.f32 %v902_v44, %v890_v63  ;;  %v911_v5 = vadd.f32 %v906_v48, %v891_v0  ;;  %v909_v6 = vadd.f32 %v898_v2, %v889_v1  ;;  %v908_v7 = vadd.f32 %v894_v3, %v888_v38 }
 0x4b0   : > { %v913_v8 = vpack.c.bf16 %v911_v5, %v910_v4  ;;  %v912_v9 = vpack.c.bf16 %v909_v6, %v908_v7 }
 0x4b2   : > { %927 = vmatpush.bf16.msrb.mxu2 %v913_v8 }
 0x4b4   : > { %v916_v10 = vpop.permute.xlu2 %915 }
 0x4b6   : > { %928 = vmatpush.bf16.msrb.mxu2 %v912_v9 }
 0x4b9   : > { %1114 = vmatmul.msk.bf16.vlgmr.msrb.gmra.mxu2 %vm387_vm1, %v341_v56 }
 0x53c   : > { %v930_v12 = vpop.f32.mrf.mxu2 }
 0x53d   : > { %v931_v13 = vadd.f32 %v930_v12, %v916_v10 }
 0x53f   : > { %v934_v14 = vmul.f32 %v931_v13, %v304_v11 }
 0x541   : > { %v935_v15 = vmul.f32 1.442695, %v934_v14  ;;  %941 = vst.msk [vmem:[%s282_s9] sm:$0x1] %vm940_vm12, %v934_v14 }
 0x542   : > { %1294 = shalt.err (!%p1291_p3)
}
 0x543   : > { %1146 = dma.vmem_to_hbm [thread:$0]  (%p1421_p5), %s959_s14, 16, %s961_s15, %s945_s16   ;;  %1265 = vpow2.f32 %v935_v15 }
 0x544   : > { %v932_v16 = vpop.f32.mrf.mxu2  ;;  %s298_s29 = scalar_lea.vmem %s1659_s7, %s1433_s13 }
 0x549   : > { %v1266_v59 = vpop.eup %1265 }
 0x54a   : > { %v1115_v17 = vadd.f32 -1.0, %v1266_v59 }
 0x54c   : > { %v1135_v18 = vcvt.f32.s32 %v1115_v17  ;;  %v1133_v20 = vand.u32 2147483647, %v1115_v17  ;;  %v1138_v22 = vand.u32 2147483648, %v1115_v17 }
 0x54e   : > { %v1136_v19 = vcvt.s32.f32 %v1135_v18  ;;  %vm1134_vm13 = vcmp.lt.f32.partialorder %v1133_v20, 8388608.0 }
 0x550   : > { %v1137_v21 = vand.u32 2147483647, %v1136_v19 }
 0x552   : > { %v1139_v23 = vor.u32 %v1138_v22, %v1137_v21 }
 0x554   : > { %v1140_v24 = vsel %vm1134_vm13, %v1139_v23, %v1115_v17 }
 0x555   : > { %v939_v25 = vmax.f32 %v1140_v24, 0.0 }
 0x557   : > { %vm1141_vm14 = vcmp.lt.s32.totalorder %v939_v25, 0  ;;  %v1142_v35 = vceil.f32 %v939_v25  ;;  %v1143_v41 = vfloor.f32 %v939_v25 }
 0x559   : > { %v1144_v26 = vsel %vm1141_vm14, %v1142_v35, %v1143_v41 }
 0x55a   : > { %v1145_v27 = vcvt.f32.s32 %v1144_v26 }
 0x55c   : > { %943 = vst.msk [vmem:[%s298_s29] sm:$0x1] %vm940_vm12, %v1145_v27 }
 0x55d PF: > { %p1152_p4 = scmp.ge.s32.totalorder %s1329_s27, 2  ;;  %s975_s8 = sand.u32 1, %s1317_s24  }
 0x55e   : > { %s976_s9 = scalar_lea.sflag [#allocation3], %s975_s8 }
 0x55f   : > { %p1149_p5 = pnand %p1152_p4, %p1425_p6 }
 0x561   : > { %p1150_p7 = pneg %p1149_p5 }
 0x563   : > { %1312 = dma.done.wait (%p1150_p7), %s976_s9, 16  }
 0x564   : > { %1314 = vsyncadd (%p1150_p7), %s976_s9, 4294967280  ;;  %p18_p8 = scmp.ge.s32.totalorder %s1408_s30, 4   ;;  %s1662_s24 = smov %s1321_s25 }
 0x565   : > { %s1663_s25 = smov %s1325_s26  ;;  %s1664_s26 = smov %s1419_s10 }
 0x566   : > { %s1665_s27 = smov %s1408_s30  ;;  %20 = sbr.rel (!%p18_p8) target bundleno = 3 (0x3), region = 94 }
 0x56b   :  { %987 = vsyncpa [#allocation3], 1 }
 0x56c   :  { %989 = vsyncpa [#allocation3 + $0x1], 1 }

// kernel: variance_adaptor_forward.3
= control target key start
LH: loop header
LB: loop body
LE: loop exit
PB: predicated region body
PF: predicated region fallthrough
CT: control target
= control target key end

     0   :  { %s3211_s0 = inlined_call_operand.vmem [shape: f32[2,32,8], index: 0, kind: input, shape index: {}]   ;;  %s3212_s1 = inlined_call_operand.vmem [shape: s32[2,1,16], index: 1, kind: input, shape index: {}]   ;;  %s3213_s2 = inlined_call_operand.vmem [shape: bf16[2,3,32,32], index: 2, kind: input, shape index: {}]   ;;  %s3214_s3 = inlined_call_operand.vmem [shape: bf16[2,3,32,32], index: 3, kind: input, shape index: {}]   ;;  %s3215_s4 = inlined_call_operand.vmem [shape: f32[2,32,8], index: 4, kind: input, shape index: {}]   ;;  %s3216_s5 = inlined_call_operand.vmem [shape: bf16[2,1,32], index: 5, kind: input, shape index: {}]   ;;  %s3217_s6 = inlined_call_operand.vmem [shape: f32[2,31,1], index: 6, kind: input, shape index: {}]   ;;  %s3218_s7 = inlined_call_operand.vmem [shape: bf16[32,64], index: 7, kind: input, shape index: {}]   ;;  %s3219_s8 = inlined_call_operand.vmem [shape: f32[2,32,16], index: 8, kind: output, shape index: {0}]   ;;  %s3220_s9 = inlined_call_operand.hbm [shape: f32[2,1,16], index: 9, kind: output, shape index: {1}]   ;;  %s3221_s10 = inlined_call_operand.hbm [shape: f32[2,1,16], index: 10, kind: output, shape index: {2}]  }
   0x1   :  { %3231 = sst [smem:[#allocation8_spill]] %s3211_s0 }
   0x2   :  { %3232 = sst [smem:[#allocation9_spill]] %s3212_s1 }
   0x3   :  { %3233 = sst [smem:[#allocation10_spill]] %s3213_s2 }
   0x4   :  { %3234 = sst [smem:[#allocation11_spill]] %s3214_s3 }
   0x5   :  { %3235 = sst [smem:[#allocation12_spill]] %s3215_s4 }
   0x6   :  { %16 = vsyncpa [#allocation3], 0 }
   0x7   :  { %18 = vsyncpa [#allocation3 + $0x1], 0 }
   0x8   :  { %19 = vsyncpa [#allocation5], 0 }
   0x9   :  { %21 = vsyncpa [#allocation5 + $0x1], 0  ;;  %s2574_s13 = smov 0   ;;  %s2576_s14 = smov 0  }
   0xa   :  { %s2578_s15 = smov 0   ;;  %s2580_s16 = smov 0  }
   0xb LB: > { %s2595_s17 = sadd.s32 4294967295, %s2503_s16   ;;  %s2006_s18 = sadd.s32 4294967294, %s2503_s16   ;;  %s2503_s16 = sphi %s2580_s16, %s3255_s16   ;;  %s2499_s15 = sphi %s2578_s15, %s3254_s15   ;;  %s2495_s14 = sphi %s2576_s14, %s3253_s14   ;;  %s2491_s13 = sphi %s2574_s13, %s3252_s13  }
   0xc   : > { %s2599_s19 = sadd.s32 1, %s2503_s16   ;;  %s238_s20 = sadd.s32 1, %s2499_s15 }
   0xd   : > { %s235_s21 = ssub.s32 %s2503_s16, %s2599_s19  ;;  %p248_p0 = scmp.ne.s32.totalorder %s2499_s15, %s2495_s14 }
   0xe   : > { %p236_p1 = scmp.eq.s32.totalorder %s235_s21, 0  ;;  %p249_p2 = scmp.eq.s32.totalorder %s2595_s17, 1 }
   0xf   : > { %p254_p3 = scmp.ne.s32.totalorder %s2495_s14, %s2491_s13  ;;  %p255_p4 = scmp.eq.s32.totalorder %s2006_s18, 1 }
  0x10   : > { %s2610_s22 = scalar_select %p236_p1, %s2499_s15, %s238_s20  }
  0x11   : > { %p2612_p5 = por %p249_p2, %p248_p0  ;;  %p2616_p6 = por %p255_p4, %p254_p3 }
  0x12   : > { %p2009_p7 = scmp.ge.s32.totalorder %s2503_s16, 1  ;;  %p331_p8 = scmp.lt.s32.totalorder %s2503_s16, 3 }
  0x14   : > { %p332_p9 = pnand %p2009_p7, %p331_p8 }
  0x15   : > { %p380_p10 = scmp.lt.s32.totalorder (!%p332_p9), %s2595_s17, 1  ;;  %s3238_s1 = sld [smem:[#allocation9_spill]] (!%p332_p9) }
  0x16   : > { %335 = sbr.rel (%p332_p9) target bundleno = 2548 (0x9f4), region = 52  ;;  %s3239_s0 = sld [smem:[#allocation8_spill]] (!%p332_p9) }
  0x17   : > { %s3227_s18 = smov (!%p332_p9), 16   ;;  %s3223_s20 = smov (!%p332_p9), 127  }
  0x18   : > { %s3225_s21 = smov (!%p332_p9), 113   ;;  %s3240_s2 = sld [smem:[#allocation10_spill]] (!%p332_p9) }
  0x19   : > { %s3241_s4 = sld [smem:[#allocation12_spill]] (!%p332_p9)  ;;  %s3245_s26 = smov (!%p332_p9), 127  }
  0x1a   : > { %s3242_s3 = sld [smem:[#allocation11_spill]] (!%p332_p9) }
  0x1b   : > { %v399_v0 = vlaneseq  ;;  %s2624_s25 = scalar_select %p380_p10, %s2595_s17, 1  ;;  %vm405_vm0 = vcmask 64512   ;;  %v2505_v4 = vmov 1.0   ;;  %vm487_vm2 = vcmask 1047680  }
  0x1c   : > { %vm532_vm3 = vcmask 261120   ;;  %v2509_v46 = vmov 0   ;;  %v2510_v49 = vmov 1   ;;  %v2511_v50 = vmov 2  }
  0x1d   : > { %v2627_v1 = vshrl.u32 %v399_v0, 7  ;;  %s2633_s28 = scalar_lea.vmem %s3238_s1, %s2624_s25  ;;  %s3222_s29 = sshll.u32 %s2624_s25, 5  ;;  %2313 = vset.pattern.permute.xlu0 %v2509_v46  ;;  %2314 = vset.pattern.permute.xlu1 %v2509_v46  ;;  %v451_v59 = vand.u32 127, %v399_v0  ;;  %v2512_v63 = vmov 0.0   ;;  %vm3229_vm6 = vcmask 130048  }
  0x1e   : > { %v2397_v2 = vld [vmem:[%s2633_s28] ss:$0 sm:$0xff]  ;;  %s384_s12 = scalar_lea.vmem %s3239_s0, %s3222_s29  ;;  %v2210_v40 = vld [vmem:[%s3240_s2 + $0x10] sm:$0xff]  ;;  %v2211_v42 = vld [vmem:[%s3240_s2 + $0x18] sm:$0xff]  ;;  %2312 = vset.pattern.permute.xlu2 %v2509_v46  ;;  %s3243_s29 = smov 16  }
  0x1f   : > { %v394_v3 = vld [vmem:[%s384_s12] sm:$0xff]  ;;  %vm402_vm1 = vcmp.eq.s32.totalorder %v2627_v1, %v2397_v2  ;;  %v395_v5 = vld [vmem:[%s384_s12 + $0x8] sm:$0xff]  ;;  %v396_v6 = vld [vmem:[%s384_s12 + $0x10] sm:$0xff]  ;;  %vm452_vm4 = vcmp.ne.s32.totalorder %v451_v59, 0  ;;  %vm455_vm5 = vcmp.ne.s32.totalorder %v451_v59, 15 }
  0x20   : > { %2015 = vmatpush.msk.msra.mxu0 %vm402_vm1, %v2505_v4  ;;  %v397_v7 = vld [vmem:[%s384_s12 + $0x18] sm:$0xff]  ;;  %v2706_v44 = vld [vmem:[%s3241_s4 + $0x8] sm:$0xff]  ;;  %v2711_v45 = vld [vmem:[%s3241_s4 + $0x10] sm:$0xff]  ;;  %v2768_v2 = vsel %vm452_vm4, 1.0, %v2512_v63  ;;  %s3244_s12 = smov 113  }
  0x21   : > { %2016 = vmatmul.msk.f32.vlgmr.msra.gmra.mxu0 %vm405_vm0, %v394_v3  ;;  %v2718_v47 = vld [vmem:[%s3241_s4] sm:$0xff]  ;;  %v2727_v48 = vld [vmem:[%s3241_s4 + $0x18] sm:$0xff]  ;;  %v2209_v55 = vld [vmem:[%s3240_s2 + $0x8] sm:$0xff] }
  0x22   : > { %v2208_v53 = vld [vmem:[%s3240_s2] sm:$0xff]  ;;  %v2213_v56 = vld [vmem:[%s3240_s2 + $0x28] sm:$0xff] }
  0x23   : > { %v2212_v54 = vld [vmem:[%s3240_s2 + $0x20] sm:$0xff] }
  0x29   : > { %2017 = vmatmul.msk.f32.gmra.mxu0 %vm405_vm0, %v395_v5 }
  0x31   : > { %2018 = vmatmul.msk.f32.gmra.mxu0 %vm405_vm0, %v396_v6  ;;  %v2773_v6 = vsel %vm455_vm5, 1.0, %v2512_v63 }
  0x39   : > { %2019 = vmatmul.msk.f32.gmra.mxu0 %vm405_vm0, %v397_v7 }
  0x9e   : > { %v2643_v8 = vpop.f32.mrf.mxu0 }
  0xa6   : > { %v2645_v9 = vpop.f32.mrf.mxu0 }
  0xa7   : > { %v2661_v14 = vpack.c.bf16 %v2645_v9, %v2643_v8  ;;  %v2297_v15 = vpack.i.bf16 %v2645_v9, %v2643_v8 }
  0xae   : > { %v2647_v10 = vpop.f32.mrf.mxu0 }
  0xb6   : > { %v2649_v11 = vpop.f32.mrf.mxu0 }
  0xb7   : > { %v2292_v12 = vpack.i.bf16 %v2649_v11, %v2647_v10  ;;  %v2655_v13 = vpack.c.bf16 %v2649_v11, %v2647_v10 }
  0xb9   : > { %2293 = vrot.lane.b32.xlu0 %v2292_v12, %s3227_s18  ;;  %586 = vmatpush.bf16.msra.mxu2 %v2655_v13 }
  0xbd   : > { %587 = vmatpush.bf16.msra.mxu2 %v2661_v14 }
  0xc0   : > { %2041 = vmatmul.msk.bf16.vlgmr.msra.gmra.mxu2 %vm532_vm3, %v2210_v40 }
  0xc1   : > { %2298 = vrot.lane.b32.xlu0 %v2297_v15, %s3227_s18 }
  0xd0   : > { %2042 = vmatmul.msk.bf16.gmra.mxu2 %vm532_vm3, %v2211_v42 }
 0x12b   : > { %v2294_v16 = vpop.permute.xlu0 %2293 }
 0x12c   : > { %v2296_v17 = vunpack.i.h.bf16 %v2294_v16  ;;  %v2295_v18 = vunpack.i.l.bf16 %v2294_v16 }
 0x12e   : > { %v496_v19 = vsel %vm487_vm2, %v2295_v18, %v2647_v10  ;;  %v499_v20 = vsel %vm487_vm2, %v2296_v17, %v2649_v11 }
 0x12f   : > { %v2302_v21 = vpack.i.bf16 %v499_v20, %v496_v19 }
 0x131   : > { %2303 = vrot.lane.b32.xlu1 %v2302_v21, %s3227_s18 }
 0x133   : > { %v2299_v22 = vpop.permute.xlu0 %2298 }
 0x134   : > { %v2301_v23 = vunpack.i.h.bf16 %v2299_v22  ;;  %v2300_v24 = vunpack.i.l.bf16 %v2299_v22 }
 0x136   : > { %v490_v25 = vsel %vm487_vm2, %v2300_v24, %v2643_v8  ;;  %v493_v26 = vsel %vm487_vm2, %v2301_v23, %v2645_v9 }
 0x137   : > { %v2307_v27 = vpack.i.bf16 %v493_v26, %v490_v25 }
 0x139   : > { %2308 = vrot.lane.b32.xlu1 %v2307_v27, %s3227_s18 }
 0x143   : > { %v589_v57 = vpop.f32.mrf.mxu2 }
 0x14b   : > { %v591_v62 = vpop.f32.mrf.mxu2 }
 0x153   : > { %v594_v18 = vpop.f32.mrf.mxu2 }
 0x1a3   : > { %v2304_v28 = vpop.permute.xlu1 %2303 }
 0x1a4   : > { %v2306_v29 = vunpack.i.h.bf16 %v2304_v28  ;;  %v2305_v30 = vunpack.i.l.bf16 %v2304_v28 }
 0x1a6   : > { %v510_v31 = vsel %vm487_vm2, %v2305_v30, %v2647_v10  ;;  %v511_v32 = vsel %vm487_vm2, %v2306_v29, %v2649_v11  ;;  %v2513_v30 = vmov 32.0  }
 0x1a7   : > { %v513_v33 = vpack.c.bf16 %v511_v32, %v510_v31  ;;  %2398 = vrcp.f32 %v2513_v30 }
 0x1a9   : > { %615 = vrot.lane.b32.xlu2 %v513_v33, %s3223_s20 }
 0x1ab   : > { %v2309_v34 = vpop.permute.xlu1 %2308 }
 0x1ac   : > { %v2311_v35 = vunpack.i.h.bf16 %v2309_v34  ;;  %v2310_v36 = vunpack.i.l.bf16 %v2309_v34 }
 0x1ad   : > { %v2399_v42 = vpop.eup %2398 }
 0x1ae   : > { %v508_v37 = vsel %vm487_vm2, %v2310_v36, %v2643_v8  ;;  %v509_v38 = vsel %vm487_vm2, %v2311_v35, %v2645_v9  ;;  %v596_v35 = vpop.f32.mrf.mxu2  ;;  %v695_v59 = vmul.f32 32.0, %v2399_v42  ;;  %vm699_vm7 = vweird.f32 %v2399_v42 }
 0x1af   : > { %v512_v39 = vpack.c.bf16 %v509_v38, %v508_v37 }
 0x1b1   : > { %526 = vrot.lane.b32.xlu1 %v512_v39, %s3225_s21  ;;  %613 = vrot.lane.b32.xlu0 %v512_v39, %s3223_s20 }
 0x1b2   : > { %528 = vrot.lane.b32.xlu2 %v513_v33, %s3225_s21 }
 0x1b9   : > { %659 = vperm.xlu0 %2313, %v2706_v44   ;;  %664 = vperm.xlu1 %2314, %v2711_v45  }
 0x1ba   : > { %654 = vperm.xlu2 %2312, %v2718_v47  }
 0x1c1   : > { %2315 = vset.pattern.permute.xlu1 %v2510_v49  ;;  %2317 = vset.pattern.permute.xlu0 %v2511_v50 }
 0x1c2   : > { %748 = vperm.xlu1 %2315, %v2711_v45   ;;  %768 = vperm.xlu0 %2317, %v2711_v45  }
 0x1c3   : > { %669 = vperm.xlu2 %2312, %v2727_v48  }
 0x1ca   : > { %2318 = vset.pattern.permute.xlu1 %v2511_v50  ;;  %764 = vperm.xlu0 %2317, %v2706_v44  }
 0x1cb   : > { %772 = vperm.xlu1 %2318, %v2727_v48   ;;  %2316 = vset.pattern.permute.xlu2 %v2510_v49 }
 0x1cc   : > { %752 = vperm.xlu2 %2316, %v2727_v48  }
 0x1d3   : > { %2319 = vset.pattern.permute.xlu1 %v2510_v49 }
 0x1d4   : > { %744 = vperm.xlu1 %2319, %v2706_v44   ;;  %740 = vperm.xlu2 %2316, %v2718_v47  }
 0x1dc   : > { %2320 = vset.pattern.permute.xlu2 %v2511_v50 }
 0x1dd   : > { %760 = vperm.xlu2 %2320, %v2718_v47  }
 0x203   : > { %v2693_v41 = vpop.permute.xlu2 %615 }
 0x204   : > { %631 = vmatpush.bf16.msra.mxu3 %v2693_v41 }
 0x20c   : > { %v2700_v43 = vpop.permute.xlu2 %528 }
 0x20d   : > { %545 = vmatpush.bf16.msra.mxu1 %v2700_v43 }
 0x214   : > { %v655_v23 = vpop.permute.xlu2 %654 }
 0x223   : > { %v2733_v51 = vpop.permute.xlu1 %526  ;;  %v2735_v52 = vpop.permute.xlu0 %613 }
 0x224   : > { %546 = vmatpush.bf16.msra.mxu1 %v2733_v51  ;;  %632 = vmatpush.bf16.msra.mxu3 %v2735_v52 }
 0x227   : > { %2031 = vmatmul.msk.bf16.vlgmr.msra.gmra.mxu1 %vm532_vm3, %v2208_v53  ;;  %2051 = vmatmul.msk.bf16.vlgmr.msra.gmra.mxu3 %vm532_vm3, %v2212_v54 }
 0x22b   : > { %v660_v21 = vpop.permute.xlu0 %659  ;;  %v665_v27 = vpop.permute.xlu1 %664 }
 0x237   : > { %2032 = vmatmul.msk.bf16.gmra.mxu1 %vm532_vm3, %v2209_v55  ;;  %2052 = vmatmul.msk.bf16.gmra.mxu3 %vm532_vm3, %v2213_v56  ;;  %v670_v55 = vpop.permute.xlu2 %669 }
 0x2a4   : > { %v548_v58 = vpop.f32.mrf.mxu1 }
 0x2a5   : > { %v558_v4 = vmul.f32 %v2768_v2, %v548_v58 }
 0x2a7   : > { %v599_v15 = vadd.f32 %v589_v57, %v558_v4  ;;  %v696_v4 = vsub.f32 1.0, %v695_v59 }
 0x2aa   : > { %v634_v60 = vpop.f32.mrf.mxu3 }
 0x2ab   : > { %v644_v16 = vmul.f32 %v2773_v6, %v634_v60 }
 0x2ac   : > { %v550_v61 = vpop.f32.mrf.mxu1 }
 0x2ad   : > { %v559_v5 = vmul.f32 %v2768_v2, %v550_v61  ;;  %v648_v24 = vadd.f32 %v644_v16, %v599_v15 }
 0x2af   : > { %v600_v17 = vadd.f32 %v591_v62, %v559_v5  ;;  %v672_v31 = vadd.f32 %v655_v23, %v648_v24 }
 0x2b1   : > { %v676_v37 = vmax.f32 %v672_v31, 0.0 }
 0x2b2   : > { %v636_v3 = vpop.f32.mrf.mxu3 }
 0x2b3   : > { %v645_v0 = vmul.f32 %v2773_v6, %v636_v3  ;;  %v681_v56 = vsel %vm3229_vm6, %v676_v37, 0.0 }
 0x2b4   : > { %v553_v7 = vpop.f32.mrf.mxu1 }
 0x2b5   : > { %v560_v12 = vmul.f32 %v2768_v2, %v553_v7  ;;  %v649_v20 = vadd.f32 %v645_v0, %v600_v17  ;;  %v697_v0 = vmul.f32 %v2399_v42, %v696_v4 }
 0x2b7   : > { %v601_v19 = vadd.f32 %v594_v18, %v560_v12  ;;  %v673_v28 = vadd.f32 %v660_v21, %v649_v20  ;;  %v698_v16 = vadd.f32 %v2399_v42, %v697_v0 }
 0x2b9   : > { %v677_v34 = vmax.f32 %v673_v28, 0.0 }
 0x2ba   : > { %v639_v22 = vpop.f32.mrf.mxu3 }
 0x2bb   : > { %v646_v25 = vmul.f32 %v2773_v6, %v639_v22  ;;  %v682_v53 = vsel %vm3229_vm6, %v677_v34, 0.0 }
 0x2bc   : > { %v555_v26 = vpop.f32.mrf.mxu1  ;;  %v683_v60 = vadd.f32 %v682_v53, %v681_v56 }
 0x2bd   : > { %v650_v29 = vadd.f32 %v646_v25, %v601_v19  ;;  %v561_v32 = vmul.f32 %v2768_v2, %v555_v26  ;;  %v2785_v19 = vsel %vm699_vm7, %v2399_v42, %v698_v16 }
 0x2bf   : > { %v674_v33 = vadd.f32 %v665_v27, %v650_v29  ;;  %v602_v38 = vadd.f32 %v596_v35, %v561_v32 }
 0x2c1   : > { %v678_v39 = vmax.f32 %v674_v33, 0.0 }
 0x2c2   : > { %v641_v36 = vpop.f32.mrf.mxu3 }
 0x2c3   : > { %v647_v40 = vmul.f32 %v2773_v6, %v641_v36  ;;  %v684_v57 = vsel %vm3229_vm6, %v678_v39, 0.0 }
 0x2c4   : > { %v685_v62 = vadd.f32 %v684_v57, %v683_v60  ;;  %v753_v57 = vpop.permute.xlu2 %752 }
 0x2c5   : > { %v651_v54 = vadd.f32 %v647_v40, %v602_v38 }
 0x2c7   : > { %v675_v58 = vadd.f32 %v670_v55, %v651_v54  ;;  %v749_v55 = vpop.permute.xlu1 %748 }
 0x2c9   : > { %v679_v61 = vmax.f32 %v675_v58, 0.0 }
 0x2cb   : > { %v686_v3 = vsel %vm3229_vm6, %v679_v61, 0.0 }
 0x2cc   : > { %v687_v5 = vadd.f32 %v686_v3, %v685_v62  ;;  %v769_v62 = vpop.permute.xlu0 %768  ;;  %v741_v3 = vpop.permute.xlu2 %740 }
 0x2ce   : > { %v688_v7 = vrot.slane %v687_v5, 4 }
 0x2cf   : > { %v773_v60 = vpop.permute.xlu1 %772 }
 0x2d0   : > { %v689_v12 = vadd.f32 %v688_v7, %v687_v5 }
 0x2d2   : > { %v690_v15 = vrot.slane %v689_v12, 2 }
 0x2d4   : > { %v691_v17 = vadd.f32 %v690_v15, %v689_v12 }
 0x2d6   : > { %v692_v18 = vrot.slane %v691_v17, 1 }
 0x2d7   : > { %v745_v12 = vpop.permute.xlu1 %744 }
 0x2d8   : > { %v693_v20 = vadd.f32 %v692_v18, %v691_v17 }
 0x2da   : > { %v701_v21 = vmul.f32 %v2785_v19, %v693_v20  ;;  %v765_v20 = vpop.permute.xlu0 %764 }
 0x2dc   : > { %v705_v22 = vsub.f32 %v679_v61, %v701_v21  ;;  %v702_v23 = vsub.f32 %v676_v37, %v701_v21  ;;  %v703_v24 = vsub.f32 %v677_v34, %v701_v21  ;;  %v704_v25 = vsub.f32 %v678_v39, %v701_v21  ;;  %v761_v21 = vpop.permute.xlu2 %760 }
 0x2de   : > { %v706_v26 = vmul.f32 %v702_v23, %v702_v23  ;;  %v707_v27 = vmul.f32 %v703_v24, %v703_v24  ;;  %v708_v28 = vmul.f32 %v704_v25, %v704_v25  ;;  %v709_v29 = vmul.f32 %v705_v22, %v705_v22 }
 0x2e0   : > { %v710_v30 = vsel %vm3229_vm6, %v706_v26, 0.0  ;;  %v711_v31 = vsel %vm3229_vm6, %v707_v27, 0.0  ;;  %v713_v33 = vsel %vm3229_vm6, %v708_v28, 0.0  ;;  %v715_v36 = vsel %vm3229_vm6, %v709_v29, 0.0 }
 0x2e1   : > { %v712_v32 = vadd.f32 %v711_v31, %v710_v30 }
 0x2e3   : > { %v714_v35 = vadd.f32 %v713_v33, %v712_v32 }
 0x2e5   : > { %v716_v38 = vadd.f32 %v715_v36, %v714_v35 }
 0x2e7   : > { %v717_v40 = vrot.slane %v716_v38, 4 }
 0x2e9   : > { %v718_v42 = vadd.f32 %v717_v40, %v716_v38 }
 0x2eb   : > { %v719_v37 = vrot.slane %v718_v42, 2 }
 0x2ed   : > { %v720_v34 = vadd.f32 %v719_v37, %v718_v42 }
 0x2ef   : > { %v721_v39 = vrot.slane %v720_v34, 1 }
 0x2f1   : > { %v722_v53 = vadd.f32 %v721_v39, %v720_v34 }
 0x2f3   : > { %v723_v54 = vmul.f32 %v722_v53, %v2785_v19 }
 0x2f5   : > { %v724_v56 = vadd.f32 1e-05, %v723_v54 }
 0x2f7   : > { %2400 = vrsqrt.f32 %v724_v56  ;;  %vm731_vm9 = vweird.f32 %v724_v56 }
 0x2fd   : > { %v2401_v58 = vpop.eup %2400 }
 0x2fe   : > { %v726_v59 = vmul.f32 %v2401_v58, %v724_v56  ;;  %vm732_vm8 = vweird.f32 %v2401_v58 }
 0x2ff   : > { %vm733_vm10 = vmor %vm731_vm9, %vm732_vm8 }
 0x300   : > { %v727_v61 = vmul.f32 %v2401_v58, %v726_v59 }
 0x302   : > { %v728_v4 = vmul.f32 0.5, %v727_v61 }
 0x304   : > { %v729_v5 = vsub.f32 1.5, %v728_v4 }
 0x306   : > { %v730_v7 = vmul.f32 %v2401_v58, %v729_v5 }
 0x308   : > { %v734_v0 = vsel %vm733_vm10, %v2401_v58, %v730_v7 }
 0x309   : > { %v737_v15 = vmul.f32 %v734_v0, %v704_v25  ;;  %v738_v16 = vmul.f32 %v734_v0, %v705_v22  ;;  %v735_v17 = vmul.f32 %v734_v0, %v702_v23  ;;  %v736_v18 = vmul.f32 %v734_v0, %v703_v24  ;;  %v2216_v0 = vld [vmem:[%s3242_s3 + $0x10] sm:$0xff] }
 0x30b   : > { %v757_v26 = vmul.f32 %v749_v55, %v737_v15  ;;  %v758_v27 = vmul.f32 %v753_v57, %v738_v16  ;;  %v755_v28 = vmul.f32 %v741_v3, %v735_v17  ;;  %v756_v29 = vmul.f32 %v745_v12, %v736_v18  ;;  %v2218_v17 = vld [vmem:[%s3242_s3 + $0x20] sm:$0xff]  ;;  %v2217_v18 = vld [vmem:[%s3242_s3 + $0x18] sm:$0xff] }
 0x30c   : > { %v2514_v15 = vmov 3  }
 0x30d   : > { %v778_v30 = vadd.f32 %v773_v60, %v758_v27  ;;  %v777_v31 = vadd.f32 %v769_v62, %v757_v26  ;;  %v776_v32 = vadd.f32 %v765_v20, %v756_v29  ;;  %v775_v33 = vadd.f32 %v761_v21, %v755_v28  ;;  %2341 = vset.pattern.permute.xlu0 %v2514_v15  ;;  %v2219_v21 = vld [vmem:[%s3242_s3 + $0x28] sm:$0xff]  ;;  %v2214_v29 = vld [vmem:[%s3242_s3] sm:$0xff] }
 0x30e   : > { %2342 = vset.pattern.permute.xlu1 %v2514_v15  ;;  %2343 = vset.pattern.permute.xlu2 %v2514_v15  ;;  %v2515_v20 = vmov 4   ;;  %v2516_v26 = vmov 5  }
 0x30f   : > { %v2321_v35 = vpack.i.bf16 %v778_v30, %v777_v31  ;;  %v853_v36 = vpack.c.bf16 %v778_v30, %v777_v31  ;;  %v2326_v38 = vpack.i.bf16 %v776_v32, %v775_v33  ;;  %v852_v22 = vpack.c.bf16 %v776_v32, %v775_v33 }
 0x311   : > { %2322 = vrot.lane.b32.xlu1 %v2321_v35, %s3227_s18  ;;  %876 = vmatpush.bf16.msrb.mxu1 %v853_v36 }
 0x312   : > { %2327 = vrot.lane.b32.xlu2 %v2326_v38, %s3227_s18 }
 0x315   : > { %877 = vmatpush.bf16.msrb.mxu1 %v852_v22 }
 0x318   : > { %2071 = vmatmul.msk.bf16.vlgmr.msrb.gmra.mxu1 %vm532_vm3, %v2216_v0 }
 0x319   : > { %1260 = vmatpush.bf16.msra.mxu1 %v2693_v41 }
 0x31d   : > { %1261 = vmatpush.bf16.msra.mxu1 %v2735_v52 }
 0x328   : > { %2072 = vmatmul.msk.bf16.gmra.mxu1 %vm532_vm3, %v2217_v18 }
 0x36c   : > { %v2328_v23 = vpop.permute.xlu2 %2327 }
 0x36d   : > { %v2330_v24 = vunpack.i.h.bf16 %v2328_v23  ;;  %v2329_v25 = vunpack.i.l.bf16 %v2328_v23 }
 0x36f   : > { %v781_v40 = vsel %vm487_vm2, %v2329_v25, %v775_v33  ;;  %v784_v42 = vsel %vm487_vm2, %v2330_v24, %v776_v32 }
 0x370   : > { %v2336_v37 = vpack.i.bf16 %v784_v42, %v781_v40 }
 0x372   : > { %2337 = vrot.lane.b32.xlu1 %v2336_v37, %s3227_s18 }
 0x383   : > { %v2323_v34 = vpop.permute.xlu1 %2322 }
 0x384   : > { %v2325_v39 = vunpack.i.h.bf16 %v2323_v34  ;;  %v2324_v53 = vunpack.i.l.bf16 %v2323_v34 }
 0x386   : > { %v787_v54 = vsel %vm487_vm2, %v2324_v53, %v777_v31  ;;  %v790_v55 = vsel %vm487_vm2, %v2325_v39, %v778_v30 }
 0x387   : > { %v2331_v41 = vpack.i.bf16 %v790_v55, %v787_v54 }
 0x389   : > { %2332 = vrot.lane.b32.xlu0 %v2331_v41, %s3227_s18  ;;  %s1872_s18 = scalar_lea.hbm %s3220_s9, %s2595_s17 }
 0x3e4   : > { %v2338_v52 = vpop.permute.xlu1 %2337 }
 0x3e5   : > { %v2340_v56 = vunpack.i.h.bf16 %v2338_v52  ;;  %v2339_v57 = vunpack.i.l.bf16 %v2338_v52 }
 0x3e7   : > { %v799_v58 = vsel %vm487_vm2, %v2339_v57, %v775_v33  ;;  %v800_v59 = vsel %vm487_vm2, %v2340_v56, %v776_v32 }
 0x3e8   : > { %v803_v60 = vpack.c.bf16 %v800_v59, %v799_v58 }
 0x3ea   : > { %903 = vrot.lane.b32.xlu1 %v803_v60, %s3223_s20 }
 0x3f2   : > { %947 = vperm.xlu1 %2342, %v2706_v44  }
 0x3fa   : > { %955 = vperm.xlu1 %2342, %v2727_v48  }
 0x3fb   : > { %v2333_v61 = vpop.permute.xlu0 %2332 }
 0x3fc   : > { %v2335_v62 = vunpack.i.h.bf16 %v2333_v61  ;;  %v2334_v3 = vunpack.i.l.bf16 %v2333_v61 }
 0x3fe   : > { %v801_v4 = vsel %vm487_vm2, %v2334_v3, %v777_v31  ;;  %v802_v5 = vsel %vm487_vm2, %v2335_v62, %v778_v30 }
 0x3ff   : > { %v804_v7 = vpack.c.bf16 %v802_v5, %v801_v4 }
 0x401   : > { %819 = vrot.lane.b32.xlu0 %v804_v7, %s3225_s21  ;;  %905 = vrot.lane.b32.xlu2 %v804_v7, %s3223_s20 }
 0x402   : > { %2346 = vset.pattern.permute.xlu1 %v2516_v26 }
 0x403   : > { %1046 = vperm.xlu1 %2346, %v2711_v45  }
 0x409   : > { %817 = vrot.lane.b32.xlu2 %v803_v60, %s3225_s21  ;;  %943 = vperm.xlu0 %2341, %v2718_v47  }
 0x40b   : > { %2348 = vset.pattern.permute.xlu1 %v2515_v20 }
 0x40c   : > { %1018 = vperm.xlu1 %2348, %v2718_v47  }
 0x411   : > { %951 = vperm.xlu2 %2343, %v2711_v45   ;;  %2345 = vset.pattern.permute.xlu0 %v2515_v20 }
 0x412   : > { %1030 = vperm.xlu0 %2345, %v2727_v48  }
 0x414   : > { %2351 = vset.pattern.permute.xlu1 %v2516_v26 }
 0x415   : > { %1042 = vperm.xlu1 %2351, %v2706_v44  }
 0x419   : > { %2344 = vset.pattern.permute.xlu2 %v2515_v20 }
 0x41a   : > { %1026 = vperm.xlu2 %2344, %v2711_v45   ;;  %2350 = vset.pattern.permute.xlu0 %v2516_v26  ;;  %v879_v45 = vpop.f32.mrf.mxu1 }
 0x41b   : > { %1038 = vperm.xlu0 %2350, %v2718_v47  }
 0x41d   : > { %2353 = vset.pattern.permute.xlu1 %v2509_v46 }
 0x422   : > { %2347 = vset.pattern.permute.xlu2 %v2516_v26  ;;  %v881_v30 = vpop.f32.mrf.mxu1 }
 0x423   : > { %1050 = vperm.xlu2 %2347, %v2727_v48   ;;  %2354 = vset.pattern.permute.xlu0 %v2509_v46 }
 0x42a   : > { %v884_v23 = vpop.f32.mrf.mxu1 }
 0x42b   : > { %2349 = vset.pattern.permute.xlu2 %v2515_v20 }
 0x42c   : > { %1022 = vperm.xlu2 %2349, %v2706_v44  }
 0x432   : > { %v886_v61 = vpop.f32.mrf.mxu1 }
 0x434   : > { %2352 = vset.pattern.permute.xlu2 %v2509_v46 }
 0x45b   : > { %v906_v12 = vpop.permute.xlu2 %905 }
 0x45c   : > { %921 = vmatpush.bf16.msrb.mxu2 %v906_v12  ;;  %v904_v16 = vpop.permute.xlu1 %903 }
 0x460   : > { %922 = vmatpush.bf16.msrb.mxu2 %v904_v16 }
 0x463   : > { %2081 = vmatmul.msk.bf16.vlgmr.msrb.gmra.mxu2 %vm532_vm3, %v2218_v17  ;;  %v818_v28 = vpop.permute.xlu2 %817 }
 0x464   : > { %v948_v37 = vpop.permute.xlu1 %947 }
 0x46b   : > { %v952_v54 = vpop.permute.xlu2 %951 }
 0x46c   : > { %v956_v12 = vpop.permute.xlu1 %955 }
 0x473   : > { %v820_v27 = vpop.permute.xlu0 %819  ;;  %2082 = vmatmul.msk.bf16.gmra.mxu2 %vm532_vm3, %v2219_v21 }
 0x474   : > { %835 = vmatpush.bf16.msrb.mxu0 %v820_v27 }
 0x478   : > { %836 = vmatpush.bf16.msrb.mxu0 %v818_v28 }
 0x47b   : > { %2061 = vmatmul.msk.bf16.vlgmr.msrb.gmra.mxu0 %vm532_vm3, %v2214_v29  ;;  %v944_v53 = vpop.permute.xlu0 %943 }
 0x47c   : > { %1221 = vmatpush.bf16.msra.mxu0 %v2655_v13  ;;  %v2215_v13 = vld [vmem:[%s3242_s3 + $0x8] sm:$0xff] }
 0x480   : > { %1222 = vmatpush.bf16.msra.mxu0 %v2661_v14 }
 0x48b   : > { %2062 = vmatmul.msk.bf16.gmra.mxu0 %vm532_vm3, %v2215_v13 }
 0x4e6   : > { %v924_v14 = vpop.f32.mrf.mxu2 }
 0x4e7   : > { %v934_v36 = vmul.f32 %v2773_v6, %v924_v14 }
 0x4ee   : > { %v926_v48 = vpop.f32.mrf.mxu2 }
 0x4ef   : > { %v935_v22 = vmul.f32 %v2773_v6, %v926_v48 }
 0x4f6   : > { %v929_v35 = vpop.f32.mrf.mxu2 }
 0x4f7   : > { %v936_v25 = vmul.f32 %v2773_v6, %v929_v35 }
 0x4f8   : > { %v838_v47 = vpop.f32.mrf.mxu0 }
 0x4f9   : > { %v848_v44 = vmul.f32 %v2768_v2, %v838_v47 }
 0x4fb   : > { %v889_v38 = vadd.f32 %v879_v45, %v848_v44 }
 0x4fd   : > { %v938_v34 = vadd.f32 %v934_v36, %v889_v38 }
 0x4fe   : > { %v931_v57 = vpop.f32.mrf.mxu2 }
 0x4ff   : > { %v958_v52 = vadd.f32 %v944_v53, %v938_v34  ;;  %v937_v3 = vmul.f32 %v2773_v6, %v931_v57 }
 0x500   : > { %v840_v31 = vpop.f32.mrf.mxu0 }
 0x501   : > { %v849_v32 = vmul.f32 %v2768_v2, %v840_v31  ;;  %v962_v62 = vmax.f32 %v958_v52, 0.0 }
 0x503   : > { %v890_v33 = vadd.f32 %v881_v30, %v849_v32  ;;  %v966_v16 = vsel %vm3229_vm6, %v962_v62, 0.0 }
 0x505   : > { %v939_v40 = vadd.f32 %v935_v22, %v890_v33 }
 0x507   : > { %v959_v55 = vadd.f32 %v948_v37, %v939_v40 }
 0x508   : > { %v843_v24 = vpop.f32.mrf.mxu0 }
 0x509   : > { %v850_v42 = vmul.f32 %v2768_v2, %v843_v24  ;;  %v963_v59 = vmax.f32 %v959_v55, 0.0 }
 0x50b   : > { %v891_v39 = vadd.f32 %v884_v23, %v850_v42  ;;  %v967_v7 = vsel %vm3229_vm6, %v963_v59, 0.0 }
 0x50c   : > { %v968_v21 = vadd.f32 %v967_v7, %v966_v16 }
 0x50d   : > { %v940_v41 = vadd.f32 %v936_v25, %v891_v39 }
 0x50f   : > { %v960_v56 = vadd.f32 %v952_v54, %v940_v41 }
 0x510   : > { %v845_v58 = vpop.f32.mrf.mxu0 }
 0x511   : > { %v851_v60 = vmul.f32 %v2768_v2, %v845_v58  ;;  %v964_v4 = vmax.f32 %v960_v56, 0.0 }
 0x513   : > { %v892_v5 = vadd.f32 %v886_v61, %v851_v60  ;;  %v969_v17 = vsel %vm3229_vm6, %v964_v4, 0.0  ;;  %v1047_v61 = vpop.permute.xlu1 %1046 }
 0x514   : > { %v970_v28 = vadd.f32 %v969_v17, %v968_v21  ;;  %v2224_v21 = vld [vmem:[%s3240_s2 + $0x50] sm:$0xff] }
 0x515   : > { %v941_v0 = vadd.f32 %v937_v3, %v892_v5  ;;  %2141 = vmatmul.msk.bf16.vlgmr.msra.gmra.mxu1 %vm532_vm3, %v2224_v21 }
 0x517   : > { %v961_v18 = vadd.f32 %v956_v12, %v941_v0  ;;  %v1031_v0 = vpop.permute.xlu0 %1030 }
 0x519   : > { %v965_v27 = vmax.f32 %v961_v18, 0.0  ;;  %v2222_v18 = vld [vmem:[%s3240_s2 + $0x40] sm:$0xff] }
 0x51a   : > { %2131 = vmatmul.msk.bf16.vlgmr.msra.gmra.mxu0 %vm532_vm3, %v2222_v18 }
 0x51b   : > { %v971_v29 = vsel %vm3229_vm6, %v965_v27, 0.0  ;;  %v1019_v12 = vpop.permute.xlu1 %1018 }
 0x51c   : > { %v972_v13 = vadd.f32 %v971_v29, %v970_v28 }
 0x51e   : > { %v973_v14 = vrot.slane %v972_v13, 4 }
 0x520   : > { %v974_v45 = vadd.f32 %v973_v14, %v972_v13 }
 0x522   : > { %v975_v47 = vrot.slane %v974_v45, 2 }
 0x524   : > { %v976_v48 = vadd.f32 %v975_v47, %v974_v45 }
 0x526   : > { %v977_v30 = vrot.slane %v976_v48, 1 }
 0x528   : > { %v978_v31 = vadd.f32 %v977_v30, %v976_v48 }
 0x52a   : > { %v979_v32 = vmul.f32 %v978_v31, %v2785_v19 }
 0x52c   : > { %v983_v44 = vsub.f32 %v965_v27, %v979_v32  ;;  %v980_v33 = vsub.f32 %v962_v62, %v979_v32  ;;  %v981_v35 = vsub.f32 %v963_v59, %v979_v32  ;;  %v982_v36 = vsub.f32 %v964_v4, %v979_v32  ;;  %v1027_v59 = vpop.permute.xlu2 %1026  ;;  %v1039_v32 = vpop.permute.xlu0 %1038 }
 0x52e   : > { %v984_v38 = vmul.f32 %v980_v33, %v980_v33  ;;  %v985_v22 = vmul.f32 %v981_v35, %v981_v35  ;;  %v986_v23 = vmul.f32 %v982_v36, %v982_v36  ;;  %v987_v24 = vmul.f32 %v983_v44, %v983_v44 }
 0x530   : > { %v988_v25 = vsel %vm3229_vm6, %v984_v38, 0.0  ;;  %v989_v40 = vsel %vm3229_vm6, %v985_v22, 0.0  ;;  %v991_v37 = vsel %vm3229_vm6, %v986_v23, 0.0  ;;  %v993_v39 = vsel %vm3229_vm6, %v987_v24, 0.0  ;;  %v1043_v38 = vpop.permute.xlu1 %1042 }
 0x531   : > { %v990_v42 = vadd.f32 %v989_v40, %v988_v25 }
 0x533   : > { %v992_v34 = vadd.f32 %v991_v37, %v990_v42  ;;  %v2903_v42 = vld [vmem:[%s3241_s4 + $0x28] sm:$0xff]  ;;  %v2908_v37 = vld [vmem:[%s3241_s4 + $0x38] sm:$0xff] }
 0x534   : > { %v1051_v4 = vpop.permute.xlu2 %1050  ;;  %1288 = vperm.xlu1 %2353, %v2903_v42   ;;  %1298 = vperm.xlu0 %2354, %v2908_v37  }
 0x535   : > { %v994_v53 = vadd.f32 %v993_v39, %v992_v34  ;;  %v2924_v34 = vld [vmem:[%s3241_s4 + $0x30] sm:$0xff]  ;;  %v2221_v39 = vld [vmem:[%s3240_s2 + $0x38] sm:$0xff] }
 0x537   : > { %v995_v54 = vrot.slane %v994_v53, 4 }
 0x539   : > { %v996_v55 = vadd.f32 %v995_v54, %v994_v53 }
 0x53b   : > { %v997_v41 = vrot.slane %v996_v55, 2 }
 0x53c   : > { %v1023_v28 = vpop.permute.xlu2 %1022  ;;  %2355 = vset.pattern.permute.xlu1 %v2510_v49  ;;  %2359 = vset.pattern.permute.xlu0 %v2510_v49 }
 0x53d   : > { %v998_v52 = vadd.f32 %v997_v41, %v996_v55  ;;  %1369 = vperm.xlu1 %2355, %v2924_v34  }
 0x53f   : > { %v999_v56 = vrot.slane %v998_v52, 1 }
 0x541   : > { %v1000_v57 = vadd.f32 %v999_v56, %v998_v52 }
 0x543   : > { %v1001_v58 = vmul.f32 %v1000_v57, %v2785_v19 }
 0x545   : > { %v1002_v60 = vadd.f32 1e-05, %v1001_v58  ;;  %2357 = vset.pattern.permute.xlu1 %v2511_v50 }
 0x546   : > { %1389 = vperm.xlu1 %2357, %v2924_v34  }
 0x547   : > { %2402 = vrsqrt.f32 %v1002_v60  ;;  %vm1009_vm12 = vweird.f32 %v1002_v60 }
 0x54d   : > { %v2403_v62 = vpop.eup %2402 }
 0x54e   : > { %v1004_v3 = vmul.f32 %v2403_v62, %v1002_v60  ;;  %vm1010_vm11 = vweird.f32 %v2403_v62  ;;  %2360 = vset.pattern.permute.xlu1 %v2510_v49 }
 0x54f   : > { %vm1011_vm13 = vmor %vm1009_vm12, %vm1010_vm11  ;;  %1365 = vperm.xlu1 %2360, %v2903_v42   ;;  %vm1116_vm12 = vcmask 129024  }
 0x550   : > { %v1005_v5 = vmul.f32 %v2403_v62, %v1004_v3 }
 0x552   : > { %v1006_v7 = vmul.f32 0.5, %v1005_v5 }
 0x554   : > { %v1007_v16 = vsub.f32 1.5, %v1006_v7 }
 0x556   : > { %v1008_v17 = vmul.f32 %v2403_v62, %v1007_v16 }
 0x557   : > { %2361 = vset.pattern.permute.xlu1 %v2511_v50 }
 0x558   : > { %v1012_v27 = vsel %vm1011_vm13, %v2403_v62, %v1008_v17  ;;  %1385 = vperm.xlu1 %2361, %v2903_v42  }
 0x559   : > { %v1015_v29 = vmul.f32 %v1012_v27, %v982_v36  ;;  %v1016_v13 = vmul.f32 %v1012_v27, %v983_v44  ;;  %v1013_v14 = vmul.f32 %v1012_v27, %v980_v33  ;;  %v1014_v45 = vmul.f32 %v1012_v27, %v981_v35  ;;  %v486_v44 = vld [vmem:[%s3216_s5] sm:$0x1]  ;;  %v2223_v33 = vld [vmem:[%s3240_s2 + $0x48] sm:$0xff]  ;;  %v2225_v35 = vld [vmem:[%s3240_s2 + $0x58] sm:$0xff] }
 0x55a   : > { %2132 = vmatmul.msk.bf16.gmra.mxu0 %vm532_vm3, %v2223_v33  ;;  %2142 = vmatmul.msk.bf16.gmra.mxu1 %vm532_vm3, %v2225_v35 }
 0x55b   : > { %v1035_v47 = vmul.f32 %v1027_v59, %v1015_v29  ;;  %v1036_v48 = vmul.f32 %v1031_v0, %v1016_v13  ;;  %v1033_v30 = vmul.f32 %v1019_v12, %v1013_v14  ;;  %v1034_v31 = vmul.f32 %v1023_v28, %v1014_v45 }
 0x55d   : > { %v1055_v22 = vadd.f32 %v1047_v61, %v1035_v47  ;;  %v1056_v23 = vadd.f32 %v1051_v4, %v1036_v48  ;;  %v1053_v24 = vadd.f32 %v1039_v32, %v1033_v30  ;;  %v1054_v25 = vadd.f32 %v1043_v38, %v1034_v31 }
 0x55f   : > { %v1058_v40 = vpack.c.bf16 %v1056_v23, %v1055_v22  ;;  %v1057_v36 = vpack.c.bf16 %v1054_v25, %v1053_v24 }
 0x560   : > { %2382 = vset.pattern.permute.xlu1 %v2514_v15 }
 0x561   : > { %1072 = vmatpush.bf16.msrb.mxu3 %v1058_v40 }
 0x565   : > { %1073 = vmatpush.bf16.msrb.mxu3 %v1057_v36 }
 0x568   : > { %2083 = vmatmul.msk.bf16.vlgmr.msrb.gmra.mxu3 %vm532_vm3, %v486_v44 }
 0x569   : > { %1182 = vmatpush.bf16.msra.mxu3 %v2700_v43  ;;  %v2913_v43 = vld [vmem:[%s3241_s4 + $0x20] sm:$0xff] }
 0x56a   : > { %1283 = vperm.xlu2 %2352, %v2913_v43   ;;  %1361 = vperm.xlu0 %2359, %v2913_v43  }
 0x56d   : > { %1183 = vmatpush.bf16.msra.mxu3 %v2733_v51  ;;  %v2220_v51 = vld [vmem:[%s3240_s2 + $0x30] sm:$0xff]  ;;  %s2429_s2 = scalar_lea.hbm %s3220_s9, 2 }
 0x572   : > { %1293 = vperm.xlu2 %2352, %v2924_v34   ;;  %2384 = vset.pattern.permute.xlu0 %v2514_v15 }
 0x578   : > { %2121 = vmatmul.msk.bf16.vlgmr.msra.gmra.mxu3 %vm532_vm3, %v2220_v51 }
 0x57a   : > { %2356 = vset.pattern.permute.xlu2 %v2510_v49 }
 0x57b   : > { %1373 = vperm.xlu2 %2356, %v2908_v37  }
 0x583   : > { %2358 = vset.pattern.permute.xlu2 %v2511_v50 }
 0x584   : > { %1393 = vperm.xlu2 %2358, %v2908_v37  }
 0x588   : > { %2122 = vmatmul.msk.bf16.gmra.mxu3 %vm532_vm3, %v2221_v39 }
 0x58c   : > { %1381 = vperm.xlu2 %2358, %v2913_v43  }
 0x592   : > { %v1263_v54 = vpop.f32.mrf.mxu1 }
 0x593   : > { %v1273_v62 = vmul.f32 %v2773_v6, %v1263_v54 }
 0x594   : > { %2383 = vset.pattern.permute.xlu2 %v2514_v15 }
 0x597   : > { %v1224_v55 = vpop.f32.mrf.mxu0 }
 0x59a   : > { %v1265_v52 = vpop.f32.mrf.mxu1 }
 0x59b   : > { %v1274_v15 = vmul.f32 %v2773_v6, %v1265_v52 }
 0x59f   : > { %v1226_v56 = vpop.f32.mrf.mxu0 }
 0x5a6   : > { %v1289_v16 = vpop.permute.xlu1 %1288  ;;  %v1299_v23 = vpop.permute.xlu0 %1298 }
 0x5c4   : > { %v1284_v60 = vpop.permute.xlu2 %1283 }
 0x5cc   : > { %v1294_v28 = vpop.permute.xlu2 %1293 }
 0x5d7   : > { %v1268_v61 = vpop.f32.mrf.mxu1  ;;  %v1229_v4 = vpop.f32.mrf.mxu0 }
 0x5d8   : > { %v1275_v7 = vmul.f32 %v2773_v6, %v1268_v61 }
 0x5df   : > { %v1270_v14 = vpop.f32.mrf.mxu1  ;;  %v1231_v30 = vpop.f32.mrf.mxu0 }
 0x5e0   : > { %v1276_v32 = vmul.f32 %v2773_v6, %v1270_v14 }
 0x5eb   : > { %v2953_v49 = vpop.f32.mrf.mxu3 }
 0x5f3   : > { %v1077_v53 = vpop.f32.mrf.mxu3 }
 0x5fb   : > { %v1185_v41 = vpop.f32.mrf.mxu3 }
 0x5fc   : > { %v1195_v50 = vmul.f32 %v2768_v2, %v1185_v41 }
 0x5fe   : > { %v1234_v3 = vadd.f32 %v1224_v55, %v1195_v50 }
 0x600   : > { %v1277_v17 = vadd.f32 %v1273_v62, %v1234_v3 }
 0x602   : > { %v1301_v29 = vadd.f32 %v1284_v60, %v1277_v17 }
 0x603   : > { %v1187_v57 = vpop.f32.mrf.mxu3 }
 0x604   : > { %v1196_v58 = vmul.f32 %v2768_v2, %v1187_v57  ;;  %v1305_v31 = vmax.f32 %v1301_v29, 0.0  ;;  %v1370_v29 = vpop.permute.xlu1 %1369 }
 0x606   : > { %v1235_v59 = vadd.f32 %v1226_v56, %v1196_v58  ;;  %v1309_v40 = vsel %vm3229_vm6, %v1305_v31, 0.0 }
 0x608   : > { %v1278_v0 = vadd.f32 %v1274_v15, %v1235_v59 }
 0x60a   : > { %v1302_v21 = vadd.f32 %v1289_v16, %v1278_v0 }
 0x60b   : > { %v1190_v5 = vpop.f32.mrf.mxu3 }
 0x60c   : > { %v1197_v12 = vmul.f32 %v2768_v2, %v1190_v5  ;;  %v1306_v47 = vmax.f32 %v1302_v21, 0.0 }
 0x60e   : > { %v1236_v18 = vadd.f32 %v1229_v4, %v1197_v12  ;;  %v1310_v24 = vsel %vm3229_vm6, %v1306_v47, 0.0 }
 0x60f   : > { %v1311_v33 = vadd.f32 %v1310_v24, %v1309_v40 }
 0x610   : > { %v1279_v27 = vadd.f32 %v1275_v7, %v1236_v18 }
 0x612   : > { %v1303_v13 = vadd.f32 %v1294_v28, %v1279_v27 }
 0x613   : > { %v1192_v45 = vpop.f32.mrf.mxu3 }
 0x614   : > { %v1198_v48 = vmul.f32 %v2768_v2, %v1192_v45  ;;  %v1307_v38 = vmax.f32 %v1303_v13, 0.0 }
 0x616   : > { %v1237_v22 = vadd.f32 %v1231_v30, %v1198_v48  ;;  %v1312_v36 = vsel %vm3229_vm6, %v1307_v38, 0.0  ;;  %v1390_v30 = vpop.permute.xlu1 %1389 }
 0x617   : > { %v1313_v51 = vadd.f32 %v1312_v36, %v1311_v33  ;;  %v1362_v33 = vpop.permute.xlu0 %1361 }
 0x618   : > { %v1280_v25 = vadd.f32 %v1276_v32, %v1237_v22 }
 0x61a   : > { %v1304_v44 = vadd.f32 %v1299_v23, %v1280_v25 }
 0x61c   : > { %v1308_v35 = vmax.f32 %v1304_v44, 0.0 }
 0x61e   : > { %v1314_v39 = vsel %vm3229_vm6, %v1308_v35, 0.0  ;;  %v1366_v23 = vpop.permute.xlu1 %1365 }
 0x61f   : > { %v1315_v53 = vadd.f32 %v1314_v39, %v1313_v51 }
 0x621   : > { %v1316_v54 = vrot.slane %v1315_v53, 4 }
 0x623   : > { %v1317_v55 = vadd.f32 %v1316_v54, %v1315_v53 }
 0x625   : > { %v1318_v41 = vrot.slane %v1317_v55, 2 }
 0x626   : > { %v1386_v54 = vpop.permute.xlu1 %1385 }
 0x627   : > { %v1319_v52 = vadd.f32 %v1318_v41, %v1317_v55 }
 0x629   : > { %v1320_v56 = vrot.slane %v1319_v52, 1 }
 0x62b   : > { %v1321_v57 = vadd.f32 %v1320_v56, %v1319_v52 }
 0x62d   : > { %v1322_v58 = vmul.f32 %v1321_v57, %v2785_v19 }
 0x62f   : > { %v1326_v50 = vsub.f32 %v1308_v35, %v1322_v58  ;;  %v1323_v59 = vsub.f32 %v1305_v31, %v1322_v58  ;;  %v1324_v60 = vsub.f32 %v1306_v47, %v1322_v58  ;;  %v1325_v61 = vsub.f32 %v1307_v38, %v1322_v58  ;;  %v1374_v31 = vpop.permute.xlu2 %1373 }
 0x631   : > { %v1327_v62 = vmul.f32 %v1323_v59, %v1323_v59  ;;  %v1328_v3 = vmul.f32 %v1324_v60, %v1324_v60  ;;  %v1329_v15 = vmul.f32 %v1325_v61, %v1325_v61  ;;  %v1330_v4 = vmul.f32 %v1326_v50, %v1326_v50 }
 0x633   : > { %v1331_v5 = vsel %vm3229_vm6, %v1327_v62, 0.0  ;;  %v1332_v7 = vsel %vm3229_vm6, %v1328_v3, 0.0  ;;  %v1334_v12 = vsel %vm3229_vm6, %v1329_v15, 0.0  ;;  %v1336_v17 = vsel %vm3229_vm6, %v1330_v4, 0.0 }
 0x634   : > { %v1333_v0 = vadd.f32 %v1332_v7, %v1331_v5 }
 0x636   : > { %v1335_v16 = vadd.f32 %v1334_v12, %v1333_v0 }
 0x637   : > { %v1394_v25 = vpop.permute.xlu2 %1393 }
 0x638   : > { %v1337_v18 = vadd.f32 %v1336_v17, %v1335_v16 }
 0x63a   : > { %v1338_v21 = vrot.slane %v1337_v18, 4 }
 0x63c   : > { %v1339_v27 = vadd.f32 %v1338_v21, %v1337_v18 }
 0x63e   : > { %v1340_v28 = vrot.slane %v1339_v27, 2 }
 0x63f   : > { %v1382_v57 = vpop.permute.xlu2 %1381 }
 0x640   : > { %v1341_v13 = vadd.f32 %v1340_v28, %v1339_v27 }
 0x642   : > { %v1342_v14 = vrot.slane %v1341_v13, 1 }
 0x644   : > { %v1343_v45 = vadd.f32 %v1342_v14, %v1341_v13 }
 0x646   : > { %v1344_v47 = vmul.f32 %v1343_v45, %v2785_v19 }
 0x648   : > { %v1345_v48 = vadd.f32 1e-05, %v1344_v47 }
 0x64a   : > { %2404 = vrsqrt.f32 %v1345_v48  ;;  %vm1352_vm15 = vweird.f32 %v1345_v48 }
 0x650   : > { %v2405_v32 = vpop.eup %2404 }
 0x651   : > { %v1347_v38 = vmul.f32 %v2405_v32, %v1345_v48  ;;  %vm1353_vm14 = vweird.f32 %v2405_v32 }
 0x652   : > { %vm1354_vm0 = vmor %vm1352_vm15, %vm1353_vm14 }
 0x653   : > { %v1348_v22 = vmul.f32 %v2405_v32, %v1347_v38 }
 0x655   : > { %v1349_v24 = vmul.f32 0.5, %v1348_v22 }
 0x657   : > { %v1350_v40 = vsub.f32 1.5, %v1349_v24 }
 0x659   : > { %v1351_v36 = vmul.f32 %v2405_v32, %v1350_v40  ;;  %v1082_v40 = vld [vmem:[%s3217_s6 + $0x10] sm:$0xff] }
 0x65b   : > { %v1355_v44 = vsel %vm1354_vm0, %v2405_v32, %v1351_v36  ;;  %v1083_v36 = vld [vmem:[%s3217_s6 + $0x18] sm:$0x7f] }
 0x65c   : > { %v1358_v35 = vmul.f32 %v1355_v44, %v1325_v61  ;;  %v1359_v51 = vmul.f32 %v1355_v44, %v1326_v50  ;;  %v1357_v39 = vmul.f32 %v1355_v44, %v1324_v60  ;;  %v1356_v53 = vmul.f32 %v1355_v44, %v1323_v59  ;;  %v2228_v44 = vld [vmem:[%s3242_s3 + $0x40] sm:$0xff] }
 0x65e   : > { %v1378_v55 = vmul.f32 %v1370_v29, %v1358_v35  ;;  %v1379_v41 = vmul.f32 %v1374_v31, %v1359_v51  ;;  %v1377_v52 = vmul.f32 %v1366_v23, %v1357_v39  ;;  %v1376_v56 = vmul.f32 %v1362_v33, %v1356_v53  ;;  %v2229_v35 = vld [vmem:[%s3242_s3 + $0x48] sm:$0xff]  ;;  %v2226_v53 = vld [vmem:[%s3242_s3 + $0x30] sm:$0xff] }
 0x660   : > { %v1398_v58 = vadd.f32 %v1390_v30, %v1378_v55  ;;  %v1399_v62 = vadd.f32 %v1394_v25, %v1379_v41  ;;  %v1396_v3 = vadd.f32 %v1382_v57, %v1376_v56  ;;  %v1397_v15 = vadd.f32 %v1386_v54, %v1377_v52  ;;  %v2230_v55 = vld [vmem:[%s3242_s3 + $0x50] sm:$0xff]  ;;  %v2227_v56 = vld [vmem:[%s3242_s3 + $0x38] sm:$0xff] }
 0x661   : > { %v2517_v25 = vmov 6   ;;  %v2231_v57 = vld [vmem:[%s3242_s3 + $0x58] sm:$0xff] }
 0x662   : > { %v2362_v4 = vpack.i.bf16 %v1399_v62, %v1398_v58  ;;  %v1474_v5 = vpack.c.bf16 %v1399_v62, %v1398_v58  ;;  %v2367_v7 = vpack.i.bf16 %v1397_v15, %v1396_v3  ;;  %v1473_v50 = vpack.c.bf16 %v1397_v15, %v1396_v3 }
 0x664   : > { %2363 = vrot.lane.b32.xlu2 %v2362_v4, %s3243_s29  ;;  %1497 = vmatpush.bf16.msrb.mxu3 %v1474_v5 }
 0x665   : > { %2368 = vrot.lane.b32.xlu0 %v2367_v7, %s3243_s29 }
 0x668   : > { %1498 = vmatpush.bf16.msrb.mxu3 %v1473_v50 }
 0x66b   : > { %2161 = vmatmul.msk.bf16.vlgmr.msrb.gmra.mxu3 %vm532_vm3, %v2228_v44 }
 0x67b   : > { %2162 = vmatmul.msk.bf16.gmra.mxu3 %vm532_vm3, %v2229_v35 }
 0x6be   : > { %v2364_v59 = vpop.permute.xlu2 %2363 }
 0x6bf   : > { %v2366_v60 = vunpack.i.h.bf16 %v2364_v59  ;;  %v2365_v61 = vunpack.i.l.bf16 %v2364_v59 }
 0x6c1   : > { %v1408_v0 = vsel %vm487_vm2, %v2365_v61, %v1398_v58  ;;  %v1411_v12 = vsel %vm487_vm2, %v2366_v60, %v1399_v62 }
 0x6c2   : > { %v2372_v16 = vpack.i.bf16 %v1411_v12, %v1408_v0 }
 0x6c4   : > { %2373 = vrot.lane.b32.xlu1 %v2372_v16, %s3243_s29 }
 0x6d7   : > { %v2369_v17 = vpop.permute.xlu0 %2368 }
 0x6d8   : > { %v2371_v18 = vunpack.i.h.bf16 %v2369_v17  ;;  %v2370_v21 = vunpack.i.l.bf16 %v2369_v17 }
 0x6da   : > { %v1402_v27 = vsel %vm487_vm2, %v2370_v21, %v1396_v3  ;;  %v1405_v28 = vsel %vm487_vm2, %v2371_v18, %v1397_v15 }
 0x6db   : > { %v2377_v29 = vpack.i.bf16 %v1405_v28, %v1402_v27 }
 0x6dd   : > { %2378 = vrot.lane.b32.xlu2 %v2377_v29, %s3243_s29 }
 0x6ee   : > { %v1500_v59 = vpop.f32.mrf.mxu3 }
 0x6f6   : > { %v1502_v0 = vpop.f32.mrf.mxu3 }
 0x6fe   : > { %v1505_v29 = vpop.f32.mrf.mxu3 }
 0x736   : > { %v2374_v13 = vpop.permute.xlu1 %2373 }
 0x737   : > { %v2376_v14 = vunpack.i.h.bf16 %v2374_v13  ;;  %v2375_v45 = vunpack.i.l.bf16 %v2374_v13  ;;  %v2379_v47 = vpop.permute.xlu2 %2378 }
 0x738   : > { %v2381_v48 = vunpack.i.h.bf16 %v2379_v47  ;;  %v2380_v30 = vunpack.i.l.bf16 %v2379_v47 }
 0x739   : > { %v1422_v31 = vsel %vm487_vm2, %v2375_v45, %v1398_v58  ;;  %v1423_v32 = vsel %vm487_vm2, %v2376_v14, %v1399_v62 }
 0x73a   : > { %v1425_v38 = vpack.c.bf16 %v1423_v32, %v1422_v31  ;;  %v1420_v22 = vsel %vm487_vm2, %v2380_v30, %v1396_v3  ;;  %v1421_v23 = vsel %vm487_vm2, %v2381_v48, %v1397_v15  ;;  %v398_v15 = vld [vmem:[%s2633_s28] sm:$0x1]  ;;  %vm1848_vm2 = vcmask 122880  }
 0x73b   : > { %v1424_v24 = vpack.c.bf16 %v1421_v23, %v1420_v22  ;;  %vm447_vm1 = vcmp.lt.s32.totalorder %v398_v15, 8 }
 0x73c   : > { %1440 = vrot.lane.b32.xlu0 %v1425_v38, %s3244_s12  ;;  %1526 = vrot.lane.b32.xlu2 %v1425_v38, %s3245_s26  ;;  %v3071_v4 = vsel %vm447_vm1, 1.0, %v2512_v63 }
 0x73d   : > { %1438 = vrot.lane.b32.xlu1 %v1424_v24, %s3244_s12  ;;  %s3068_s12 = sand.u32 1, %s2495_s14  }
 0x73e   : > { %s3230_s0 = scalar_lea.vmem [#allocation4], %s3068_s12  ;;  %s1857_s21 = scalar_lea.sflag [#allocation3], %s3068_s12 }
 0x744   : > { %1524 = vrot.lane.b32.xlu0 %v1424_v24, %s3245_s26  ;;  %1568 = vperm.xlu2 %2383, %v2903_v42   ;;  %s373_s26 = scalar_lea.vmem [#allocation2], %s3068_s12 }
 0x745   : > { %1564 = vperm.xlu1 %2382, %v2913_v43   ;;  %s1874_s20 = sshll.u32 %s373_s26, 4  ;;  %s1875_s20 = int_to_ptr.vmem [resolvable:$true] %s1874_s20 }
 0x74c   : > { %2385 = vset.pattern.permute.xlu2 %v2515_v20  ;;  %1572 = vperm.xlu0 %2384, %v2924_v34  }
 0x74d   : > { %1576 = vperm.xlu1 %2382, %v2908_v37   ;;  %1647 = vperm.xlu2 %2385, %v2924_v34  }
 0x754   : > { %2388 = vset.pattern.permute.xlu0 %v2516_v26 }
 0x755   : > { %2386 = vset.pattern.permute.xlu1 %v2515_v20  ;;  %2387 = vset.pattern.permute.xlu2 %v2516_v26 }
 0x756   : > { %1651 = vperm.xlu1 %2386, %v2908_v37   ;;  %1667 = vperm.xlu2 %2387, %v2924_v34   ;;  %v1081_v34 = vld [vmem:[%s3217_s6 + $0x8] sm:$0xff] }
 0x757   : > { %1671 = vperm.xlu0 %2388, %v2908_v37   ;;  %v2408_v37 = vld [vmem:[%s3241_s4] sm:$0xff] }
 0x75e   : > { %1639 = vperm.xlu1 %2386, %v2913_v43   ;;  %2389 = vset.pattern.permute.xlu2 %v2515_v20  ;;  %v2174_v20 = vld [vmem:[%s3217_s6 + $0x20] sm:$0xff] }
 0x75f   : > { %1643 = vperm.xlu2 %2389, %v2903_v42   ;;  %2392 = vset.pattern.permute.xlu0 %v2517_v25 }
 0x760   : > { %1681 = vperm.xlu0 %2392, %v2913_v43  }
 0x766   : > { %2390 = vset.pattern.permute.xlu1 %v2516_v26 }
 0x767   : > { %1659 = vperm.xlu1 %2390, %v2913_v43   ;;  %2391 = vset.pattern.permute.xlu2 %v2516_v26  ;;  %v2175_v26 = vld [vmem:[%s3217_s6 + $0x28] sm:$0xff]  ;;  %v1080_v43 = vld [vmem:[%s3217_s6] sm:$0xff] }
 0x768   : > { %1663 = vperm.xlu2 %2391, %v2903_v42   ;;  %2396 = vset.pattern.permute.xlu0 %v2509_v46  ;;  %v2176_v42 = vld [vmem:[%s3217_s6 + $0x30] sm:$0xff] }
 0x76f   : > { %2393 = vset.pattern.permute.xlu1 %v2517_v25 }
 0x770   : > { %1060 = vperm.xlu1 %2393, %v2408_v37   ;;  %2394 = vset.pattern.permute.xlu2 %v2509_v46 }
 0x771   : > { %1709 = vperm.xlu2 %2394, %v2174_v20  }
 0x778   : > { %2395 = vset.pattern.permute.xlu1 %v2509_v46 }
 0x779   : > { %1714 = vperm.xlu1 %2395, %v2175_v26   ;;  %1719 = vperm.xlu2 %2394, %v2176_v42   ;;  %v1507_v42 = vpop.f32.mrf.mxu3 }
 0x781   : > { %1087 = vperm.xlu1 %2395, %v1080_v43   ;;  %1092 = vperm.xlu2 %2394, %v1081_v34  }
 0x789   : > { %1097 = vperm.xlu1 %2395, %v1082_v40   ;;  %1102 = vperm.xlu2 %2394, %v1083_v36  }
 0x796   : > { %v1527_v33 = vpop.permute.xlu2 %1526 }
 0x797   : > { %1542 = vmatpush.bf16.msrb.mxu0 %v1527_v33 }
 0x79e   : > { %v1569_v31 = vpop.permute.xlu2 %1568 }
 0x7ae   : > { %v1441_v51 = vpop.permute.xlu0 %1440 }
 0x7af   : > { %v1439_v39 = vpop.permute.xlu1 %1438  ;;  %1456 = vmatpush.bf16.msra.mxu2 %v1441_v51 }
 0x7b3   : > { %1457 = vmatpush.bf16.msra.mxu2 %v1439_v39 }
 0x7b6   : > { %v1525_v54 = vpop.permute.xlu0 %1524  ;;  %2151 = vmatmul.msk.bf16.vlgmr.msra.gmra.mxu2 %vm532_vm3, %v2226_v53 }
 0x7b7   : > { %1543 = vmatpush.bf16.msrb.mxu0 %v1525_v54  ;;  %v1565_v41 = vpop.permute.xlu1 %1564 }
 0x7ba   : > { %2171 = vmatmul.msk.bf16.vlgmr.msrb.gmra.mxu0 %vm532_vm3, %v2230_v55 }
 0x7be   : > { %v1573_v32 = vpop.permute.xlu0 %1572 }
 0x7bf   : > { %v1577_v52 = vpop.permute.xlu1 %1576 }
 0x7c6   : > { %2152 = vmatmul.msk.bf16.gmra.mxu2 %vm532_vm3, %v2227_v56 }
 0x7c8   : > { %v3059_v58 = vpop.permute.xlu1 %1651 }
 0x7ca   : > { %2172 = vmatmul.msk.bf16.gmra.mxu0 %vm532_vm3, %v2231_v57 }
 0x7d0   : > { %v3062_v62 = vpop.permute.xlu1 %1639 }
 0x7d9   : > { %v3064_v3 = vpop.permute.xlu1 %1659 }
 0x7e2   : > { %v1061_v5 = vpop.permute.xlu1 %1060 }
 0x7e3   : > { %v1076_v7 = vadd.f32 %v2953_v49, %v1061_v5 }
 0x7e5   : > { %v3075_v50 = vmul.f32 %v3071_v4, %v1076_v7 }
 0x7e7   : > { %1849 = vst.msk [vmem:[%s373_s26] sm:$0x1] %vm1848_vm2, %v3075_v50 }
 0x837   : > { %v1545_v60 = vpop.f32.mrf.mxu0 }
 0x838   : > { %v1555_v21 = vmul.f32 %v2773_v6, %v1545_v60 }
 0x839   : > { %v1459_v61 = vpop.f32.mrf.mxu2 }
 0x83a   : > { %v1469_v17 = vmul.f32 %v2768_v2, %v1459_v61 }
 0x83c   : > { %v1510_v27 = vadd.f32 %v1500_v59, %v1469_v17 }
 0x83e   : > { %v1559_v48 = vadd.f32 %v1555_v21, %v1510_v27 }
 0x83f   : > { %v1547_v12 = vpop.f32.mrf.mxu0 }
 0x840   : > { %v1556_v28 = vmul.f32 %v2773_v6, %v1547_v12  ;;  %v1579_v23 = vadd.f32 %v1565_v41, %v1559_v48 }
 0x841   : > { %v1461_v16 = vpop.f32.mrf.mxu2 }
 0x842   : > { %v1470_v63 = vmul.f32 %v2768_v2, %v1461_v16  ;;  %v1583_v43 = vmax.f32 %v1579_v23, 0.0  ;;  %v2177_v23 = vld [vmem:[%s3217_s6 + $0x38] sm:$0x7f] }
 0x843   : > { %1724 = vperm.xlu0 %2396, %v2177_v23  }
 0x844   : > { %v1511_v49 = vadd.f32 %v1502_v0, %v1470_v63  ;;  %v1587_v35 = vsel %vm3229_vm6, %v1583_v43, 0.0 }
 0x846   : > { %v1560_v14 = vadd.f32 %v1556_v28, %v1511_v49 }
 0x847   : > { %v1550_v18 = vpop.f32.mrf.mxu0 }
 0x848   : > { %v1557_v45 = vmul.f32 %v2773_v6, %v1550_v18  ;;  %v1580_v38 = vadd.f32 %v1569_v31, %v1560_v14  ;;  %v1648_v31 = vpop.permute.xlu2 %1647 }
 0x849   : > { %v1464_v13 = vpop.f32.mrf.mxu2 }
 0x84a   : > { %v1471_v47 = vmul.f32 %v2768_v2, %v1464_v13  ;;  %v1584_v37 = vmax.f32 %v1580_v38, 0.0 }
 0x84c   : > { %v1512_v30 = vadd.f32 %v1505_v29, %v1471_v47  ;;  %v1588_v44 = vsel %vm3229_vm6, %v1584_v37, 0.0 }
 0x84d   : > { %v1589_v53 = vadd.f32 %v1588_v44, %v1587_v35  ;;  %v1672_v35 = vpop.permute.xlu0 %1671 }
 0x84e   : > { %v1561_v22 = vadd.f32 %v1557_v45, %v1512_v30 }
 0x84f   : > { %v1552_v25 = vpop.f32.mrf.mxu0 }
 0x850   : > { %v1581_v24 = vadd.f32 %v1573_v32, %v1561_v22  ;;  %v1558_v34 = vmul.f32 %v2773_v6, %v1552_v25 }
 0x851   : > { %v1466_v20 = vpop.f32.mrf.mxu2 }
 0x852   : > { %v1472_v26 = vmul.f32 %v2768_v2, %v1466_v20  ;;  %v1585_v40 = vmax.f32 %v1581_v24, 0.0  ;;  %v1668_v24 = vpop.permute.xlu2 %1667 }
 0x854   : > { %v1513_v36 = vadd.f32 %v1507_v42, %v1472_v26  ;;  %v1590_v51 = vsel %vm3229_vm6, %v1585_v40, 0.0 }
 0x855   : > { %v1591_v55 = vadd.f32 %v1590_v51, %v1589_v53 }
 0x856   : > { %v1562_v33 = vadd.f32 %v1558_v34, %v1513_v36 }
 0x858   : > { %v1582_v39 = vadd.f32 %v1577_v52, %v1562_v33 }
 0x85a   : > { %v1586_v54 = vmax.f32 %v1582_v39, 0.0  ;;  %v1644_v42 = vpop.permute.xlu2 %1643 }
 0x85c   : > { %v1592_v41 = vsel %vm3229_vm6, %v1586_v54, 0.0 }
 0x85d   : > { %v1593_v2 = vadd.f32 %v1592_v41, %v1591_v55 }
 0x85f   : > { %v1594_v56 = vrot.slane %v1593_v2, 4 }
 0x861   : > { %v1595_v57 = vadd.f32 %v1594_v56, %v1593_v2 }
 0x862   : > { %v1664_v2 = vpop.permute.xlu2 %1663 }
 0x863   : > { %v1596_v15 = vrot.slane %v1595_v57, 2 }
 0x865   : > { %v1597_v6 = vadd.f32 %v1596_v15, %v1595_v57 }
 0x867   : > { %v1598_v5 = vrot.slane %v1597_v6, 1 }
 0x869   : > { %v1599_v7 = vadd.f32 %v1598_v5, %v1597_v6  ;;  %v2112_v5 = vld [vmem:[%s3216_s5 + $0x1] sm:$0x1] }
 0x86b   : > { %v1600_v59 = vmul.f32 %v1599_v7, %v2785_v19  ;;  %v1715_v7 = vpop.permute.xlu1 %1714 }
 0x86d   : > { %v1601_v60 = vsub.f32 %v1583_v43, %v1600_v59  ;;  %v1602_v61 = vsub.f32 %v1584_v37, %v1600_v59  ;;  %v1603_v0 = vsub.f32 %v1585_v40, %v1600_v59  ;;  %v1604_v12 = vsub.f32 %v1586_v54, %v1600_v59 }
 0x86f   : > { %v1605_v16 = vmul.f32 %v1601_v60, %v1601_v60  ;;  %v1606_v52 = vmul.f32 %v1602_v61, %v1602_v61  ;;  %v1607_v63 = vmul.f32 %v1603_v0, %v1603_v0  ;;  %v1608_v17 = vmul.f32 %v1604_v12, %v1604_v12 }
 0x871   : > { %v1609_v49 = vsel %vm3229_vm6, %v1605_v16, 0.0  ;;  %v1610_v18 = vsel %vm3229_vm6, %v1606_v52, 0.0  ;;  %v1612_v27 = vsel %vm3229_vm6, %v1607_v63, 0.0  ;;  %v1614_v29 = vsel %vm3229_vm6, %v1608_v17, 0.0 }
 0x872   : > { %v1611_v21 = vadd.f32 %v1610_v18, %v1609_v49 }
 0x873   : > { %v1088_v59 = vpop.permute.xlu1 %1087 }
 0x874   : > { %v1613_v28 = vadd.f32 %v1612_v27, %v1611_v21  ;;  %v1682_v21 = vpop.permute.xlu0 %1681 }
 0x876   : > { %v1615_v13 = vadd.f32 %v1614_v29, %v1613_v28 }
 0x878   : > { %v1616_v14 = vrot.slane %v1615_v13, 4 }
 0x87a   : > { %v1617_v45 = vadd.f32 %v1616_v14, %v1615_v13 }
 0x87c   : > { %v1618_v47 = vrot.slane %v1617_v45, 2 }
 0x87e   : > { %v1619_v48 = vadd.f32 %v1618_v47, %v1617_v45 }
 0x880   : > { %v1620_v30 = vrot.slane %v1619_v48, 1 }
 0x882   : > { %v1621_v32 = vadd.f32 %v1620_v30, %v1619_v48 }
 0x884   : > { %v1622_v38 = vmul.f32 %v1621_v32, %v2785_v19 }
 0x886   : > { %v1623_v22 = vadd.f32 1e-05, %v1622_v38 }
 0x888   : > { %2406 = vrsqrt.f32 %v1623_v22  ;;  %vm1630_vm5 = vweird.f32 %v1623_v22 }
 0x88e   : > { %v2407_v25 = vpop.eup %2406 }
 0x88f   : > { %v1625_v20 = vmul.f32 %v2407_v25, %v1623_v22  ;;  %vm1631_vm4 = vweird.f32 %v2407_v25 }
 0x890   : > { %vm1632_vm7 = vmor %vm1630_vm5, %vm1631_vm4 }
 0x891   : > { %v1626_v37 = vmul.f32 %v2407_v25, %v1625_v20 }
 0x893   : > { %v1627_v26 = vmul.f32 0.5, %v1626_v37 }
 0x895   : > { %v1628_v43 = vsub.f32 1.5, %v1627_v26 }
 0x897   : > { %v1629_v34 = vmul.f32 %v2407_v25, %v1628_v43 }
 0x899   : > { %v1633_v40 = vsel %vm1632_vm7, %v2407_v25, %v1629_v34 }
 0x89a   : > { %v1636_v19 = vmul.f32 %v1633_v40, %v1603_v0  ;;  %v1637_v36 = vmul.f32 %v1633_v40, %v1604_v12  ;;  %v1634_v44 = vmul.f32 %v1633_v40, %v1601_v60  ;;  %v1635_v33 = vmul.f32 %v1633_v40, %v1602_v61  ;;  %v1098_v61 = vpop.permute.xlu1 %1097 }
 0x89b   : > { %v1084_v0 = vperm.slane %v3075_v50, 0 }
 0x89c   : > { %v1656_v51 = vmul.f32 %v1648_v31, %v1636_v19  ;;  %v1657_v39 = vmul.f32 %v3059_v58, %v1637_v36  ;;  %v1654_v53 = vmul.f32 %v3062_v62, %v1634_v44  ;;  %v1655_v54 = vmul.f32 %v1644_v42, %v1635_v33  ;;  %v1710_v58 = vpop.permute.xlu2 %1709 }
 0x89d   : > { %vm1107_vm8 = vcmp.gt.f32.partialorder %v1084_v0, %v1098_v61  ;;  %vm1105_vm10 = vcmp.gt.f32.partialorder %v1084_v0, %v1088_v59 }
 0x89e   : > { %v1676_v55 = vadd.f32 %v1668_v24, %v1656_v51  ;;  %v1677_v41 = vadd.f32 %v1672_v35, %v1657_v39  ;;  %v1674_v57 = vadd.f32 %v3064_v3, %v1654_v53  ;;  %v1675_v15 = vadd.f32 %v1664_v2, %v1655_v54 }
 0x89f   : > { %v1111_v3 = vsel %vm1107_vm8, 1, %v2509_v46  ;;  %v1109_v52 = vsel %vm1105_vm10, 1, %v2509_v46  ;;  %v1753_v53 = vadd.s32 48, %v2627_v1  ;;  %v1754_v54 = vadd.s32 56, %v2627_v1 }
 0x8a0   : > { %v1679_v56 = vpack.c.bf16 %v1677_v41, %v1676_v55  ;;  %v1678_v6 = vpack.c.bf16 %v1675_v15, %v1674_v57  ;;  %v1115_v63 = vsel %vm3229_vm6, %v1111_v3, 0  ;;  %v1113_v49 = vsel %vm3229_vm6, %v1109_v52, 0 }
 0x8a1   : > { %v1751_v41 = vadd.s32 32, %v2627_v1  ;;  %v1752_v2 = vadd.s32 40, %v2627_v1  ;;  %v1750_v57 = vadd.s32 24, %v2627_v1  ;;  %v2518_v15 = vmov 1.0|1.0  }
 0x8a2   : > { %1693 = vmatpush.bf16.msrb.mxu1 %v1679_v56  ;;  %v1749_v56 = vadd.s32 16, %v2627_v1 }
 0x8a4   : > { %v1720_v62 = vpop.permute.xlu2 %1719 }
 0x8a6   : > { %1694 = vmatpush.bf16.msrb.mxu1 %v1678_v6  ;;  %v1748_v6 = vadd.s32 8, %v2627_v1 }
 0x8a9   : > { %2173 = vmatmul.msk.bf16.vlgmr.msrb.gmra.mxu1 %vm532_vm3, %v2112_v5  ;;  %v2232_v5 = vld [vmem:[%s3218_s7] sm:$0xff] }
 0x8ac   : > { %v1093_v60 = vpop.permute.xlu2 %1092 }
 0x8ad   : > { %vm1106_vm11 = vcmp.gt.f32.partialorder %v1084_v0, %v1093_v60 }
 0x8ae   : > { %v1110_v17 = vsel %vm1106_vm11, 1, %v2509_v46 }
 0x8af   : > { %v1114_v27 = vsel %vm3229_vm6, %v1110_v17, 0 }
 0x8b0   : > { %v1118_v28 = vadd.s32 %v1114_v27, %v1113_v49 }
 0x8b4   : > { %v1103_v12 = vpop.permute.xlu2 %1102 }
 0x8b5   : > { %vm1108_vm9 = vcmp.gt.f32.partialorder %v1084_v0, %v1103_v12  ;;  %v1725_v48 = vpop.permute.xlu0 %1724 }
 0x8b6   : > { %v1112_v16 = vsel %vm1108_vm9, 1, %v2509_v46 }
 0x8b7   : > { %v1117_v50 = vsel %vm1116_vm12, %v1112_v16, 0 }
 0x8b8   : > { %v1119_v18 = vadd.s32 %v1117_v50, %v1115_v63 }
 0x8ba   : > { %v1120_v29 = vadd.s32 %v1119_v18, %v1118_v28 }
 0x8bc   : > { %v1121_v45 = vrot.slane %v1120_v29, 4 }
 0x8be   : > { %v1122_v31 = vadd.s32 %v1121_v45, %v1120_v29 }
 0x8c0   : > { %v1123_v43 = vrot.slane %v1122_v31, 2 }
 0x8c2   : > { %v1124_v19 = vadd.s32 %v1123_v43, %v1122_v31 }
 0x8c4   : > { %v1125_v33 = vrot.slane %v1124_v19, 1 }
 0x8c6   : > { %v1126_v51 = vadd.s32 %v1125_v33, %v1124_v19 }
 0x8c8   : > { %vm1761_vm0 = vcmp.eq.s32.totalorder %v1753_v53, %v1126_v51  ;;  %vm1762_vm4 = vcmp.eq.s32.totalorder %v1754_v54, %v1126_v51  ;;  %vm1759_vm11 = vcmp.eq.s32.totalorder %v1751_v41, %v1126_v51 }
 0x926   : > { %v1696_v13 = vpop.f32.mrf.mxu1 }
 0x927   : > { %v1697_v14 = vadd.f32 %v1696_v13, %v1682_v21 }
 0x929   : > { %v1700_v47 = vmul.f32 %v3071_v4, %v1697_v14 }
 0x92b   : > { %v1706_v30 = vperm.slane %v1700_v47, 0  ;;  %1850 = vst.msk [vmem:[%s3230_s0] sm:$0x1] %vm1848_vm2, %v1700_v47  ;;  %s1876_s0 = sshll.u32 %s1872_s18, 4  ;;  %s1877_s0 = int_to_ptr.hbm [resolvable:$true] %s1876_s0 }
 0x92c   : > { %s2423_s30 = sshra.s32 %s1877_s0, 4  ;;  %s2424_s30 = int_to_ptr.hbm [resolvable:$true] %s2423_s30 }
 0x92d   : > { %vm1727_vm3 = vcmp.gt.f32.partialorder %v1706_v30, %v1710_v58  ;;  %vm1728_vm13 = vcmp.gt.f32.partialorder %v1706_v30, %v1715_v7  ;;  %vm1729_vm14 = vcmp.gt.f32.partialorder %v1706_v30, %v1720_v62  ;;  %vm1730_vm15 = vcmp.gt.f32.partialorder %v1706_v30, %v1725_v48  ;;  %v2233_v58 = vld [vmem:[%s3218_s7 + $0x8] sm:$0xff]  ;;  %s2425_s1 = scalar_lea.hbm %s2424_s30, 1  ;;  %p2430_p0 = scmp.lt.s32.totalorder %s2424_s30, %s3220_s9 }
 0x92e   : > { %v1731_v32 = vsel %vm1727_vm3, 1, %v2509_v46  ;;  %v1732_v38 = vsel %vm1728_vm13, 1, %v2509_v46  ;;  %v1733_v22 = vsel %vm1729_vm14, 1, %v2509_v46  ;;  %v1734_v23 = vsel %vm1730_vm15, 1, %v2509_v46  ;;  %v1698_v4 = vpop.f32.mrf.mxu1  ;;  %p2426_p11 = scmp.ne.s32.totalorder %s2424_s30, %s2425_s1  ;;  %p2431_p1 = scmp.lt.s32.totalorder %s2429_s2, %s2425_s1 }
 0x92f   : > { %v1735_v24 = vsel %vm3229_vm6, %v1731_v32, 0  ;;  %v1736_v25 = vsel %vm3229_vm6, %v1732_v38, 0  ;;  %v1737_v20 = vsel %vm3229_vm6, %v1733_v22, 0  ;;  %v1738_v37 = vsel %vm1116_vm12, %v1734_v23, 0 }
 0x930   : > { %v1739_v26 = vadd.s32 %v1736_v25, %v1735_v24  ;;  %v1740_v42 = vadd.s32 %v1738_v37, %v1737_v20  ;;  %vm1760_vm12 = vcmp.eq.s32.totalorder %v1752_v2, %v1126_v51  ;;  %p2427_p12 = pnand %p2426_p11, %p2612_p5  ;;  %p2432_p2 = por %p2431_p1, %p2430_p0 }
 0x932   : > { %v1741_v34 = vadd.s32 %v1740_v42, %v1739_v26  ;;  %p2428_p13 = pneg %p2427_p12 }
 0x934   : > { %v1742_v40 = vrot.slane %v1741_v34, 4  ;;  %p2433_p3 = pnand %p2432_p2, %p2428_p13 }
 0x936   : > { %v1743_v36 = vadd.s32 %v1742_v40, %v1741_v34 }
 0x938   : > { %v1744_v44 = vrot.slane %v1743_v36, 2 }
 0x93a   : > { %v1745_v35 = vadd.s32 %v1744_v44, %v1743_v36 }
 0x93c   : > { %v1746_v46 = vrot.slane %v1745_v35, 1 }
 0x93e   : > { %v1747_v39 = vadd.s32 %v1746_v46, %v1745_v35 }
 0x940   : > { %v1763_v55 = vadd.s32 32, %v1747_v39 }
 0x942   : > { %vm1770_vm1 = vcmp.eq.s32.totalorder %v1753_v53, %v1763_v55  ;;  %vm1771_vm2 = vcmp.eq.s32.totalorder %v1754_v54, %v1763_v55  ;;  %vm1768_vm7 = vcmp.eq.s32.totalorder %v1751_v41, %v1763_v55  ;;  %vm1769_vm9 = vcmp.eq.s32.totalorder %v1752_v2, %v1763_v55 }
 0x943   : > { %vm1778_vm5 = vmor %vm1761_vm0, %vm1770_vm1  ;;  %vm1766_vm13 = vcmp.eq.s32.totalorder %v1749_v56, %v1763_v55  ;;  %vm1767_vm15 = vcmp.eq.s32.totalorder %v1750_v57, %v1763_v55  ;;  %vm1757_vm0 = vcmp.eq.s32.totalorder %v1749_v56, %v1126_v51  ;;  %vm1758_vm1 = vcmp.eq.s32.totalorder %v1750_v57, %v1126_v51 }
 0x944   : > { %vm1779_vm8 = vmor %vm1762_vm4, %vm1771_vm2 }
 0x945   : > { %vm2194_vm10 = vmpackc.low %vm1779_vm8, %vm1778_vm5  ;;  %vm1764_vm5 = vcmp.eq.s32.totalorder %v2627_v1, %v1763_v55  ;;  %vm1765_vm8 = vcmp.eq.s32.totalorder %v1748_v6, %v1763_v55 }
 0x946   : > { %2195 = vmatpush.bf16.msk.msrb.mxu2 %vm2194_vm10, %v2518_v15  ;;  %vm1776_vm3 = vmor %vm1759_vm11, %vm1768_vm7  ;;  %vm1755_vm7 = vcmp.eq.s32.totalorder %v2627_v1, %v1126_v51  ;;  %vm1756_vm11 = vcmp.eq.s32.totalorder %v1748_v6, %v1126_v51 }
 0x947   : > { %vm1777_vm14 = vmor %vm1760_vm12, %vm1769_vm9 }
 0x948   : > { %vm2196_vm6 = vmpackc.low %vm1777_vm14, %vm1776_vm3 }
 0x949   : > { %vm1774_vm2 = vmor %vm1757_vm0, %vm1766_vm13 }
 0x94a   : > { %2197 = vmatpush.bf16.msk.msrb.mxu2 %vm2196_vm6, %v2518_v15  ;;  %vm1775_vm4 = vmor %vm1758_vm1, %vm1767_vm15  ;;  %vm1814_vm6 = vcmask 523264  }
 0x94b   : > { %vm2198_vm10 = vmpackc.low %vm1775_vm4, %vm1774_vm2 }
 0x94c   : > { %vm1772_vm9 = vmor %vm1755_vm7, %vm1764_vm5 }
 0x94d   : > { %vm1773_vm12 = vmor %vm1756_vm11, %vm1765_vm8 }
 0x94e   : > { %2199 = vmatpush.bf16.msk.msrb.mxu2 %vm2198_vm10, %v2518_v15  ;;  %vm2200_vm3 = vmpackc.low %vm1773_vm12, %vm1772_vm9 }
 0x952   : > { %2201 = vmatpush.bf16.msk.msrb.mxu2 %vm2200_vm3, %v2518_v15 }
 0x955   : > { %2202 = vmatmul.msk.bf16.vlgmr.msrb.gmra.mxu2 %vm1814_vm6, %v2232_v5 }
 0x965   : > { %2203 = vmatmul.msk.bf16.gmra.mxu2 %vm1814_vm6, %v2233_v58 }
 0x966   : > { %2436 = shalt.err (!%p2433_p3)
}
 0x967   : > { %2234 = dma.vmem_to_hbm [thread:$0]  (%p2612_p5), %s1875_s20, 16, %s1877_s0, %s1857_s21  }
 0x968   : > { %s1885_s18 = scalar_lea.hbm %s3221_s10, %s2595_s17  ;;  %s3246_s11 = scalar_lea.vmem [#allocation4], %s3068_s12 }
 0x969   : > { %s1887_s29 = sshll.u32 %s3246_s11, 4  ;;  %s1889_s4 = sshll.u32 %s1885_s18, 4  ;;  %s1888_s29 = int_to_ptr.vmem [resolvable:$true] %s1887_s29  ;;  %s1890_s4 = int_to_ptr.hbm [resolvable:$true] %s1889_s4 }
 0x96a   : > { %s1861_s1 = scalar_lea.sflag [#allocation5], %s3068_s12  ;;  %s2451_s2 = sshra.s32 %s1890_s4, 4  ;;  %s2452_s2 = int_to_ptr.hbm [resolvable:$true] %s2451_s2 }
 0x96b   : > { %s2453_s3 = scalar_lea.hbm %s2452_s2, 1  ;;  %s2457_s0 = scalar_lea.hbm %s3221_s10, 2 }
 0x96c   : > { %p2454_p4 = scmp.ne.s32.totalorder %s2452_s2, %s2453_s3  ;;  %p2458_p9 = scmp.lt.s32.totalorder %s2452_s2, %s3221_s10 }
 0x96d   : > { %p2459_p10 = scmp.lt.s32.totalorder %s2457_s0, %s2453_s3 }
 0x96e   : > { %p2455_p7 = pnand %p2454_p4, %p2612_p5 }
 0x96f   : > { %p2460_p11 = por %p2459_p10, %p2458_p9 }
 0x970   : > { %p2456_p8 = pneg %p2455_p7 }
 0x972   : > { %p2461_p12 = pnand %p2460_p11, %p2456_p8 }
 0x974   : > { %2464 = shalt.err (!%p2461_p12)
}
 0x975   : > { %2235 = dma.vmem_to_hbm [thread:$0]  (%p2612_p5), %s1888_s29, 16, %s1890_s4, %s1861_s1   ;;  %vm3248_vm13 = vcmask 130048  }
 0x976   : > { %s3247_s17 = sshll.u32 %s2624_s25, 5  ;;  %vm3249_vm14 = vmmov %vm3248_vm13 }
 0x977   : > { %s392_s27 = scalar_lea.vmem %s3219_s8, %s3247_s17  ;;  %vm3250_vm15 = vmmov %vm3248_vm13 }
 0x978   : > { %vm3251_vm0 = vmmov %vm3248_vm13 }
 0x9d8   : > { %v1830_v1 = vpop.f32.mrf.mxu2 }
 0x9d9   : > { %v1840_v7 = vadd.f32 %v1830_v1, %v2643_v8 }
 0x9db   : > { %1844 = vst.msk [vmem:[%s392_s27] sm:$0xff] %vm3248_vm13, %v1840_v7 }
 0x9e0   : > { %v1832_v62 = vpop.f32.mrf.mxu2 }
 0x9e1   : > { %v1841_v59 = vadd.f32 %v1832_v62, %v2645_v9 }
 0x9e3   : > { %1845 = vst.msk [vmem:[%s392_s27 + $0x8] sm:$0xff] %vm3249_vm14, %v1841_v59 }
 0x9e8   : > { %v1835_v60 = vpop.f32.mrf.mxu2 }
 0x9e9   : > { %v1842_v61 = vadd.f32 %v1835_v60, %v2647_v10 }
 0x9eb   : > { %1846 = vst.msk [vmem:[%s392_s27 + $0x10] sm:$0xff] %vm3250_vm15, %v1842_v61 }
 0x9f0   : > { %v1837_v0 = vpop.f32.mrf.mxu2 }
 0x9f1   : > { %v1843_v12 = vadd.f32 %v1837_v0, %v2649_v11 }
 0x9f3   : > { %1847 = vst.msk [vmem:[%s392_s27 + $0x18] sm:$0xff] %vm3251_vm0, %v1843_v12 }
 0x9f4 PF: > { %p2245_p5 = scmp.ge.s32.totalorder %s2503_s16, 2  ;;  %s1909_s4 = sand.u32 1, %s2491_s13  }
 0x9f5   : > { %s1910_s23 = scalar_lea.sflag [#allocation3], %s1909_s4 }
 0x9f6   : > { %p2239_p13 = pnand %p2245_p5, %p2616_p6 }
 0x9f8   : > { %p2240_p0 = pneg %p2239_p13 }
 0x9fa   : > { %2482 = dma.done.wait (%p2240_p0), %s1910_s23, 16  }
 0x9fb   : > { %2484 = vsyncadd (%p2240_p0), %s1910_s23, 4294967280  ;;  %s1919_s25 = scalar_lea.sflag [#allocation5], %s1909_s4 }
 0x9fc   : > { %2486 = dma.done.wait (%p2240_p0), %s1919_s25, 16  }
 0x9fd   : > { %2488 = vsyncadd (%p2240_p0), %s1919_s25, 4294967280  ;;  %p24_p1 = scmp.ge.s32.totalorder %s2599_s19, 4   ;;  %s3252_s13 = smov %s2495_s14 }
 0x9fe   : > { %s3253_s14 = smov %s2499_s15  ;;  %s3254_s15 = smov %s2610_s22 }
 0x9ff   : > { %s3255_s16 = smov %s2599_s19  ;;  %26 = sbr.rel (!%p24_p1) target bundleno = 11 (0xb), region = 124 }
 0xa04   :  { %1924 = vsyncpa [#allocation3], 1 }
 0xa05   :  { %1926 = vsyncpa [#allocation3 + $0x1], 1 }
 0xa06   :  { %1927 = vsyncpa [#allocation5], 1 }
 0xa07   :  { %1929 = vsyncpa [#allocation5 + $0x1], 1 }

</bundles_post_ra>
